<compile_context>
chip_gen: v7x
topology: tpu7x:2x2x1
jax: 0.10.0
libtpu: 0.0.40
codegen_flags: <defaults>
</compile_context>

<pallas_src>
import jax
import jax.numpy as jnp
from jax.experimental import pallas as pl
from jax.experimental.pallas import tpu as pltpu

HIDDEN = 5
INPUT_FEATURES = 4
OUTPUT_CLASSES = 1

LANES = 128        # lane width of a dense tile
BLOCK_ROWS = 256   # sublane-rows per grid step -> 256*128 = 32768 samples/step
CHUNK_ROWS = 32    # sublane-rows per inner compute slab (4 f32 vregs wide)


def _mlp_kernel(x_ref, w1_ref, b1_ref, w2_ref, b2_ref, o_ref):
    # x_ref: (INPUT_FEATURES, BLOCK_ROWS, LANES) in VMEM, batch on (rows, lanes)
    # w1_ref: (HIDDEN, INPUT_FEATURES), b1_ref: (HIDDEN,),
    # w2_ref: (OUTPUT_CLASSES, HIDDEN), b2_ref: (OUTPUT_CLASSES,)  -- SMEM scalars
    # o_ref: (BLOCK_ROWS, LANES) in VMEM
    #
    # Strip-mine the block in CHUNK_ROWS-row slabs; static offsets keep slices
    # aligned and the per-slab store bounds the live vreg set (~25 vregs).
    for c in range(BLOCK_ROWS // CHUNK_ROWS):
        r = c * CHUNK_ROWS
        # 4 dense (CHUNK_ROWS, 128) loads, one per input feature.
        xs = [x_ref[i, r:r + CHUNK_ROWS, :] for i in range(INPUT_FEATURES)]

        acc = None
        for j in range(HIDDEN):
            # h[j] = b1[j] + sum_i w1[j, i] * x[i]   (pure VPU scalar*vector MACs)
            h = xs[0] * w1_ref[j, 0]
            for i in range(1, INPUT_FEATURES):
                h = h + xs[i] * w1_ref[j, i]
            h = jax.nn.sigmoid(h + b1_ref[j])          # EUP transcendental
            t = h * w2_ref[0, j]
            acc = t if acc is None else acc + t

        # o = b2[0] + sum_j w2[0, j] * sigmoid(h[j]); dense unmasked vst.
        o_ref[r:r + CHUNK_ROWS, :] = (acc + b2_ref[0]).astype(o_ref.dtype)


def net_forward(x, w1, b1, w2, b2):
    """x: (B, INPUT_FEATURES) -> (B, OUTPUT_CLASSES).

    Weights use the PyTorch layout: w1 (HIDDEN, IN), b1 (HIDDEN,),
    w2 (OUT, HIDDEN), b2 (OUT,).
    """
    B = x.shape[0]
    n_rows = pl.cdiv(B, LANES)          # 128-lane rows of batch
    Bp = n_rows * LANES

    # Feature-major + dense (rows, lanes) layout; single fused XLA copy.
    xb = x.T                            # (INPUT_FEATURES, B)
    if Bp != B:
        xb = jnp.pad(xb, ((0, 0), (0, Bp - B)))
    xb = xb.reshape(INPUT_FEATURES, n_rows, LANES)

    smem_spec = pl.BlockSpec(memory_space=pltpu.MemorySpace.SMEM)
    grid = (pl.cdiv(n_rows, BLOCK_ROWS),)   # partial trailing block handled by Pallas

    out = pl.pallas_call(
        _mlp_kernel,
        out_shape=jax.ShapeDtypeStruct((n_rows, LANES), x.dtype),
        grid=grid,
        in_specs=[
            pl.BlockSpec((INPUT_FEATURES, BLOCK_ROWS, LANES), lambda i: (0, i, 0)),
            smem_spec,  # w1
            smem_spec,  # b1
            smem_spec,  # w2
            smem_spec,  # b2
        ],
        out_specs=pl.BlockSpec((BLOCK_ROWS, LANES), lambda i: (i, 0)),
        compiler_params=pltpu.CompilerParams(
            dimension_semantics=("parallel",),
        ),
    )(xb, w1, b1, w2, b2)

    # Output is already batch-major: flatten, drop the 128-pad tail, add feature dim.
    return out.reshape(-1)[:B].reshape(B, OUTPUT_CLASSES)


def init_params(key):
    """PyTorch-Linear-style init: U(-1/sqrt(fan_in), +), PyTorch layouts."""
    k1, k2, k3, k4 = jax.random.split(key, 4)
    bound1 = 1.0 / jnp.sqrt(INPUT_FEATURES)
    bound2 = 1.0 / jnp.sqrt(HIDDEN)
    w1 = jax.random.uniform(k1, (HIDDEN, INPUT_FEATURES), jnp.float32, -bound1, bound1)
    b1 = jax.random.uniform(k2, (HIDDEN,), jnp.float32, -bound1, bound1)
    w2 = jax.random.uniform(k3, (OUTPUT_CLASSES, HIDDEN), jnp.float32, -bound2, bound2)
    b2 = jax.random.uniform(k4, (OUTPUT_CLASSES,), jnp.float32, -bound2, bound2)
    return w1, b1, w2, b2


def reference_forward(x, w1, b1, w2, b2):
    h = jax.nn.sigmoid(x @ w1.T + b1)
    return h @ w2.T + b2


if __name__ == "__main__":
    key = jax.random.PRNGKey(0)
    k_params, k_x1, k_x2 = jax.random.split(key, 3)
    w1, b1, w2, b2 = init_params(k_params)

    # Small batch: pads to one 128-lane row, single (partial) grid block.
    batch = 8
    x = jax.random.normal(k_x1, (batch, INPUT_FEATURES), jnp.float32)
    out = jax.block_until_ready(net_forward(x, w1, b1, w2, b2))
    ref = reference_forward(x, w1, b1, w2, b2)
    assert out.shape == (batch, OUTPUT_CLASSES)
    assert jnp.allclose(out, ref, atol=1e-5, rtol=1e-5)

    # Ragged batch spanning two grid steps (second block partial: 258 rows).
    batch2 = 33000
    x2 = jax.random.normal(k_x2, (batch2, INPUT_FEATURES), jnp.float32)
    out2 = jax.block_until_ready(net_forward(x2, w1, b1, w2, b2))
    ref2 = reference_forward(x2, w1, b1, w2, b2)
    assert out2.shape == (batch2, OUTPUT_CLASSES)
    assert jnp.allclose(out2, ref2, atol=1e-5, rtol=1e-5)

    print("KERNEL_OK")
</pallas_src>

<mosaic_0001>
module attributes {stable_mosaic.version = 11 : i64} {
  func.func @_mlp_kernel(%arg0: i32, %arg1: memref<4x256x128xf32, #tpu.memory_space<vmem>>, %arg2: memref<5x4xf32, #tpu.memory_space<smem>>, %arg3: memref<5xf32, #tpu.memory_space<smem>>, %arg4: memref<1x5xf32, #tpu.memory_space<smem>>, %arg5: memref<1xf32, #tpu.memory_space<smem>>, %arg6: memref<256x128xf32, #tpu.memory_space<vmem>>) attributes {dimension_semantics = [#tpu.dimension_semantics<parallel>], iteration_bounds = array<i64: 1>, scalar_prefetch = 0 : i64, scratch_operands = 0 : i64, tpu.core_type = #tpu.core_type<tc>, window_params = [{transform_indices = @transform_0, window_bounds = array<i64: 4, 256, 128>}, {transform_indices = @transform_1, window_bounds = array<i64: 5, 4>}, {transform_indices = @transform_2, window_bounds = array<i64: 5>}, {transform_indices = @transform_3, window_bounds = array<i64: 1, 5>}, {transform_indices = @transform_4, window_bounds = array<i64: 1>}, {transform_indices = @transform_5, window_bounds = array<i64: 256, 128>}]} {
    %c0 = arith.constant 0 : index
    %c0_0 = arith.constant 0 : index
    %c0_1 = arith.constant 0 : index
    %0 = vector.load %arg1[%c0, %c0_0, %c0_1] : memref<4x256x128xf32, #tpu.memory_space<vmem>>, vector<1x32x128xf32>
    %1 = vector.shape_cast %0 : vector<1x32x128xf32> to vector<32x128xf32>
    %c1 = arith.constant 1 : index
    %c0_2 = arith.constant 0 : index
    %c0_3 = arith.constant 0 : index
    %2 = vector.load %arg1[%c1, %c0_2, %c0_3] : memref<4x256x128xf32, #tpu.memory_space<vmem>>, vector<1x32x128xf32>
    %3 = vector.shape_cast %2 : vector<1x32x128xf32> to vector<32x128xf32>
    %c2 = arith.constant 2 : index
    %c0_4 = arith.constant 0 : index
    %c0_5 = arith.constant 0 : index
    %4 = vector.load %arg1[%c2, %c0_4, %c0_5] : memref<4x256x128xf32, #tpu.memory_space<vmem>>, vector<1x32x128xf32>
    %5 = vector.shape_cast %4 : vector<1x32x128xf32> to vector<32x128xf32>
    %c3 = arith.constant 3 : index
    %c0_6 = arith.constant 0 : index
    %c0_7 = arith.constant 0 : index
    %6 = vector.load %arg1[%c3, %c0_6, %c0_7] : memref<4x256x128xf32, #tpu.memory_space<vmem>>, vector<1x32x128xf32>
    %7 = vector.shape_cast %6 : vector<1x32x128xf32> to vector<32x128xf32>
    %c0_8 = arith.constant 0 : index
    %c0_9 = arith.constant 0 : index
    %8 = memref.load %arg2[%c0_8, %c0_9] : memref<5x4xf32, #tpu.memory_space<smem>>
    %9 = vector.broadcast %8 : f32 to vector<32x128xf32>
    %10 = arith.mulf %1, %9 : vector<32x128xf32>
    %c0_10 = arith.constant 0 : index
    %c1_11 = arith.constant 1 : index
    %11 = memref.load %arg2[%c0_10, %c1_11] : memref<5x4xf32, #tpu.memory_space<smem>>
    %12 = vector.broadcast %11 : f32 to vector<32x128xf32>
    %13 = arith.mulf %3, %12 : vector<32x128xf32>
    %14 = arith.addf %10, %13 : vector<32x128xf32>
    %c0_12 = arith.constant 0 : index
    %c2_13 = arith.constant 2 : index
    %15 = memref.load %arg2[%c0_12, %c2_13] : memref<5x4xf32, #tpu.memory_space<smem>>
    %16 = vector.broadcast %15 : f32 to vector<32x128xf32>
    %17 = arith.mulf %5, %16 : vector<32x128xf32>
    %18 = arith.addf %14, %17 : vector<32x128xf32>
    %c0_14 = arith.constant 0 : index
    %c3_15 = arith.constant 3 : index
    %19 = memref.load %arg2[%c0_14, %c3_15] : memref<5x4xf32, #tpu.memory_space<smem>>
    %20 = vector.broadcast %19 : f32 to vector<32x128xf32>
    %21 = arith.mulf %7, %20 : vector<32x128xf32>
    %22 = arith.addf %18, %21 : vector<32x128xf32>
    %c0_16 = arith.constant 0 : index
    %23 = memref.load %arg3[%c0_16] : memref<5xf32, #tpu.memory_space<smem>>
    %24 = vector.broadcast %23 : f32 to vector<32x128xf32>
    %25 = arith.addf %22, %24 : vector<32x128xf32>
    %26 = arith.negf %25 : vector<32x128xf32>
    %27 = math.exp %26 : vector<32x128xf32>
    %cst = arith.constant 1.000000e+00 : f32
    %28 = vector.broadcast %cst : f32 to vector<32x128xf32>
    %29 = arith.addf %28, %27 : vector<32x128xf32>
    %30 = arith.divf %28, %29 : vector<32x128xf32>
    %c0_17 = arith.constant 0 : index
    %c0_18 = arith.constant 0 : index
    %31 = memref.load %arg4[%c0_17, %c0_18] : memref<1x5xf32, #tpu.memory_space<smem>>
    %32 = vector.broadcast %31 : f32 to vector<32x128xf32>
    %33 = arith.mulf %30, %32 : vector<32x128xf32>
    %c1_19 = arith.constant 1 : index
    %c0_20 = arith.constant 0 : index
    %34 = memref.load %arg2[%c1_19, %c0_20] : memref<5x4xf32, #tpu.memory_space<smem>>
    %35 = vector.broadcast %34 : f32 to vector<32x128xf32>
    %36 = arith.mulf %1, %35 : vector<32x128xf32>
    %c1_21 = arith.constant 1 : index
    %c1_22 = arith.constant 1 : index
    %37 = memref.load %arg2[%c1_21, %c1_22] : memref<5x4xf32, #tpu.memory_space<smem>>
    %38 = vector.broadcast %37 : f32 to vector<32x128xf32>
    %39 = arith.mulf %3, %38 : vector<32x128xf32>
    %40 = arith.addf %36, %39 : vector<32x128xf32>
    %c1_23 = arith.constant 1 : index
    %c2_24 = arith.constant 2 : index
    %41 = memref.load %arg2[%c1_23, %c2_24] : memref<5x4xf32, #tpu.memory_space<smem>>
    %42 = vector.broadcast %41 : f32 to vector<32x128xf32>
    %43 = arith.mulf %5, %42 : vector<32x128xf32>
    %44 = arith.addf %40, %43 : vector<32x128xf32>
    %c1_25 = arith.constant 1 : index
    %c3_26 = arith.constant 3 : index
    %45 = memref.load %arg2[%c1_25, %c3_26] : memref<5x4xf32, #tpu.memory_space<smem>>
    %46 = vector.broadcast %45 : f32 to vector<32x128xf32>
    %47 = arith.mulf %7, %46 : vector<32x128xf32>
    %48 = arith.addf %44, %47 : vector<32x128xf32>
    %c1_27 = arith.constant 1 : index
    %49 = memref.load %arg3[%c1_27] : memref<5xf32, #tpu.memory_space<smem>>
    %50 = vector.broadcast %49 : f32 to vector<32x128xf32>
    %51 = arith.addf %48, %50 : vector<32x128xf32>
    %52 = arith.negf %51 : vector<32x128xf32>
    %53 = math.exp %52 : vector<32x128xf32>
    %cst_28 = arith.constant 1.000000e+00 : f32
    %54 = vector.broadcast %cst_28 : f32 to vector<32x128xf32>
    %55 = arith.addf %54, %53 : vector<32x128xf32>
    %56 = arith.divf %54, %55 : vector<32x128xf32>
    %c0_29 = arith.constant 0 : index
    %c1_30 = arith.constant 1 : index
    %57 = memref.load %arg4[%c0_29, %c1_30] : memref<1x5xf32, #tpu.memory_space<smem>>
    %58 = vector.broadcast %57 : f32 to vector<32x128xf32>
    %59 = arith.mulf %56, %58 : vector<32x128xf32>
    %60 = arith.addf %33, %59 : vector<32x128xf32>
    %c2_31 = arith.constant 2 : index
    %c0_32 = arith.constant 0 : index
    %61 = memref.load %arg2[%c2_31, %c0_32] : memref<5x4xf32, #tpu.memory_space<smem>>
    %62 = vector.broadcast %61 : f32 to vector<32x128xf32>
    %63 = arith.mulf %1, %62 : vector<32x128xf32>
    %c2_33 = arith.constant 2 : index
    %c1_34 = arith.constant 1 : index
    %64 = memref.load %arg2[%c2_33, %c1_34] : memref<5x4xf32, #tpu.memory_space<smem>>
    %65 = vector.broadcast %64 : f32 to vector<32x128xf32>
    %66 = arith.mulf %3, %65 : vector<32x128xf32>
    %67 = arith.addf %63, %66 : vector<32x128xf32>
    %c2_35 = arith.constant 2 : index
    %c2_36 = arith.constant 2 : index
    %68 = memref.load %arg2[%c2_35, %c2_36] : memref<5x4xf32, #tpu.memory_space<smem>>
    %69 = vector.broadcast %68 : f32 to vector<32x128xf32>
    %70 = arith.mulf %5, %69 : vector<32x128xf32>
    %71 = arith.addf %67, %70 : vector<32x128xf32>
    %c2_37 = arith.constant 2 : index
    %c3_38 = arith.constant 3 : index
    %72 = memref.load %arg2[%c2_37, %c3_38] : memref<5x4xf32, #tpu.memory_space<smem>>
    %73 = vector.broadcast %72 : f32 to vector<32x128xf32>
    %74 = arith.mulf %7, %73 : vector<32x128xf32>
    %75 = arith.addf %71, %74 : vector<32x128xf32>
    %c2_39 = arith.constant 2 : index
    %76 = memref.load %arg3[%c2_39] : memref<5xf32, #tpu.memory_space<smem>>
    %77 = vector.broadcast %76 : f32 to vector<32x128xf32>
    %78 = arith.addf %75, %77 : vector<32x128xf32>
    %79 = arith.negf %78 : vector<32x128xf32>
    %80 = math.exp %79 : vector<32x128xf32>
    %cst_40 = arith.constant 1.000000e+00 : f32
    %81 = vector.broadcast %cst_40 : f32 to vector<32x128xf32>
    %82 = arith.addf %81, %80 : vector<32x128xf32>
    %83 = arith.divf %81, %82 : vector<32x128xf32>
    %c0_41 = arith.constant 0 : index
    %c2_42 = arith.constant 2 : index
    %84 = memref.load %arg4[%c0_41, %c2_42] : memref<1x5xf32, #tpu.memory_space<smem>>
    %85 = vector.broadcast %84 : f32 to vector<32x128xf32>
    %86 = arith.mulf %83, %85 : vector<32x128xf32>
    %87 = arith.addf %60, %86 : vector<32x128xf32>
    %c3_43 = arith.constant 3 : index
    %c0_44 = arith.constant 0 : index
    %88 = memref.load %arg2[%c3_43, %c0_44] : memref<5x4xf32, #tpu.memory_space<smem>>
    %89 = vector.broadcast %88 : f32 to vector<32x128xf32>
    %90 = arith.mulf %1, %89 : vector<32x128xf32>
    %c3_45 = arith.constant 3 : index
    %c1_46 = arith.constant 1 : index
    %91 = memref.load %arg2[%c3_45, %c1_46] : memref<5x4xf32, #tpu.memory_space<smem>>
    %92 = vector.broadcast %91 : f32 to vector<32x128xf32>
    %93 = arith.mulf %3, %92 : vector<32x128xf32>
    %94 = arith.addf %90, %93 : vector<32x128xf32>
    %c3_47 = arith.constant 3 : index
    %c2_48 = arith.constant 2 : index
    %95 = memref.load %arg2[%c3_47, %c2_48] : memref<5x4xf32, #tpu.memory_space<smem>>
    %96 = vector.broadcast %95 : f32 to vector<32x128xf32>
    %97 = arith.mulf %5, %96 : vector<32x128xf32>
    %98 = arith.addf %94, %97 : vector<32x128xf32>
    %c3_49 = arith.constant 3 : index
    %c3_50 = arith.constant 3 : index
    %99 = memref.load %arg2[%c3_49, %c3_50] : memref<5x4xf32, #tpu.memory_space<smem>>
    %100 = vector.broadcast %99 : f32 to vector<32x128xf32>
    %101 = arith.mulf %7, %100 : vector<32x128xf32>
    %102 = arith.addf %98, %101 : vector<32x128xf32>
    %c3_51 = arith.constant 3 : index
    %103 = memref.load %arg3[%c3_51] : memref<5xf32, #tpu.memory_space<smem>>
    %104 = vector.broadcast %103 : f32 to vector<32x128xf32>
    %105 = arith.addf %102, %104 : vector<32x128xf32>
    %106 = arith.negf %105 : vector<32x128xf32>
    %107 = math.exp %106 : vector<32x128xf32>
    %cst_52 = arith.constant 1.000000e+00 : f32
    %108 = vector.broadcast %cst_52 : f32 to vector<32x128xf32>
    %109 = arith.addf %108, %107 : vector<32x128xf32>
    %110 = arith.divf %108, %109 : vector<32x128xf32>
    %c0_53 = arith.constant 0 : index
    %c3_54 = arith.constant 3 : index
    %111 = memref.load %arg4[%c0_53, %c3_54] : memref<1x5xf32, #tpu.memory_space<smem>>
    %112 = vector.broadcast %111 : f32 to vector<32x128xf32>
    %113 = arith.mulf %110, %112 : vector<32x128xf32>
    %114 = arith.addf %87, %113 : vector<32x128xf32>
    %c4 = arith.constant 4 : index
    %c0_55 = arith.constant 0 : index
    %115 = memref.load %arg2[%c4, %c0_55] : memref<5x4xf32, #tpu.memory_space<smem>>
    %116 = vector.broadcast %115 : f32 to vector<32x128xf32>
    %117 = arith.mulf %1, %116 : vector<32x128xf32>
    %c4_56 = arith.constant 4 : index
    %c1_57 = arith.constant 1 : index
    %118 = memref.load %arg2[%c4_56, %c1_57] : memref<5x4xf32, #tpu.memory_space<smem>>
    %119 = vector.broadcast %118 : f32 to vector<32x128xf32>
    %120 = arith.mulf %3, %119 : vector<32x128xf32>
    %121 = arith.addf %117, %120 : vector<32x128xf32>
    %c4_58 = arith.constant 4 : index
    %c2_59 = arith.constant 2 : index
    %122 = memref.load %arg2[%c4_58, %c2_59] : memref<5x4xf32, #tpu.memory_space<smem>>
    %123 = vector.broadcast %122 : f32 to vector<32x128xf32>
    %124 = arith.mulf %5, %123 : vector<32x128xf32>
    %125 = arith.addf %121, %124 : vector<32x128xf32>
    %c4_60 = arith.constant 4 : index
    %c3_61 = arith.constant 3 : index
    %126 = memref.load %arg2[%c4_60, %c3_61] : memref<5x4xf32, #tpu.memory_space<smem>>
    %127 = vector.broadcast %126 : f32 to vector<32x128xf32>
    %128 = arith.mulf %7, %127 : vector<32x128xf32>
    %129 = arith.addf %125, %128 : vector<32x128xf32>
    %c4_62 = arith.constant 4 : index
    %130 = memref.load %arg3[%c4_62] : memref<5xf32, #tpu.memory_space<smem>>
    %131 = vector.broadcast %130 : f32 to vector<32x128xf32>
    %132 = arith.addf %129, %131 : vector<32x128xf32>
    %133 = arith.negf %132 : vector<32x128xf32>
    %134 = math.exp %133 : vector<32x128xf32>
    %cst_63 = arith.constant 1.000000e+00 : f32
    %135 = vector.broadcast %cst_63 : f32 to vector<32x128xf32>
    %136 = arith.addf %135, %134 : vector<32x128xf32>
    %137 = arith.divf %135, %136 : vector<32x128xf32>
    %c0_64 = arith.constant 0 : index
    %c4_65 = arith.constant 4 : index
    %138 = memref.load %arg4[%c0_64, %c4_65] : memref<1x5xf32, #tpu.memory_space<smem>>
    %139 = vector.broadcast %138 : f32 to vector<32x128xf32>
    %140 = arith.mulf %137, %139 : vector<32x128xf32>
    %141 = arith.addf %114, %140 : vector<32x128xf32>
    %c0_66 = arith.constant 0 : index
    %142 = memref.load %arg5[%c0_66] : memref<1xf32, #tpu.memory_space<smem>>
    %143 = vector.broadcast %142 : f32 to vector<32x128xf32>
    %144 = arith.addf %141, %143 : vector<32x128xf32>
    %c0_67 = arith.constant 0 : index
    %c0_68 = arith.constant 0 : index
    %145 = vector.load %arg6[%c0_67, %c0_68] : memref<256x128xf32, #tpu.memory_space<vmem>>, vector<32x128xf32>
    tpu.vector_store %arg6[%c0_67, %c0_68], %144 {strides = array<i32>} : memref<256x128xf32, #tpu.memory_space<vmem>>, vector<32x128xf32>,
    %c0_69 = arith.constant 0 : index
    %c32 = arith.constant 32 : index
    %c0_70 = arith.constant 0 : index
    %146 = vector.load %arg1[%c0_69, %c32, %c0_70] : memref<4x256x128xf32, #tpu.memory_space<vmem>>, vector<1x32x128xf32>
    %147 = vector.shape_cast %146 : vector<1x32x128xf32> to vector<32x128xf32>
    %c1_71 = arith.constant 1 : index
    %c32_72 = arith.constant 32 : index
    %c0_73 = arith.constant 0 : index
    %148 = vector.load %arg1[%c1_71, %c32_72, %c0_73] : memref<4x256x128xf32, #tpu.memory_space<vmem>>, vector<1x32x128xf32>
    %149 = vector.shape_cast %148 : vector<1x32x128xf32> to vector<32x128xf32>
    %c2_74 = arith.constant 2 : index
    %c32_75 = arith.constant 32 : index
    %c0_76 = arith.constant 0 : index
    %150 = vector.load %arg1[%c2_74, %c32_75, %c0_76] : memref<4x256x128xf32, #tpu.memory_space<vmem>>, vector<1x32x128xf32>
    %151 = vector.shape_cast %150 : vector<1x32x128xf32> to vector<32x128xf32>
    %c3_77 = arith.constant 3 : index
    %c32_78 = arith.constant 32 : index
    %c0_79 = arith.constant 0 : index
    %152 = vector.load %arg1[%c3_77, %c32_78, %c0_79] : memref<4x256x128xf32, #tpu.memory_space<vmem>>, vector<1x32x128xf32>
    %153 = vector.shape_cast %152 : vector<1x32x128xf32> to vector<32x128xf32>
    %c0_80 = arith.constant 0 : index
    %c0_81 = arith.constant 0 : index
    %154 = memref.load %arg2[%c0_80, %c0_81] : memref<5x4xf32, #tpu.memory_space<smem>>
    %155 = vector.broadcast %154 : f32 to vector<32x128xf32>
    %156 = arith.mulf %147, %155 : vector<32x128xf32>
    %c0_82 = arith.constant 0 : index
    %c1_83 = arith.constant 1 : index
    %157 = memref.load %arg2[%c0_82, %c1_83] : memref<5x4xf32, #tpu.memory_space<smem>>
    %158 = vector.broadcast %157 : f32 to vector<32x128xf32>
    %159 = arith.mulf %149, %158 : vector<32x128xf32>
    %160 = arith.addf %156, %159 : vector<32x128xf32>
    %c0_84 = arith.constant 0 : index
    %c2_85 = arith.constant 2 : index
    %161 = memref.load %arg2[%c0_84, %c2_85] : memref<5x4xf32, #tpu.memory_space<smem>>
    %162 = vector.broadcast %161 : f32 to vector<32x128xf32>
    %163 = arith.mulf %151, %162 : vector<32x128xf32>
    %164 = arith.addf %160, %163 : vector<32x128xf32>
    %c0_86 = arith.constant 0 : index
    %c3_87 = arith.constant 3 : index
    %165 = memref.load %arg2[%c0_86, %c3_87] : memref<5x4xf32, #tpu.memory_space<smem>>
    %166 = vector.broadcast %165 : f32 to vector<32x128xf32>
    %167 = arith.mulf %153, %166 : vector<32x128xf32>
    %168 = arith.addf %164, %167 : vector<32x128xf32>
    %c0_88 = arith.constant 0 : index
    %169 = memref.load %arg3[%c0_88] : memref<5xf32, #tpu.memory_space<smem>>
    %170 = vector.broadcast %169 : f32 to vector<32x128xf32>
    %171 = arith.addf %168, %170 : vector<32x128xf32>
    %172 = arith.negf %171 : vector<32x128xf32>
    %173 = math.exp %172 : vector<32x128xf32>
    %cst_89 = arith.constant 1.000000e+00 : f32
    %174 = vector.broadcast %cst_89 : f32 to vector<32x128xf32>
    %175 = arith.addf %174, %173 : vector<32x128xf32>
    %176 = arith.divf %174, %175 : vector<32x128xf32>
    %c0_90 = arith.constant 0 : index
    %c0_91 = arith.constant 0 : index
    %177 = memref.load %arg4[%c0_90, %c0_91] : memref<1x5xf32, #tpu.memory_space<smem>>
    %178 = vector.broadcast %177 : f32 to vector<32x128xf32>
    %179 = arith.mulf %176, %178 : vector<32x128xf32>
    %c1_92 = arith.constant 1 : index
    %c0_93 = arith.constant 0 : index
    %180 = memref.load %arg2[%c1_92, %c0_93] : memref<5x4xf32, #tpu.memory_space<smem>>
    %181 = vector.broadcast %180 : f32 to vector<32x128xf32>
    %182 = arith.mulf %147, %181 : vector<32x128xf32>
    %c1_94 = arith.constant 1 : index
    %c1_95 = arith.constant 1 : index
    %183 = memref.load %arg2[%c1_94, %c1_95] : memref<5x4xf32, #tpu.memory_space<smem>>
    %184 = vector.broadcast %183 : f32 to vector<32x128xf32>
    %185 = arith.mulf %149, %184 : vector<32x128xf32>
    %186 = arith.addf %182, %185 : vector<32x128xf32>
    %c1_96 = arith.constant 1 : index
    %c2_97 = arith.constant 2 : index
    %187 = memref.load %arg2[%c1_96, %c2_97] : memref<5x4xf32, #tpu.memory_space<smem>>
    %188 = vector.broadcast %187 : f32 to vector<32x128xf32>
    %189 = arith.mulf %151, %188 : vector<32x128xf32>
    %190 = arith.addf %186, %189 : vector<32x128xf32>
    %c1_98 = arith.constant 1 : index
    %c3_99 = arith.constant 3 : index
    %191 = memref.load %arg2[%c1_98, %c3_99] : memref<5x4xf32, #tpu.memory_space<smem>>
    %192 = vector.broadcast %191 : f32 to vector<32x128xf32>
    %193 = arith.mulf %153, %192 : vector<32x128xf32>
    %194 = arith.addf %190, %193 : vector<32x128xf32>
    %c1_100 = arith.constant 1 : index
    %195 = memref.load %arg3[%c1_100] : memref<5xf32, #tpu.memory_space<smem>>
    %196 = vector.broadcast %195 : f32 to vector<32x128xf32>
    %197 = arith.addf %194, %196 : vector<32x128xf32>
    %198 = arith.negf %197 : vector<32x128xf32>
    %199 = math.exp %198 : vector<32x128xf32>
    %cst_101 = arith.constant 1.000000e+00 : f32
    %200 = vector.broadcast %cst_101 : f32 to vector<32x128xf32>
    %201 = arith.addf %200, %199 : vector<32x128xf32>
    %202 = arith.divf %200, %201 : vector<32x128xf32>
    %c0_102 = arith.constant 0 : index
    %c1_103 = arith.constant 1 : index
    %203 = memref.load %arg4[%c0_102, %c1_103] : memref<1x5xf32, #tpu.memory_space<smem>>
    %204 = vector.broadcast %203 : f32 to vector<32x128xf32>
    %205 = arith.mulf %202, %204 : vector<32x128xf32>
    %206 = arith.addf %179, %205 : vector<32x128xf32>
    %c2_104 = arith.constant 2 : index
    %c0_105 = arith.constant 0 : index
    %207 = memref.load %arg2[%c2_104, %c0_105] : memref<5x4xf32, #tpu.memory_space<smem>>
    %208 = vector.broadcast %207 : f32 to vector<32x128xf32>
    %209 = arith.mulf %147, %208 : vector<32x128xf32>
    %c2_106 = arith.constant 2 : index
    %c1_107 = arith.constant 1 : index
    %210 = memref.load %arg2[%c2_106, %c1_107] : memref<5x4xf32, #tpu.memory_space<smem>>
    %211 = vector.broadcast %210 : f32 to vector<32x128xf32>
    %212 = arith.mulf %149, %211 : vector<32x128xf32>
    %213 = arith.addf %209, %212 : vector<32x128xf32>
    %c2_108 = arith.constant 2 : index
    %c2_109 = arith.constant 2 : index
    %214 = memref.load %arg2[%c2_108, %c2_109] : memref<5x4xf32, #tpu.memory_space<smem>>
    %215 = vector.broadcast %214 : f32 to vector<32x128xf32>
    %216 = arith.mulf %151, %215 : vector<32x128xf32>
    %217 = arith.addf %213, %216 : vector<32x128xf32>
    %c2_110 = arith.constant 2 : index
    %c3_111 = arith.constant 3 : index
    %218 = memref.load %arg2[%c2_110, %c3_111] : memref<5x4xf32, #tpu.memory_space<smem>>
    %219 = vector.broadcast %218 : f32 to vector<32x128xf32>
    %220 = arith.mulf %153, %219 : vector<32x128xf32>
    %221 = arith.addf %217, %220 : vector<32x128xf32>
    %c2_112 = arith.constant 2 : index
    %222 = memref.load %arg3[%c2_112] : memref<5xf32, #tpu.memory_space<smem>>
    %223 = vector.broadcast %222 : f32 to vector<32x128xf32>
    %224 = arith.addf %221, %223 : vector<32x128xf32>
    %225 = arith.negf %224 : vector<32x128xf32>
    %226 = math.exp %225 : vector<32x128xf32>
    %cst_113 = arith.constant 1.000000e+00 : f32
    %227 = vector.broadcast %cst_113 : f32 to vector<32x128xf32>
    %228 = arith.addf %227, %226 : vector<32x128xf32>
    %229 = arith.divf %227, %228 : vector<32x128xf32>
    %c0_114 = arith.constant 0 : index
    %c2_115 = arith.constant 2 : index
    %230 = memref.load %arg4[%c0_114, %c2_115] : memref<1x5xf32, #tpu.memory_space<smem>>
    %231 = vector.broadcast %230 : f32 to vector<32x128xf32>
    %232 = arith.mulf %229, %231 : vector<32x128xf32>
    %233 = arith.addf %206, %232 : vector<32x128xf32>
    %c3_116 = arith.constant 3 : index
    %c0_117 = arith.constant 0 : index
    %234 = memref.load %arg2[%c3_116, %c0_117] : memref<5x4xf32, #tpu.memory_space<smem>>
    %235 = vector.broadcast %234 : f32 to vector<32x128xf32>
    %236 = arith.mulf %147, %235 : vector<32x128xf32>
    %c3_118 = arith.constant 3 : index
    %c1_119 = arith.constant 1 : index
    %237 = memref.load %arg2[%c3_118, %c1_119] : memref<5x4xf32, #tpu.memory_space<smem>>
    %238 = vector.broadcast %237 : f32 to vector<32x128xf32>
    %239 = arith.mulf %149, %238 : vector<32x128xf32>
    %240 = arith.addf %236, %239 : vector<32x128xf32>
    %c3_120 = arith.constant 3 : index
    %c2_121 = arith.constant 2 : index
    %241 = memref.load %arg2[%c3_120, %c2_121] : memref<5x4xf32, #tpu.memory_space<smem>>
    %242 = vector.broadcast %241 : f32 to vector<32x128xf32>
    %243 = arith.mulf %151, %242 : vector<32x128xf32>
    %244 = arith.addf %240, %243 : vector<32x128xf32>
    %c3_122 = arith.constant 3 : index
    %c3_123 = arith.constant 3 : index
    %245 = memref.load %arg2[%c3_122, %c3_123] : memref<5x4xf32, #tpu.memory_space<smem>>
    %246 = vector.broadcast %245 : f32 to vector<32x128xf32>
    %247 = arith.mulf %153, %246 : vector<32x128xf32>
    %248 = arith.addf %244, %247 : vector<32x128xf32>
    %c3_124 = arith.constant 3 : index
    %249 = memref.load %arg3[%c3_124] : memref<5xf32, #tpu.memory_space<smem>>
    %250 = vector.broadcast %249 : f32 to vector<32x128xf32>
    %251 = arith.addf %248, %250 : vector<32x128xf32>
    %252 = arith.negf %251 : vector<32x128xf32>
    %253 = math.exp %252 : vector<32x128xf32>
    %cst_125 = arith.constant 1.000000e+00 : f32
    %254 = vector.broadcast %cst_125 : f32 to vector<32x128xf32>
    %255 = arith.addf %254, %253 : vector<32x128xf32>
    %256 = arith.divf %254, %255 : vector<32x128xf32>
    %c0_126 = arith.constant 0 : index
    %c3_127 = arith.constant 3 : index
    %257 = memref.load %arg4[%c0_126, %c3_127] : memref<1x5xf32, #tpu.memory_space<smem>>
    %258 = vector.broadcast %257 : f32 to vector<32x128xf32>
    %259 = arith.mulf %256, %258 : vector<32x128xf32>
    %260 = arith.addf %233, %259 : vector<32x128xf32>
    %c4_128 = arith.constant 4 : index
    %c0_129 = arith.constant 0 : index
    %261 = memref.load %arg2[%c4_128, %c0_129] : memref<5x4xf32, #tpu.memory_space<smem>>
    %262 = vector.broadcast %261 : f32 to vector<32x128xf32>
    %263 = arith.mulf %147, %262 : vector<32x128xf32>
    %c4_130 = arith.constant 4 : index
    %c1_131 = arith.constant 1 : index
    %264 = memref.load %arg2[%c4_130, %c1_131] : memref<5x4xf32, #tpu.memory_space<smem>>
    %265 = vector.broadcast %264 : f32 to vector<32x128xf32>
    %266 = arith.mulf %149, %265 : vector<32x128xf32>
    %267 = arith.addf %263, %266 : vector<32x128xf32>
    %c4_132 = arith.constant 4 : index
    %c2_133 = arith.constant 2 : index
    %268 = memref.load %arg2[%c4_132, %c2_133] : memref<5x4xf32, #tpu.memory_space<smem>>
    %269 = vector.broadcast %268 : f32 to vector<32x128xf32>
    %270 = arith.mulf %151, %269 : vector<32x128xf32>
    %271 = arith.addf %267, %270 : vector<32x128xf32>
    %c4_134 = arith.constant 4 : index
    %c3_135 = arith.constant 3 : index
    %272 = memref.load %arg2[%c4_134, %c3_135] : memref<5x4xf32, #tpu.memory_space<smem>>
    %273 = vector.broadcast %272 : f32 to vector<32x128xf32>
    %274 = arith.mulf %153, %273 : vector<32x128xf32>
    %275 = arith.addf %271, %274 : vector<32x128xf32>
    %c4_136 = arith.constant 4 : index
    %276 = memref.load %arg3[%c4_136] : memref<5xf32, #tpu.memory_space<smem>>
    %277 = vector.broadcast %276 : f32 to vector<32x128xf32>
    %278 = arith.addf %275, %277 : vector<32x128xf32>
    %279 = arith.negf %278 : vector<32x128xf32>
    %280 = math.exp %279 : vector<32x128xf32>
    %cst_137 = arith.constant 1.000000e+00 : f32
    %281 = vector.broadcast %cst_137 : f32 to vector<32x128xf32>
    %282 = arith.addf %281, %280 : vector<32x128xf32>
    %283 = arith.divf %281, %282 : vector<32x128xf32>
    %c0_138 = arith.constant 0 : index
    %c4_139 = arith.constant 4 : index
    %284 = memref.load %arg4[%c0_138, %c4_139] : memref<1x5xf32, #tpu.memory_space<smem>>
    %285 = vector.broadcast %284 : f32 to vector<32x128xf32>
    %286 = arith.mulf %283, %285 : vector<32x128xf32>
    %287 = arith.addf %260, %286 : vector<32x128xf32>
    %c0_140 = arith.constant 0 : index
    %288 = memref.load %arg5[%c0_140] : memref<1xf32, #tpu.memory_space<smem>>
    %289 = vector.broadcast %288 : f32 to vector<32x128xf32>
    %290 = arith.addf %287, %289 : vector<32x128xf32>
    %c32_141 = arith.constant 32 : index
    %c0_142 = arith.constant 0 : index
    %291 = vector.load %arg6[%c32_141, %c0_142] : memref<256x128xf32, #tpu.memory_space<vmem>>, vector<32x128xf32>
    tpu.vector_store %arg6[%c32_141, %c0_142], %290 {strides = array<i32>} : memref<256x128xf32, #tpu.memory_space<vmem>>, vector<32x128xf32>,
    %c0_143 = arith.constant 0 : index
    %c64 = arith.constant 64 : index
    %c0_144 = arith.constant 0 : index
    %292 = vector.load %arg1[%c0_143, %c64, %c0_144] : memref<4x256x128xf32, #tpu.memory_space<vmem>>, vector<1x32x128xf32>
    %293 = vector.shape_cast %292 : vector<1x32x128xf32> to vector<32x128xf32>
    %c1_145 = arith.constant 1 : index
    %c64_146 = arith.constant 64 : index
    %c0_147 = arith.constant 0 : index
    %294 = vector.load %arg1[%c1_145, %c64_146, %c0_147] : memref<4x256x128xf32, #tpu.memory_space<vmem>>, vector<1x32x128xf32>
    %295 = vector.shape_cast %294 : vector<1x32x128xf32> to vector<32x128xf32>
    %c2_148 = arith.constant 2 : index
    %c64_149 = arith.constant 64 : index
    %c0_150 = arith.constant 0 : index
    %296 = vector.load %arg1[%c2_148, %c64_149, %c0_150] : memref<4x256x128xf32, #tpu.memory_space<vmem>>, vector<1x32x128xf32>
    %297 = vector.shape_cast %296 : vector<1x32x128xf32> to vector<32x128xf32>
    %c3_151 = arith.constant 3 : index
    %c64_152 = arith.constant 64 : index
    %c0_153 = arith.constant 0 : index
    %298 = vector.load %arg1[%c3_151, %c64_152, %c0_153] : memref<4x256x128xf32, #tpu.memory_space<vmem>>, vector<1x32x128xf32>
    %299 = vector.shape_cast %298 : vector<1x32x128xf32> to vector<32x128xf32>
    %c0_154 = arith.constant 0 : index
    %c0_155 = arith.constant 0 : index
    %300 = memref.load %arg2[%c0_154, %c0_155] : memref<5x4xf32, #tpu.memory_space<smem>>
    %301 = vector.broadcast %300 : f32 to vector<32x128xf32>
    %302 = arith.mulf %293, %301 : vector<32x128xf32>
    %c0_156 = arith.constant 0 : index
    %c1_157 = arith.constant 1 : index
    %303 = memref.load %arg2[%c0_156, %c1_157] : memref<5x4xf32, #tpu.memory_space<smem>>
    %304 = vector.broadcast %303 : f32 to vector<32x128xf32>
    %305 = arith.mulf %295, %304 : vector<32x128xf32>
    %306 = arith.addf %302, %305 : vector<32x128xf32>
    %c0_158 = arith.constant 0 : index
    %c2_159 = arith.constant 2 : index
    %307 = memref.load %arg2[%c0_158, %c2_159] : memref<5x4xf32, #tpu.memory_space<smem>>
    %308 = vector.broadcast %307 : f32 to vector<32x128xf32>
    %309 = arith.mulf %297, %308 : vector<32x128xf32>
    %310 = arith.addf %306, %309 : vector<32x128xf32>
    %c0_160 = arith.constant 0 : index
    %c3_161 = arith.constant 3 : index
    %311 = memref.load %arg2[%c0_160, %c3_161] : memref<5x4xf32, #tpu.memory_space<smem>>
    %312 = vector.broadcast %311 : f32 to vector<32x128xf32>
    %313 = arith.mulf %299, %312 : vector<32x128xf32>
    %314 = arith.addf %310, %313 : vector<32x128xf32>
    %c0_162 = arith.constant 0 : index
    %315 = memref.load %arg3[%c0_162] : memref<5xf32, #tpu.memory_space<smem>>
    %316 = vector.broadcast %315 : f32 to vector<32x128xf32>
    %317 = arith.addf %314, %316 : vector<32x128xf32>
    %318 = arith.negf %317 : vector<32x128xf32>
    %319 = math.exp %318 : vector<32x128xf32>
    %cst_163 = arith.constant 1.000000e+00 : f32
    %320 = vector.broadcast %cst_163 : f32 to vector<32x128xf32>
    %321 = arith.addf %320, %319 : vector<32x128xf32>
    %322 = arith.divf %320, %321 : vector<32x128xf32>
    %c0_164 = arith.constant 0 : index
    %c0_165 = arith.constant 0 : index
    %323 = memref.load %arg4[%c0_164, %c0_165] : memref<1x5xf32, #tpu.memory_space<smem>>
    %324 = vector.broadcast %323 : f32 to vector<32x128xf32>
    %325 = arith.mulf %322, %324 : vector<32x128xf32>
    %c1_166 = arith.constant 1 : index
    %c0_167 = arith.constant 0 : index
    %326 = memref.load %arg2[%c1_166, %c0_167] : memref<5x4xf32, #tpu.memory_space<smem>>
    %327 = vector.broadcast %326 : f32 to vector<32x128xf32>
    %328 = arith.mulf %293, %327 : vector<32x128xf32>
    %c1_168 = arith.constant 1 : index
    %c1_169 = arith.constant 1 : index
    %329 = memref.load %arg2[%c1_168, %c1_169] : memref<5x4xf32, #tpu.memory_space<smem>>
    %330 = vector.broadcast %329 : f32 to vector<32x128xf32>
    %331 = arith.mulf %295, %330 : vector<32x128xf32>
    %332 = arith.addf %328, %331 : vector<32x128xf32>
    %c1_170 = arith.constant 1 : index
    %c2_171 = arith.constant 2 : index
    %333 = memref.load %arg2[%c1_170, %c2_171] : memref<5x4xf32, #tpu.memory_space<smem>>
    %334 = vector.broadcast %333 : f32 to vector<32x128xf32>
    %335 = arith.mulf %297, %334 : vector<32x128xf32>
    %336 = arith.addf %332, %335 : vector<32x128xf32>
    %c1_172 = arith.constant 1 : index
    %c3_173 = arith.constant 3 : index
    %337 = memref.load %arg2[%c1_172, %c3_173] : memref<5x4xf32, #tpu.memory_space<smem>>
    %338 = vector.broadcast %337 : f32 to vector<32x128xf32>
    %339 = arith.mulf %299, %338 : vector<32x128xf32>
    %340 = arith.addf %336, %339 : vector<32x128xf32>
    %c1_174 = arith.constant 1 : index
    %341 = memref.load %arg3[%c1_174] : memref<5xf32, #tpu.memory_space<smem>>
    %342 = vector.broadcast %341 : f32 to vector<32x128xf32>
    %343 = arith.addf %340, %342 : vector<32x128xf32>
    %344 = arith.negf %343 : vector<32x128xf32>
    %345 = math.exp %344 : vector<32x128xf32>
    %cst_175 = arith.constant 1.000000e+00 : f32
    %346 = vector.broadcast %cst_175 : f32 to vector<32x128xf32>
    %347 = arith.addf %346, %345 : vector<32x128xf32>
    %348 = arith.divf %346, %347 : vector<32x128xf32>
    %c0_176 = arith.constant 0 : index
    %c1_177 = arith.constant 1 : index
    %349 = memref.load %arg4[%c0_176, %c1_177] : memref<1x5xf32, #tpu.memory_space<smem>>
    %350 = vector.broadcast %349 : f32 to vector<32x128xf32>
    %351 = arith.mulf %348, %350 : vector<32x128xf32>
    %352 = arith.addf %325, %351 : vector<32x128xf32>
    %c2_178 = arith.constant 2 : index
    %c0_179 = arith.constant 0 : index
    %353 = memref.load %arg2[%c2_178, %c0_179] : memref<5x4xf32, #tpu.memory_space<smem>>
    %354 = vector.broadcast %353 : f32 to vector<32x128xf32>
    %355 = arith.mulf %293, %354 : vector<32x128xf32>
    %c2_180 = arith.constant 2 : index
    %c1_181 = arith.constant 1 : index
    %356 = memref.load %arg2[%c2_180, %c1_181] : memref<5x4xf32, #tpu.memory_space<smem>>
    %357 = vector.broadcast %356 : f32 to vector<32x128xf32>
    %358 = arith.mulf %295, %357 : vector<32x128xf32>
    %359 = arith.addf %355, %358 : vector<32x128xf32>
    %c2_182 = arith.constant 2 : index
    %c2_183 = arith.constant 2 : index
    %360 = memref.load %arg2[%c2_182, %c2_183] : memref<5x4xf32, #tpu.memory_space<smem>>
    %361 = vector.broadcast %360 : f32 to vector<32x128xf32>
    %362 = arith.mulf %297, %361 : vector<32x128xf32>
    %363 = arith.addf %359, %362 : vector<32x128xf32>
    %c2_184 = arith.constant 2 : index
    %c3_185 = arith.constant 3 : index
    %364 = memref.load %arg2[%c2_184, %c3_185] : memref<5x4xf32, #tpu.memory_space<smem>>
    %365 = vector.broadcast %364 : f32 to vector<32x128xf32>
    %366 = arith.mulf %299, %365 : vector<32x128xf32>
    %367 = arith.addf %363, %366 : vector<32x128xf32>
    %c2_186 = arith.constant 2 : index
    %368 = memref.load %arg3[%c2_186] : memref<5xf32, #tpu.memory_space<smem>>
    %369 = vector.broadcast %368 : f32 to vector<32x128xf32>
    %370 = arith.addf %367, %369 : vector<32x128xf32>
    %371 = arith.negf %370 : vector<32x128xf32>
    %372 = math.exp %371 : vector<32x128xf32>
    %cst_187 = arith.constant 1.000000e+00 : f32
    %373 = vector.broadcast %cst_187 : f32 to vector<32x128xf32>
    %374 = arith.addf %373, %372 : vector<32x128xf32>
    %375 = arith.divf %373, %374 : vector<32x128xf32>
    %c0_188 = arith.constant 0 : index
    %c2_189 = arith.constant 2 : index
    %376 = memref.load %arg4[%c0_188, %c2_189] : memref<1x5xf32, #tpu.memory_space<smem>>
    %377 = vector.broadcast %376 : f32 to vector<32x128xf32>
    %378 = arith.mulf %375, %377 : vector<32x128xf32>
    %379 = arith.addf %352, %378 : vector<32x128xf32>
    %c3_190 = arith.constant 3 : index
    %c0_191 = arith.constant 0 : index
    %380 = memref.load %arg2[%c3_190, %c0_191] : memref<5x4xf32, #tpu.memory_space<smem>>
    %381 = vector.broadcast %380 : f32 to vector<32x128xf32>
    %382 = arith.mulf %293, %381 : vector<32x128xf32>
    %c3_192 = arith.constant 3 : index
    %c1_193 = arith.constant 1 : index
    %383 = memref.load %arg2[%c3_192, %c1_193] : memref<5x4xf32, #tpu.memory_space<smem>>
    %384 = vector.broadcast %383 : f32 to vector<32x128xf32>
    %385 = arith.mulf %295, %384 : vector<32x128xf32>
    %386 = arith.addf %382, %385 : vector<32x128xf32>
    %c3_194 = arith.constant 3 : index
    %c2_195 = arith.constant 2 : index
    %387 = memref.load %arg2[%c3_194, %c2_195] : memref<5x4xf32, #tpu.memory_space<smem>>
    %388 = vector.broadcast %387 : f32 to vector<32x128xf32>
    %389 = arith.mulf %297, %388 : vector<32x128xf32>
    %390 = arith.addf %386, %389 : vector<32x128xf32>
    %c3_196 = arith.constant 3 : index
    %c3_197 = arith.constant 3 : index
    %391 = memref.load %arg2[%c3_196, %c3_197] : memref<5x4xf32, #tpu.memory_space<smem>>
    %392 = vector.broadcast %391 : f32 to vector<32x128xf32>
    %393 = arith.mulf %299, %392 : vector<32x128xf32>
    %394 = arith.addf %390, %393 : vector<32x128xf32>
    %c3_198 = arith.constant 3 : index
    %395 = memref.load %arg3[%c3_198] : memref<5xf32, #tpu.memory_space<smem>>
    %396 = vector.broadcast %395 : f32 to vector<32x128xf32>
    %397 = arith.addf %394, %396 : vector<32x128xf32>
    %398 = arith.negf %397 : vector<32x128xf32>
    %399 = math.exp %398 : vector<32x128xf32>
    %cst_199 = arith.constant 1.000000e+00 : f32
    %400 = vector.broadcast %cst_199 : f32 to vector<32x128xf32>
    %401 = arith.addf %400, %399 : vector<32x128xf32>
    %402 = arith.divf %400, %401 : vector<32x128xf32>
    %c0_200 = arith.constant 0 : index
    %c3_201 = arith.constant 3 : index
    %403 = memref.load %arg4[%c0_200, %c3_201] : memref<1x5xf32, #tpu.memory_space<smem>>
    %404 = vector.broadcast %403 : f32 to vector<32x128xf32>
    %405 = arith.mulf %402, %404 : vector<32x128xf32>
    %406 = arith.addf %379, %405 : vector<32x128xf32>
    %c4_202 = arith.constant 4 : index
    %c0_203 = arith.constant 0 : index
    %407 = memref.load %arg2[%c4_202, %c0_203] : memref<5x4xf32, #tpu.memory_space<smem>>
    %408 = vector.broadcast %407 : f32 to vector<32x128xf32>
    %409 = arith.mulf %293, %408 : vector<32x128xf32>
    %c4_204 = arith.constant 4 : index
    %c1_205 = arith.constant 1 : index
    %410 = memref.load %arg2[%c4_204, %c1_205] : memref<5x4xf32, #tpu.memory_space<smem>>
    %411 = vector.broadcast %410 : f32 to vector<32x128xf32>
    %412 = arith.mulf %295, %411 : vector<32x128xf32>
    %413 = arith.addf %409, %412 : vector<32x128xf32>
    %c4_206 = arith.constant 4 : index
    %c2_207 = arith.constant 2 : index
    %414 = memref.load %arg2[%c4_206, %c2_207] : memref<5x4xf32, #tpu.memory_space<smem>>
    %415 = vector.broadcast %414 : f32 to vector<32x128xf32>
    %416 = arith.mulf %297, %415 : vector<32x128xf32>
    %417 = arith.addf %413, %416 : vector<32x128xf32>
    %c4_208 = arith.constant 4 : index
    %c3_209 = arith.constant 3 : index
    %418 = memref.load %arg2[%c4_208, %c3_209] : memref<5x4xf32, #tpu.memory_space<smem>>
    %419 = vector.broadcast %418 : f32 to vector<32x128xf32>
    %420 = arith.mulf %299, %419 : vector<32x128xf32>
    %421 = arith.addf %417, %420 : vector<32x128xf32>
    %c4_210 = arith.constant 4 : index
    %422 = memref.load %arg3[%c4_210] : memref<5xf32, #tpu.memory_space<smem>>
    %423 = vector.broadcast %422 : f32 to vector<32x128xf32>
    %424 = arith.addf %421, %423 : vector<32x128xf32>
    %425 = arith.negf %424 : vector<32x128xf32>
    %426 = math.exp %425 : vector<32x128xf32>
    %cst_211 = arith.constant 1.000000e+00 : f32
    %427 = vector.broadcast %cst_211 : f32 to vector<32x128xf32>
    %428 = arith.addf %427, %426 : vector<32x128xf32>
    %429 = arith.divf %427, %428 : vector<32x128xf32>
    %c0_212 = arith.constant 0 : index
    %c4_213 = arith.constant 4 : index
    %430 = memref.load %arg4[%c0_212, %c4_213] : memref<1x5xf32, #tpu.memory_space<smem>>
    %431 = vector.broadcast %430 : f32 to vector<32x128xf32>
    %432 = arith.mulf %429, %431 : vector<32x128xf32>
    %433 = arith.addf %406, %432 : vector<32x128xf32>
    %c0_214 = arith.constant 0 : index
    %434 = memref.load %arg5[%c0_214] : memref<1xf32, #tpu.memory_space<smem>>
    %435 = vector.broadcast %434 : f32 to vector<32x128xf32>
    %436 = arith.addf %433, %435 : vector<32x128xf32>
    %c64_215 = arith.constant 64 : index
    %c0_216 = arith.constant 0 : index
    %437 = vector.load %arg6[%c64_215, %c0_216] : memref<256x128xf32, #tpu.memory_space<vmem>>, vector<32x128xf32>
    tpu.vector_store %arg6[%c64_215, %c0_216], %436 {strides = array<i32>} : memref<256x128xf32, #tpu.memory_space<vmem>>, vector<32x128xf32>,
    %c0_217 = arith.constant 0 : index
    %c96 = arith.constant 96 : index
    %c0_218 = arith.constant 0 : index
    %438 = vector.load %arg1[%c0_217, %c96, %c0_218] : memref<4x256x128xf32, #tpu.memory_space<vmem>>, vector<1x32x128xf32>
    %439 = vector.shape_cast %438 : vector<1x32x128xf32> to vector<32x128xf32>
    %c1_219 = arith.constant 1 : index
    %c96_220 = arith.constant 96 : index
    %c0_221 = arith.constant 0 : index
    %440 = vector.load %arg1[%c1_219, %c96_220, %c0_221] : memref<4x256x128xf32, #tpu.memory_space<vmem>>, vector<1x32x128xf32>
    %441 = vector.shape_cast %440 : vector<1x32x128xf32> to vector<32x128xf32>
    %c2_222 = arith.constant 2 : index
    %c96_223 = arith.constant 96 : index
    %c0_224 = arith.constant 0 : index
    %442 = vector.load %arg1[%c2_222, %c96_223, %c0_224] : memref<4x256x128xf32, #tpu.memory_space<vmem>>, vector<1x32x128xf32>
    %443 = vector.shape_cast %442 : vector<1x32x128xf32> to vector<32x128xf32>
    %c3_225 = arith.constant 3 : index
    %c96_226 = arith.constant 96 : index
    %c0_227 = arith.constant 0 : index
    %444 = vector.load %arg1[%c3_225, %c96_226, %c0_227] : memref<4x256x128xf32, #tpu.memory_space<vmem>>, vector<1x32x128xf32>
    %445 = vector.shape_cast %444 : vector<1x32x128xf32> to vector<32x128xf32>
    %c0_228 = arith.constant 0 : index
    %c0_229 = arith.constant 0 : index
    %446 = memref.load %arg2[%c0_228, %c0_229] : memref<5x4xf32, #tpu.memory_space<smem>>
    %447 = vector.broadcast %446 : f32 to vector<32x128xf32>
    %448 = arith.mulf %439, %447 : vector<32x128xf32>
    %c0_230 = arith.constant 0 : index
    %c1_231 = arith.constant 1 : index
    %449 = memref.load %arg2[%c0_230, %c1_231] : memref<5x4xf32, #tpu.memory_space<smem>>
    %450 = vector.broadcast %449 : f32 to vector<32x128xf32>
    %451 = arith.mulf %441, %450 : vector<32x128xf32>
    %452 = arith.addf %448, %451 : vector<32x128xf32>
    %c0_232 = arith.constant 0 : index
    %c2_233 = arith.constant 2 : index
    %453 = memref.load %arg2[%c0_232, %c2_233] : memref<5x4xf32, #tpu.memory_space<smem>>
    %454 = vector.broadcast %453 : f32 to vector<32x128xf32>
    %455 = arith.mulf %443, %454 : vector<32x128xf32>
    %456 = arith.addf %452, %455 : vector<32x128xf32>
    %c0_234 = arith.constant 0 : index
    %c3_235 = arith.constant 3 : index
    %457 = memref.load %arg2[%c0_234, %c3_235] : memref<5x4xf32, #tpu.memory_space<smem>>
    %458 = vector.broadcast %457 : f32 to vector<32x128xf32>
    %459 = arith.mulf %445, %458 : vector<32x128xf32>
    %460 = arith.addf %456, %459 : vector<32x128xf32>
    %c0_236 = arith.constant 0 : index
    %461 = memref.load %arg3[%c0_236] : memref<5xf32, #tpu.memory_space<smem>>
    %462 = vector.broadcast %461 : f32 to vector<32x128xf32>
    %463 = arith.addf %460, %462 : vector<32x128xf32>
    %464 = arith.negf %463 : vector<32x128xf32>
    %465 = math.exp %464 : vector<32x128xf32>
    %cst_237 = arith.constant 1.000000e+00 : f32
    %466 = vector.broadcast %cst_237 : f32 to vector<32x128xf32>
    %467 = arith.addf %466, %465 : vector<32x128xf32>
    %468 = arith.divf %466, %467 : vector<32x128xf32>
    %c0_238 = arith.constant 0 : index
    %c0_239 = arith.constant 0 : index
    %469 = memref.load %arg4[%c0_238, %c0_239] : memref<1x5xf32, #tpu.memory_space<smem>>
    %470 = vector.broadcast %469 : f32 to vector<32x128xf32>
    %471 = arith.mulf %468, %470 : vector<32x128xf32>
    %c1_240 = arith.constant 1 : index
    %c0_241 = arith.constant 0 : index
    %472 = memref.load %arg2[%c1_240, %c0_241] : memref<5x4xf32, #tpu.memory_space<smem>>
    %473 = vector.broadcast %472 : f32 to vector<32x128xf32>
    %474 = arith.mulf %439, %473 : vector<32x128xf32>
    %c1_242 = arith.constant 1 : index
    %c1_243 = arith.constant 1 : index
    %475 = memref.load %arg2[%c1_242, %c1_243] : memref<5x4xf32, #tpu.memory_space<smem>>
    %476 = vector.broadcast %475 : f32 to vector<32x128xf32>
    %477 = arith.mulf %441, %476 : vector<32x128xf32>
    %478 = arith.addf %474, %477 : vector<32x128xf32>
    %c1_244 = arith.constant 1 : index
    %c2_245 = arith.constant 2 : index
    %479 = memref.load %arg2[%c1_244, %c2_245] : memref<5x4xf32, #tpu.memory_space<smem>>
    %480 = vector.broadcast %479 : f32 to vector<32x128xf32>
    %481 = arith.mulf %443, %480 : vector<32x128xf32>
    %482 = arith.addf %478, %481 : vector<32x128xf32>
    %c1_246 = arith.constant 1 : index
    %c3_247 = arith.constant 3 : index
    %483 = memref.load %arg2[%c1_246, %c3_247] : memref<5x4xf32, #tpu.memory_space<smem>>
    %484 = vector.broadcast %483 : f32 to vector<32x128xf32>
    %485 = arith.mulf %445, %484 : vector<32x128xf32>
    %486 = arith.addf %482, %485 : vector<32x128xf32>
    %c1_248 = arith.constant 1 : index
    %487 = memref.load %arg3[%c1_248] : memref<5xf32, #tpu.memory_space<smem>>
    %488 = vector.broadcast %487 : f32 to vector<32x128xf32>
    %489 = arith.addf %486, %488 : vector<32x128xf32>
    %490 = arith.negf %489 : vector<32x128xf32>
    %491 = math.exp %490 : vector<32x128xf32>
    %cst_249 = arith.constant 1.000000e+00 : f32
    %492 = vector.broadcast %cst_249 : f32 to vector<32x128xf32>
    %493 = arith.addf %492, %491 : vector<32x128xf32>
    %494 = arith.divf %492, %493 : vector<32x128xf32>
    %c0_250 = arith.constant 0 : index
    %c1_251 = arith.constant 1 : index
    %495 = memref.load %arg4[%c0_250, %c1_251] : memref<1x5xf32, #tpu.memory_space<smem>>
    %496 = vector.broadcast %495 : f32 to vector<32x128xf32>
    %497 = arith.mulf %494, %496 : vector<32x128xf32>
    %498 = arith.addf %471, %497 : vector<32x128xf32>
    %c2_252 = arith.constant 2 : index
    %c0_253 = arith.constant 0 : index
    %499 = memref.load %arg2[%c2_252, %c0_253] : memref<5x4xf32, #tpu.memory_space<smem>>
    %500 = vector.broadcast %499 : f32 to vector<32x128xf32>
    %501 = arith.mulf %439, %500 : vector<32x128xf32>
    %c2_254 = arith.constant 2 : index
    %c1_255 = arith.constant 1 : index
    %502 = memref.load %arg2[%c2_254, %c1_255] : memref<5x4xf32, #tpu.memory_space<smem>>
    %503 = vector.broadcast %502 : f32 to vector<32x128xf32>
    %504 = arith.mulf %441, %503 : vector<32x128xf32>
    %505 = arith.addf %501, %504 : vector<32x128xf32>
    %c2_256 = arith.constant 2 : index
    %c2_257 = arith.constant 2 : index
    %506 = memref.load %arg2[%c2_256, %c2_257] : memref<5x4xf32, #tpu.memory_space<smem>>
    %507 = vector.broadcast %506 : f32 to vector<32x128xf32>
    %508 = arith.mulf %443, %507 : vector<32x128xf32>
    %509 = arith.addf %505, %508 : vector<32x128xf32>
    %c2_258 = arith.constant 2 : index
    %c3_259 = arith.constant 3 : index
    %510 = memref.load %arg2[%c2_258, %c3_259] : memref<5x4xf32, #tpu.memory_space<smem>>
    %511 = vector.broadcast %510 : f32 to vector<32x128xf32>
    %512 = arith.mulf %445, %511 : vector<32x128xf32>
    %513 = arith.addf %509, %512 : vector<32x128xf32>
    %c2_260 = arith.constant 2 : index
    %514 = memref.load %arg3[%c2_260] : memref<5xf32, #tpu.memory_space<smem>>
    %515 = vector.broadcast %514 : f32 to vector<32x128xf32>
    %516 = arith.addf %513, %515 : vector<32x128xf32>
    %517 = arith.negf %516 : vector<32x128xf32>
    %518 = math.exp %517 : vector<32x128xf32>
    %cst_261 = arith.constant 1.000000e+00 : f32
    %519 = vector.broadcast %cst_261 : f32 to vector<32x128xf32>
    %520 = arith.addf %519, %518 : vector<32x128xf32>
    %521 = arith.divf %519, %520 : vector<32x128xf32>
    %c0_262 = arith.constant 0 : index
    %c2_263 = arith.constant 2 : index
    %522 = memref.load %arg4[%c0_262, %c2_263] : memref<1x5xf32, #tpu.memory_space<smem>>
    %523 = vector.broadcast %522 : f32 to vector<32x128xf32>
    %524 = arith.mulf %521, %523 : vector<32x128xf32>
    %525 = arith.addf %498, %524 : vector<32x128xf32>
    %c3_264 = arith.constant 3 : index
    %c0_265 = arith.constant 0 : index
    %526 = memref.load %arg2[%c3_264, %c0_265] : memref<5x4xf32, #tpu.memory_space<smem>>
    %527 = vector.broadcast %526 : f32 to vector<32x128xf32>
    %528 = arith.mulf %439, %527 : vector<32x128xf32>
    %c3_266 = arith.constant 3 : index
    %c1_267 = arith.constant 1 : index
    %529 = memref.load %arg2[%c3_266, %c1_267] : memref<5x4xf32, #tpu.memory_space<smem>>
    %530 = vector.broadcast %529 : f32 to vector<32x128xf32>
    %531 = arith.mulf %441, %530 : vector<32x128xf32>
    %532 = arith.addf %528, %531 : vector<32x128xf32>
    %c3_268 = arith.constant 3 : index
    %c2_269 = arith.constant 2 : index
    %533 = memref.load %arg2[%c3_268, %c2_269] : memref<5x4xf32, #tpu.memory_space<smem>>
    %534 = vector.broadcast %533 : f32 to vector<32x128xf32>
    %535 = arith.mulf %443, %534 : vector<32x128xf32>
    %536 = arith.addf %532, %535 : vector<32x128xf32>
    %c3_270 = arith.constant 3 : index
    %c3_271 = arith.constant 3 : index
    %537 = memref.load %arg2[%c3_270, %c3_271] : memref<5x4xf32, #tpu.memory_space<smem>>
    %538 = vector.broadcast %537 : f32 to vector<32x128xf32>
    %539 = arith.mulf %445, %538 : vector<32x128xf32>
    %540 = arith.addf %536, %539 : vector<32x128xf32>
    %c3_272 = arith.constant 3 : index
    %541 = memref.load %arg3[%c3_272] : memref<5xf32, #tpu.memory_space<smem>>
    %542 = vector.broadcast %541 : f32 to vector<32x128xf32>
    %543 = arith.addf %540, %542 : vector<32x128xf32>
    %544 = arith.negf %543 : vector<32x128xf32>
    %545 = math.exp %544 : vector<32x128xf32>
    %cst_273 = arith.constant 1.000000e+00 : f32
    %546 = vector.broadcast %cst_273 : f32 to vector<32x128xf32>
    %547 = arith.addf %546, %545 : vector<32x128xf32>
    %548 = arith.divf %546, %547 : vector<32x128xf32>
    %c0_274 = arith.constant 0 : index
    %c3_275 = arith.constant 3 : index
    %549 = memref.load %arg4[%c0_274, %c3_275] : memref<1x5xf32, #tpu.memory_space<smem>>
    %550 = vector.broadcast %549 : f32 to vector<32x128xf32>
    %551 = arith.mulf %548, %550 : vector<32x128xf32>
    %552 = arith.addf %525, %551 : vector<32x128xf32>
    %c4_276 = arith.constant 4 : index
    %c0_277 = arith.constant 0 : index
    %553 = memref.load %arg2[%c4_276, %c0_277] : memref<5x4xf32, #tpu.memory_space<smem>>
    %554 = vector.broadcast %553 : f32 to vector<32x128xf32>
    %555 = arith.mulf %439, %554 : vector<32x128xf32>
    %c4_278 = arith.constant 4 : index
    %c1_279 = arith.constant 1 : index
    %556 = memref.load %arg2[%c4_278, %c1_279] : memref<5x4xf32, #tpu.memory_space<smem>>
    %557 = vector.broadcast %556 : f32 to vector<32x128xf32>
    %558 = arith.mulf %441, %557 : vector<32x128xf32>
    %559 = arith.addf %555, %558 : vector<32x128xf32>
    %c4_280 = arith.constant 4 : index
    %c2_281 = arith.constant 2 : index
    %560 = memref.load %arg2[%c4_280, %c2_281] : memref<5x4xf32, #tpu.memory_space<smem>>
    %561 = vector.broadcast %560 : f32 to vector<32x128xf32>
    %562 = arith.mulf %443, %561 : vector<32x128xf32>
    %563 = arith.addf %559, %562 : vector<32x128xf32>
    %c4_282 = arith.constant 4 : index
    %c3_283 = arith.constant 3 : index
    %564 = memref.load %arg2[%c4_282, %c3_283] : memref<5x4xf32, #tpu.memory_space<smem>>
    %565 = vector.broadcast %564 : f32 to vector<32x128xf32>
    %566 = arith.mulf %445, %565 : vector<32x128xf32>
    %567 = arith.addf %563, %566 : vector<32x128xf32>
    %c4_284 = arith.constant 4 : index
    %568 = memref.load %arg3[%c4_284] : memref<5xf32, #tpu.memory_space<smem>>
    %569 = vector.broadcast %568 : f32 to vector<32x128xf32>
    %570 = arith.addf %567, %569 : vector<32x128xf32>
    %571 = arith.negf %570 : vector<32x128xf32>
    %572 = math.exp %571 : vector<32x128xf32>
    %cst_285 = arith.constant 1.000000e+00 : f32
    %573 = vector.broadcast %cst_285 : f32 to vector<32x128xf32>
    %574 = arith.addf %573, %572 : vector<32x128xf32>
    %575 = arith.divf %573, %574 : vector<32x128xf32>
    %c0_286 = arith.constant 0 : index
    %c4_287 = arith.constant 4 : index
    %576 = memref.load %arg4[%c0_286, %c4_287] : memref<1x5xf32, #tpu.memory_space<smem>>
    %577 = vector.broadcast %576 : f32 to vector<32x128xf32>
    %578 = arith.mulf %575, %577 : vector<32x128xf32>
    %579 = arith.addf %552, %578 : vector<32x128xf32>
    %c0_288 = arith.constant 0 : index
    %580 = memref.load %arg5[%c0_288] : memref<1xf32, #tpu.memory_space<smem>>
    %581 = vector.broadcast %580 : f32 to vector<32x128xf32>
    %582 = arith.addf %579, %581 : vector<32x128xf32>
    %c96_289 = arith.constant 96 : index
    %c0_290 = arith.constant 0 : index
    %583 = vector.load %arg6[%c96_289, %c0_290] : memref<256x128xf32, #tpu.memory_space<vmem>>, vector<32x128xf32>
    tpu.vector_store %arg6[%c96_289, %c0_290], %582 {strides = array<i32>} : memref<256x128xf32, #tpu.memory_space<vmem>>, vector<32x128xf32>,
    %c0_291 = arith.constant 0 : index
    %c128 = arith.constant 128 : index
    %c0_292 = arith.constant 0 : index
    %584 = vector.load %arg1[%c0_291, %c128, %c0_292] : memref<4x256x128xf32, #tpu.memory_space<vmem>>, vector<1x32x128xf32>
    %585 = vector.shape_cast %584 : vector<1x32x128xf32> to vector<32x128xf32>
    %c1_293 = arith.constant 1 : index
    %c128_294 = arith.constant 128 : index
    %c0_295 = arith.constant 0 : index
    %586 = vector.load %arg1[%c1_293, %c128_294, %c0_295] : memref<4x256x128xf32, #tpu.memory_space<vmem>>, vector<1x32x128xf32>
    %587 = vector.shape_cast %586 : vector<1x32x128xf32> to vector<32x128xf32>
    %c2_296 = arith.constant 2 : index
    %c128_297 = arith.constant 128 : index
    %c0_298 = arith.constant 0 : index
    %588 = vector.load %arg1[%c2_296, %c128_297, %c0_298] : memref<4x256x128xf32, #tpu.memory_space<vmem>>, vector<1x32x128xf32>
    %589 = vector.shape_cast %588 : vector<1x32x128xf32> to vector<32x128xf32>
    %c3_299 = arith.constant 3 : index
    %c128_300 = arith.constant 128 : index
    %c0_301 = arith.constant 0 : index
    %590 = vector.load %arg1[%c3_299, %c128_300, %c0_301] : memref<4x256x128xf32, #tpu.memory_space<vmem>>, vector<1x32x128xf32>
    %591 = vector.shape_cast %590 : vector<1x32x128xf32> to vector<32x128xf32>
    %c0_302 = arith.constant 0 : index
    %c0_303 = arith.constant 0 : index
    %592 = memref.load %arg2[%c0_302, %c0_303] : memref<5x4xf32, #tpu.memory_space<smem>>
    %593 = vector.broadcast %592 : f32 to vector<32x128xf32>
    %594 = arith.mulf %585, %593 : vector<32x128xf32>
    %c0_304 = arith.constant 0 : index
    %c1_305 = arith.constant 1 : index
    %595 = memref.load %arg2[%c0_304, %c1_305] : memref<5x4xf32, #tpu.memory_space<smem>>
    %596 = vector.broadcast %595 : f32 to vector<32x128xf32>
    %597 = arith.mulf %587, %596 : vector<32x128xf32>
    %598 = arith.addf %594, %597 : vector<32x128xf32>
    %c0_306 = arith.constant 0 : index
    %c2_307 = arith.constant 2 : index
    %599 = memref.load %arg2[%c0_306, %c2_307] : memref<5x4xf32, #tpu.memory_space<smem>>
    %600 = vector.broadcast %599 : f32 to vector<32x128xf32>
    %601 = arith.mulf %589, %600 : vector<32x128xf32>
    %602 = arith.addf %598, %601 : vector<32x128xf32>
    %c0_308 = arith.constant 0 : index
    %c3_309 = arith.constant 3 : index
    %603 = memref.load %arg2[%c0_308, %c3_309] : memref<5x4xf32, #tpu.memory_space<smem>>
    %604 = vector.broadcast %603 : f32 to vector<32x128xf32>
    %605 = arith.mulf %591, %604 : vector<32x128xf32>
    %606 = arith.addf %602, %605 : vector<32x128xf32>
    %c0_310 = arith.constant 0 : index
    %607 = memref.load %arg3[%c0_310] : memref<5xf32, #tpu.memory_space<smem>>
    %608 = vector.broadcast %607 : f32 to vector<32x128xf32>
    %609 = arith.addf %606, %608 : vector<32x128xf32>
    %610 = arith.negf %609 : vector<32x128xf32>
    %611 = math.exp %610 : vector<32x128xf32>
    %cst_311 = arith.constant 1.000000e+00 : f32
    %612 = vector.broadcast %cst_311 : f32 to vector<32x128xf32>
    %613 = arith.addf %612, %611 : vector<32x128xf32>
    %614 = arith.divf %612, %613 : vector<32x128xf32>
    %c0_312 = arith.constant 0 : index
    %c0_313 = arith.constant 0 : index
    %615 = memref.load %arg4[%c0_312, %c0_313] : memref<1x5xf32, #tpu.memory_space<smem>>
    %616 = vector.broadcast %615 : f32 to vector<32x128xf32>
    %617 = arith.mulf %614, %616 : vector<32x128xf32>
    %c1_314 = arith.constant 1 : index
    %c0_315 = arith.constant 0 : index
    %618 = memref.load %arg2[%c1_314, %c0_315] : memref<5x4xf32, #tpu.memory_space<smem>>
    %619 = vector.broadcast %618 : f32 to vector<32x128xf32>
    %620 = arith.mulf %585, %619 : vector<32x128xf32>
    %c1_316 = arith.constant 1 : index
    %c1_317 = arith.constant 1 : index
    %621 = memref.load %arg2[%c1_316, %c1_317] : memref<5x4xf32, #tpu.memory_space<smem>>
    %622 = vector.broadcast %621 : f32 to vector<32x128xf32>
    %623 = arith.mulf %587, %622 : vector<32x128xf32>
    %624 = arith.addf %620, %623 : vector<32x128xf32>
    %c1_318 = arith.constant 1 : index
    %c2_319 = arith.constant 2 : index
    %625 = memref.load %arg2[%c1_318, %c2_319] : memref<5x4xf32, #tpu.memory_space<smem>>
    %626 = vector.broadcast %625 : f32 to vector<32x128xf32>
    %627 = arith.mulf %589, %626 : vector<32x128xf32>
    %628 = arith.addf %624, %627 : vector<32x128xf32>
    %c1_320 = arith.constant 1 : index
    %c3_321 = arith.constant 3 : index
    %629 = memref.load %arg2[%c1_320, %c3_321] : memref<5x4xf32, #tpu.memory_space<smem>>
    %630 = vector.broadcast %629 : f32 to vector<32x128xf32>
    %631 = arith.mulf %591, %630 : vector<32x128xf32>
    %632 = arith.addf %628, %631 : vector<32x128xf32>
    %c1_322 = arith.constant 1 : index
    %633 = memref.load %arg3[%c1_322] : memref<5xf32, #tpu.memory_space<smem>>
    %634 = vector.broadcast %633 : f32 to vector<32x128xf32>
    %635 = arith.addf %632, %634 : vector<32x128xf32>
    %636 = arith.negf %635 : vector<32x128xf32>
    %637 = math.exp %636 : vector<32x128xf32>
    %cst_323 = arith.constant 1.000000e+00 : f32
    %638 = vector.broadcast %cst_323 : f32 to vector<32x128xf32>
    %639 = arith.addf %638, %637 : vector<32x128xf32>
    %640 = arith.divf %638, %639 : vector<32x128xf32>
    %c0_324 = arith.constant 0 : index
    %c1_325 = arith.constant 1 : index
    %641 = memref.load %arg4[%c0_324, %c1_325] : memref<1x5xf32, #tpu.memory_space<smem>>
    %642 = vector.broadcast %641 : f32 to vector<32x128xf32>
    %643 = arith.mulf %640, %642 : vector<32x128xf32>
    %644 = arith.addf %617, %643 : vector<32x128xf32>
    %c2_326 = arith.constant 2 : index
    %c0_327 = arith.constant 0 : index
    %645 = memref.load %arg2[%c2_326, %c0_327] : memref<5x4xf32, #tpu.memory_space<smem>>
    %646 = vector.broadcast %645 : f32 to vector<32x128xf32>
    %647 = arith.mulf %585, %646 : vector<32x128xf32>
    %c2_328 = arith.constant 2 : index
    %c1_329 = arith.constant 1 : index
    %648 = memref.load %arg2[%c2_328, %c1_329] : memref<5x4xf32, #tpu.memory_space<smem>>
    %649 = vector.broadcast %648 : f32 to vector<32x128xf32>
    %650 = arith.mulf %587, %649 : vector<32x128xf32>
    %651 = arith.addf %647, %650 : vector<32x128xf32>
    %c2_330 = arith.constant 2 : index
    %c2_331 = arith.constant 2 : index
    %652 = memref.load %arg2[%c2_330, %c2_331] : memref<5x4xf32, #tpu.memory_space<smem>>
    %653 = vector.broadcast %652 : f32 to vector<32x128xf32>
    %654 = arith.mulf %589, %653 : vector<32x128xf32>
    %655 = arith.addf %651, %654 : vector<32x128xf32>
    %c2_332 = arith.constant 2 : index
    %c3_333 = arith.constant 3 : index
    %656 = memref.load %arg2[%c2_332, %c3_333] : memref<5x4xf32, #tpu.memory_space<smem>>
    %657 = vector.broadcast %656 : f32 to vector<32x128xf32>
    %658 = arith.mulf %591, %657 : vector<32x128xf32>
    %659 = arith.addf %655, %658 : vector<32x128xf32>
    %c2_334 = arith.constant 2 : index
    %660 = memref.load %arg3[%c2_334] : memref<5xf32, #tpu.memory_space<smem>>
    %661 = vector.broadcast %660 : f32 to vector<32x128xf32>
    %662 = arith.addf %659, %661 : vector<32x128xf32>
    %663 = arith.negf %662 : vector<32x128xf32>
    %664 = math.exp %663 : vector<32x128xf32>
    %cst_335 = arith.constant 1.000000e+00 : f32
    %665 = vector.broadcast %cst_335 : f32 to vector<32x128xf32>
    %666 = arith.addf %665, %664 : vector<32x128xf32>
    %667 = arith.divf %665, %666 : vector<32x128xf32>
    %c0_336 = arith.constant 0 : index
    %c2_337 = arith.constant 2 : index
    %668 = memref.load %arg4[%c0_336, %c2_337] : memref<1x5xf32, #tpu.memory_space<smem>>
    %669 = vector.broadcast %668 : f32 to vector<32x128xf32>
    %670 = arith.mulf %667, %669 : vector<32x128xf32>
    %671 = arith.addf %644, %670 : vector<32x128xf32>
    %c3_338 = arith.constant 3 : index
    %c0_339 = arith.constant 0 : index
    %672 = memref.load %arg2[%c3_338, %c0_339] : memref<5x4xf32, #tpu.memory_space<smem>>
    %673 = vector.broadcast %672 : f32 to vector<32x128xf32>
    %674 = arith.mulf %585, %673 : vector<32x128xf32>
    %c3_340 = arith.constant 3 : index
    %c1_341 = arith.constant 1 : index
    %675 = memref.load %arg2[%c3_340, %c1_341] : memref<5x4xf32, #tpu.memory_space<smem>>
    %676 = vector.broadcast %675 : f32 to vector<32x128xf32>
    %677 = arith.mulf %587, %676 : vector<32x128xf32>
    %678 = arith.addf %674, %677 : vector<32x128xf32>
    %c3_342 = arith.constant 3 : index
    %c2_343 = arith.constant 2 : index
    %679 = memref.load %arg2[%c3_342, %c2_343] : memref<5x4xf32, #tpu.memory_space<smem>>
    %680 = vector.broadcast %679 : f32 to vector<32x128xf32>
    %681 = arith.mulf %589, %680 : vector<32x128xf32>
    %682 = arith.addf %678, %681 : vector<32x128xf32>
    %c3_344 = arith.constant 3 : index
    %c3_345 = arith.constant 3 : index
    %683 = memref.load %arg2[%c3_344, %c3_345] : memref<5x4xf32, #tpu.memory_space<smem>>
    %684 = vector.broadcast %683 : f32 to vector<32x128xf32>
    %685 = arith.mulf %591, %684 : vector<32x128xf32>
    %686 = arith.addf %682, %685 : vector<32x128xf32>
    %c3_346 = arith.constant 3 : index
    %687 = memref.load %arg3[%c3_346] : memref<5xf32, #tpu.memory_space<smem>>
    %688 = vector.broadcast %687 : f32 to vector<32x128xf32>
    %689 = arith.addf %686, %688 : vector<32x128xf32>
    %690 = arith.negf %689 : vector<32x128xf32>
    %691 = math.exp %690 : vector<32x128xf32>
    %cst_347 = arith.constant 1.000000e+00 : f32
    %692 = vector.broadcast %cst_347 : f32 to vector<32x128xf32>
    %693 = arith.addf %692, %691 : vector<32x128xf32>
    %694 = arith.divf %692, %693 : vector<32x128xf32>
    %c0_348 = arith.constant 0 : index
    %c3_349 = arith.constant 3 : index
    %695 = memref.load %arg4[%c0_348, %c3_349] : memref<1x5xf32, #tpu.memory_space<smem>>
    %696 = vector.broadcast %695 : f32 to vector<32x128xf32>
    %697 = arith.mulf %694, %696 : vector<32x128xf32>
    %698 = arith.addf %671, %697 : vector<32x128xf32>
    %c4_350 = arith.constant 4 : index
    %c0_351 = arith.constant 0 : index
    %699 = memref.load %arg2[%c4_350, %c0_351] : memref<5x4xf32, #tpu.memory_space<smem>>
    %700 = vector.broadcast %699 : f32 to vector<32x128xf32>
    %701 = arith.mulf %585, %700 : vector<32x128xf32>
    %c4_352 = arith.constant 4 : index
    %c1_353 = arith.constant 1 : index
    %702 = memref.load %arg2[%c4_352, %c1_353] : memref<5x4xf32, #tpu.memory_space<smem>>
    %703 = vector.broadcast %702 : f32 to vector<32x128xf32>
    %704 = arith.mulf %587, %703 : vector<32x128xf32>
    %705 = arith.addf %701, %704 : vector<32x128xf32>
    %c4_354 = arith.constant 4 : index
    %c2_355 = arith.constant 2 : index
    %706 = memref.load %arg2[%c4_354, %c2_355] : memref<5x4xf32, #tpu.memory_space<smem>>
    %707 = vector.broadcast %706 : f32 to vector<32x128xf32>
    %708 = arith.mulf %589, %707 : vector<32x128xf32>
    %709 = arith.addf %705, %708 : vector<32x128xf32>
    %c4_356 = arith.constant 4 : index
    %c3_357 = arith.constant 3 : index
    %710 = memref.load %arg2[%c4_356, %c3_357] : memref<5x4xf32, #tpu.memory_space<smem>>
    %711 = vector.broadcast %710 : f32 to vector<32x128xf32>
    %712 = arith.mulf %591, %711 : vector<32x128xf32>
    %713 = arith.addf %709, %712 : vector<32x128xf32>
    %c4_358 = arith.constant 4 : index
    %714 = memref.load %arg3[%c4_358] : memref<5xf32, #tpu.memory_space<smem>>
    %715 = vector.broadcast %714 : f32 to vector<32x128xf32>
    %716 = arith.addf %713, %715 : vector<32x128xf32>
    %717 = arith.negf %716 : vector<32x128xf32>
    %718 = math.exp %717 : vector<32x128xf32>
    %cst_359 = arith.constant 1.000000e+00 : f32
    %719 = vector.broadcast %cst_359 : f32 to vector<32x128xf32>
    %720 = arith.addf %719, %718 : vector<32x128xf32>
    %721 = arith.divf %719, %720 : vector<32x128xf32>
    %c0_360 = arith.constant 0 : index
    %c4_361 = arith.constant 4 : index
    %722 = memref.load %arg4[%c0_360, %c4_361] : memref<1x5xf32, #tpu.memory_space<smem>>
    %723 = vector.broadcast %722 : f32 to vector<32x128xf32>
    %724 = arith.mulf %721, %723 : vector<32x128xf32>
    %725 = arith.addf %698, %724 : vector<32x128xf32>
    %c0_362 = arith.constant 0 : index
    %726 = memref.load %arg5[%c0_362] : memref<1xf32, #tpu.memory_space<smem>>
    %727 = vector.broadcast %726 : f32 to vector<32x128xf32>
    %728 = arith.addf %725, %727 : vector<32x128xf32>
    %c128_363 = arith.constant 128 : index
    %c0_364 = arith.constant 0 : index
    %729 = vector.load %arg6[%c128_363, %c0_364] : memref<256x128xf32, #tpu.memory_space<vmem>>, vector<32x128xf32>
    tpu.vector_store %arg6[%c128_363, %c0_364], %728 {strides = array<i32>} : memref<256x128xf32, #tpu.memory_space<vmem>>, vector<32x128xf32>,
    %c0_365 = arith.constant 0 : index
    %c160 = arith.constant 160 : index
    %c0_366 = arith.constant 0 : index
    %730 = vector.load %arg1[%c0_365, %c160, %c0_366] : memref<4x256x128xf32, #tpu.memory_space<vmem>>, vector<1x32x128xf32>
    %731 = vector.shape_cast %730 : vector<1x32x128xf32> to vector<32x128xf32>
    %c1_367 = arith.constant 1 : index
    %c160_368 = arith.constant 160 : index
    %c0_369 = arith.constant 0 : index
    %732 = vector.load %arg1[%c1_367, %c160_368, %c0_369] : memref<4x256x128xf32, #tpu.memory_space<vmem>>, vector<1x32x128xf32>
    %733 = vector.shape_cast %732 : vector<1x32x128xf32> to vector<32x128xf32>
    %c2_370 = arith.constant 2 : index
    %c160_371 = arith.constant 160 : index
    %c0_372 = arith.constant 0 : index
    %734 = vector.load %arg1[%c2_370, %c160_371, %c0_372] : memref<4x256x128xf32, #tpu.memory_space<vmem>>, vector<1x32x128xf32>
    %735 = vector.shape_cast %734 : vector<1x32x128xf32> to vector<32x128xf32>
    %c3_373 = arith.constant 3 : index
    %c160_374 = arith.constant 160 : index
    %c0_375 = arith.constant 0 : index
    %736 = vector.load %arg1[%c3_373, %c160_374, %c0_375] : memref<4x256x128xf32, #tpu.memory_space<vmem>>, vector<1x32x128xf32>
    %737 = vector.shape_cast %736 : vector<1x32x128xf32> to vector<32x128xf32>
    %c0_376 = arith.constant 0 : index
    %c0_377 = arith.constant 0 : index
    %738 = memref.load %arg2[%c0_376, %c0_377] : memref<5x4xf32, #tpu.memory_space<smem>>
    %739 = vector.broadcast %738 : f32 to vector<32x128xf32>
    %740 = arith.mulf %731, %739 : vector<32x128xf32>
    %c0_378 = arith.constant 0 : index
    %c1_379 = arith.constant 1 : index
    %741 = memref.load %arg2[%c0_378, %c1_379] : memref<5x4xf32, #tpu.memory_space<smem>>
    %742 = vector.broadcast %741 : f32 to vector<32x128xf32>
    %743 = arith.mulf %733, %742 : vector<32x128xf32>
    %744 = arith.addf %740, %743 : vector<32x128xf32>
    %c0_380 = arith.constant 0 : index
    %c2_381 = arith.constant 2 : index
    %745 = memref.load %arg2[%c0_380, %c2_381] : memref<5x4xf32, #tpu.memory_space<smem>>
    %746 = vector.broadcast %745 : f32 to vector<32x128xf32>
    %747 = arith.mulf %735, %746 : vector<32x128xf32>
    %748 = arith.addf %744, %747 : vector<32x128xf32>
    %c0_382 = arith.constant 0 : index
    %c3_383 = arith.constant 3 : index
    %749 = memref.load %arg2[%c0_382, %c3_383] : memref<5x4xf32, #tpu.memory_space<smem>>
    %750 = vector.broadcast %749 : f32 to vector<32x128xf32>
    %751 = arith.mulf %737, %750 : vector<32x128xf32>
    %752 = arith.addf %748, %751 : vector<32x128xf32>
    %c0_384 = arith.constant 0 : index
    %753 = memref.load %arg3[%c0_384] : memref<5xf32, #tpu.memory_space<smem>>
    %754 = vector.broadcast %753 : f32 to vector<32x128xf32>
    %755 = arith.addf %752, %754 : vector<32x128xf32>
    %756 = arith.negf %755 : vector<32x128xf32>
    %757 = math.exp %756 : vector<32x128xf32>
    %cst_385 = arith.constant 1.000000e+00 : f32
    %758 = vector.broadcast %cst_385 : f32 to vector<32x128xf32>
    %759 = arith.addf %758, %757 : vector<32x128xf32>
    %760 = arith.divf %758, %759 : vector<32x128xf32>
    %c0_386 = arith.constant 0 : index
    %c0_387 = arith.constant 0 : index
    %761 = memref.load %arg4[%c0_386, %c0_387] : memref<1x5xf32, #tpu.memory_space<smem>>
    %762 = vector.broadcast %761 : f32 to vector<32x128xf32>
    %763 = arith.mulf %760, %762 : vector<32x128xf32>
    %c1_388 = arith.constant 1 : index
    %c0_389 = arith.constant 0 : index
    %764 = memref.load %arg2[%c1_388, %c0_389] : memref<5x4xf32, #tpu.memory_space<smem>>
    %765 = vector.broadcast %764 : f32 to vector<32x128xf32>
    %766 = arith.mulf %731, %765 : vector<32x128xf32>
    %c1_390 = arith.constant 1 : index
    %c1_391 = arith.constant 1 : index
    %767 = memref.load %arg2[%c1_390, %c1_391] : memref<5x4xf32, #tpu.memory_space<smem>>
    %768 = vector.broadcast %767 : f32 to vector<32x128xf32>
    %769 = arith.mulf %733, %768 : vector<32x128xf32>
    %770 = arith.addf %766, %769 : vector<32x128xf32>
    %c1_392 = arith.constant 1 : index
    %c2_393 = arith.constant 2 : index
    %771 = memref.load %arg2[%c1_392, %c2_393] : memref<5x4xf32, #tpu.memory_space<smem>>
    %772 = vector.broadcast %771 : f32 to vector<32x128xf32>
    %773 = arith.mulf %735, %772 : vector<32x128xf32>
    %774 = arith.addf %770, %773 : vector<32x128xf32>
    %c1_394 = arith.constant 1 : index
    %c3_395 = arith.constant 3 : index
    %775 = memref.load %arg2[%c1_394, %c3_395] : memref<5x4xf32, #tpu.memory_space<smem>>
    %776 = vector.broadcast %775 : f32 to vector<32x128xf32>
    %777 = arith.mulf %737, %776 : vector<32x128xf32>
    %778 = arith.addf %774, %777 : vector<32x128xf32>
    %c1_396 = arith.constant 1 : index
    %779 = memref.load %arg3[%c1_396] : memref<5xf32, #tpu.memory_space<smem>>
    %780 = vector.broadcast %779 : f32 to vector<32x128xf32>
    %781 = arith.addf %778, %780 : vector<32x128xf32>
    %782 = arith.negf %781 : vector<32x128xf32>
    %783 = math.exp %782 : vector<32x128xf32>
    %cst_397 = arith.constant 1.000000e+00 : f32
    %784 = vector.broadcast %cst_397 : f32 to vector<32x128xf32>
    %785 = arith.addf %784, %783 : vector<32x128xf32>
    %786 = arith.divf %784, %785 : vector<32x128xf32>
    %c0_398 = arith.constant 0 : index
    %c1_399 = arith.constant 1 : index
    %787 = memref.load %arg4[%c0_398, %c1_399] : memref<1x5xf32, #tpu.memory_space<smem>>
    %788 = vector.broadcast %787 : f32 to vector<32x128xf32>
    %789 = arith.mulf %786, %788 : vector<32x128xf32>
    %790 = arith.addf %763, %789 : vector<32x128xf32>
    %c2_400 = arith.constant 2 : index
    %c0_401 = arith.constant 0 : index
    %791 = memref.load %arg2[%c2_400, %c0_401] : memref<5x4xf32, #tpu.memory_space<smem>>
    %792 = vector.broadcast %791 : f32 to vector<32x128xf32>
    %793 = arith.mulf %731, %792 : vector<32x128xf32>
    %c2_402 = arith.constant 2 : index
    %c1_403 = arith.constant 1 : index
    %794 = memref.load %arg2[%c2_402, %c1_403] : memref<5x4xf32, #tpu.memory_space<smem>>
    %795 = vector.broadcast %794 : f32 to vector<32x128xf32>
    %796 = arith.mulf %733, %795 : vector<32x128xf32>
    %797 = arith.addf %793, %796 : vector<32x128xf32>
    %c2_404 = arith.constant 2 : index
    %c2_405 = arith.constant 2 : index
    %798 = memref.load %arg2[%c2_404, %c2_405] : memref<5x4xf32, #tpu.memory_space<smem>>
    %799 = vector.broadcast %798 : f32 to vector<32x128xf32>
    %800 = arith.mulf %735, %799 : vector<32x128xf32>
    %801 = arith.addf %797, %800 : vector<32x128xf32>
    %c2_406 = arith.constant 2 : index
    %c3_407 = arith.constant 3 : index
    %802 = memref.load %arg2[%c2_406, %c3_407] : memref<5x4xf32, #tpu.memory_space<smem>>
    %803 = vector.broadcast %802 : f32 to vector<32x128xf32>
    %804 = arith.mulf %737, %803 : vector<32x128xf32>
    %805 = arith.addf %801, %804 : vector<32x128xf32>
    %c2_408 = arith.constant 2 : index
    %806 = memref.load %arg3[%c2_408] : memref<5xf32, #tpu.memory_space<smem>>
    %807 = vector.broadcast %806 : f32 to vector<32x128xf32>
    %808 = arith.addf %805, %807 : vector<32x128xf32>
    %809 = arith.negf %808 : vector<32x128xf32>
    %810 = math.exp %809 : vector<32x128xf32>
    %cst_409 = arith.constant 1.000000e+00 : f32
    %811 = vector.broadcast %cst_409 : f32 to vector<32x128xf32>
    %812 = arith.addf %811, %810 : vector<32x128xf32>
    %813 = arith.divf %811, %812 : vector<32x128xf32>
    %c0_410 = arith.constant 0 : index
    %c2_411 = arith.constant 2 : index
    %814 = memref.load %arg4[%c0_410, %c2_411] : memref<1x5xf32, #tpu.memory_space<smem>>
    %815 = vector.broadcast %814 : f32 to vector<32x128xf32>
    %816 = arith.mulf %813, %815 : vector<32x128xf32>
    %817 = arith.addf %790, %816 : vector<32x128xf32>
    %c3_412 = arith.constant 3 : index
    %c0_413 = arith.constant 0 : index
    %818 = memref.load %arg2[%c3_412, %c0_413] : memref<5x4xf32, #tpu.memory_space<smem>>
    %819 = vector.broadcast %818 : f32 to vector<32x128xf32>
    %820 = arith.mulf %731, %819 : vector<32x128xf32>
    %c3_414 = arith.constant 3 : index
    %c1_415 = arith.constant 1 : index
    %821 = memref.load %arg2[%c3_414, %c1_415] : memref<5x4xf32, #tpu.memory_space<smem>>
    %822 = vector.broadcast %821 : f32 to vector<32x128xf32>
    %823 = arith.mulf %733, %822 : vector<32x128xf32>
    %824 = arith.addf %820, %823 : vector<32x128xf32>
    %c3_416 = arith.constant 3 : index
    %c2_417 = arith.constant 2 : index
    %825 = memref.load %arg2[%c3_416, %c2_417] : memref<5x4xf32, #tpu.memory_space<smem>>
    %826 = vector.broadcast %825 : f32 to vector<32x128xf32>
    %827 = arith.mulf %735, %826 : vector<32x128xf32>
    %828 = arith.addf %824, %827 : vector<32x128xf32>
    %c3_418 = arith.constant 3 : index
    %c3_419 = arith.constant 3 : index
    %829 = memref.load %arg2[%c3_418, %c3_419] : memref<5x4xf32, #tpu.memory_space<smem>>
    %830 = vector.broadcast %829 : f32 to vector<32x128xf32>
    %831 = arith.mulf %737, %830 : vector<32x128xf32>
    %832 = arith.addf %828, %831 : vector<32x128xf32>
    %c3_420 = arith.constant 3 : index
    %833 = memref.load %arg3[%c3_420] : memref<5xf32, #tpu.memory_space<smem>>
    %834 = vector.broadcast %833 : f32 to vector<32x128xf32>
    %835 = arith.addf %832, %834 : vector<32x128xf32>
    %836 = arith.negf %835 : vector<32x128xf32>
    %837 = math.exp %836 : vector<32x128xf32>
    %cst_421 = arith.constant 1.000000e+00 : f32
    %838 = vector.broadcast %cst_421 : f32 to vector<32x128xf32>
    %839 = arith.addf %838, %837 : vector<32x128xf32>
    %840 = arith.divf %838, %839 : vector<32x128xf32>
    %c0_422 = arith.constant 0 : index
    %c3_423 = arith.constant 3 : index
    %841 = memref.load %arg4[%c0_422, %c3_423] : memref<1x5xf32, #tpu.memory_space<smem>>
    %842 = vector.broadcast %841 : f32 to vector<32x128xf32>
    %843 = arith.mulf %840, %842 : vector<32x128xf32>
    %844 = arith.addf %817, %843 : vector<32x128xf32>
    %c4_424 = arith.constant 4 : index
    %c0_425 = arith.constant 0 : index
    %845 = memref.load %arg2[%c4_424, %c0_425] : memref<5x4xf32, #tpu.memory_space<smem>>
    %846 = vector.broadcast %845 : f32 to vector<32x128xf32>
    %847 = arith.mulf %731, %846 : vector<32x128xf32>
    %c4_426 = arith.constant 4 : index
    %c1_427 = arith.constant 1 : index
    %848 = memref.load %arg2[%c4_426, %c1_427] : memref<5x4xf32, #tpu.memory_space<smem>>
    %849 = vector.broadcast %848 : f32 to vector<32x128xf32>
    %850 = arith.mulf %733, %849 : vector<32x128xf32>
    %851 = arith.addf %847, %850 : vector<32x128xf32>
    %c4_428 = arith.constant 4 : index
    %c2_429 = arith.constant 2 : index
    %852 = memref.load %arg2[%c4_428, %c2_429] : memref<5x4xf32, #tpu.memory_space<smem>>
    %853 = vector.broadcast %852 : f32 to vector<32x128xf32>
    %854 = arith.mulf %735, %853 : vector<32x128xf32>
    %855 = arith.addf %851, %854 : vector<32x128xf32>
    %c4_430 = arith.constant 4 : index
    %c3_431 = arith.constant 3 : index
    %856 = memref.load %arg2[%c4_430, %c3_431] : memref<5x4xf32, #tpu.memory_space<smem>>
    %857 = vector.broadcast %856 : f32 to vector<32x128xf32>
    %858 = arith.mulf %737, %857 : vector<32x128xf32>
    %859 = arith.addf %855, %858 : vector<32x128xf32>
    %c4_432 = arith.constant 4 : index
    %860 = memref.load %arg3[%c4_432] : memref<5xf32, #tpu.memory_space<smem>>
    %861 = vector.broadcast %860 : f32 to vector<32x128xf32>
    %862 = arith.addf %859, %861 : vector<32x128xf32>
    %863 = arith.negf %862 : vector<32x128xf32>
    %864 = math.exp %863 : vector<32x128xf32>
    %cst_433 = arith.constant 1.000000e+00 : f32
    %865 = vector.broadcast %cst_433 : f32 to vector<32x128xf32>
    %866 = arith.addf %865, %864 : vector<32x128xf32>
    %867 = arith.divf %865, %866 : vector<32x128xf32>
    %c0_434 = arith.constant 0 : index
    %c4_435 = arith.constant 4 : index
    %868 = memref.load %arg4[%c0_434, %c4_435] : memref<1x5xf32, #tpu.memory_space<smem>>
    %869 = vector.broadcast %868 : f32 to vector<32x128xf32>
    %870 = arith.mulf %867, %869 : vector<32x128xf32>
    %871 = arith.addf %844, %870 : vector<32x128xf32>
    %c0_436 = arith.constant 0 : index
    %872 = memref.load %arg5[%c0_436] : memref<1xf32, #tpu.memory_space<smem>>
    %873 = vector.broadcast %872 : f32 to vector<32x128xf32>
    %874 = arith.addf %871, %873 : vector<32x128xf32>
    %c160_437 = arith.constant 160 : index
    %c0_438 = arith.constant 0 : index
    %875 = vector.load %arg6[%c160_437, %c0_438] : memref<256x128xf32, #tpu.memory_space<vmem>>, vector<32x128xf32>
    tpu.vector_store %arg6[%c160_437, %c0_438], %874 {strides = array<i32>} : memref<256x128xf32, #tpu.memory_space<vmem>>, vector<32x128xf32>,
    %c0_439 = arith.constant 0 : index
    %c192 = arith.constant 192 : index
    %c0_440 = arith.constant 0 : index
    %876 = vector.load %arg1[%c0_439, %c192, %c0_440] : memref<4x256x128xf32, #tpu.memory_space<vmem>>, vector<1x32x128xf32>
    %877 = vector.shape_cast %876 : vector<1x32x128xf32> to vector<32x128xf32>
    %c1_441 = arith.constant 1 : index
    %c192_442 = arith.constant 192 : index
    %c0_443 = arith.constant 0 : index
    %878 = vector.load %arg1[%c1_441, %c192_442, %c0_443] : memref<4x256x128xf32, #tpu.memory_space<vmem>>, vector<1x32x128xf32>
    %879 = vector.shape_cast %878 : vector<1x32x128xf32> to vector<32x128xf32>
    %c2_444 = arith.constant 2 : index
    %c192_445 = arith.constant 192 : index
    %c0_446 = arith.constant 0 : index
    %880 = vector.load %arg1[%c2_444, %c192_445, %c0_446] : memref<4x256x128xf32, #tpu.memory_space<vmem>>, vector<1x32x128xf32>
    %881 = vector.shape_cast %880 : vector<1x32x128xf32> to vector<32x128xf32>
    %c3_447 = arith.constant 3 : index
    %c192_448 = arith.constant 192 : index
    %c0_449 = arith.constant 0 : index
    %882 = vector.load %arg1[%c3_447, %c192_448, %c0_449] : memref<4x256x128xf32, #tpu.memory_space<vmem>>, vector<1x32x128xf32>
    %883 = vector.shape_cast %882 : vector<1x32x128xf32> to vector<32x128xf32>
    %c0_450 = arith.constant 0 : index
    %c0_451 = arith.constant 0 : index
    %884 = memref.load %arg2[%c0_450, %c0_451] : memref<5x4xf32, #tpu.memory_space<smem>>
    %885 = vector.broadcast %884 : f32 to vector<32x128xf32>
    %886 = arith.mulf %877, %885 : vector<32x128xf32>
    %c0_452 = arith.constant 0 : index
    %c1_453 = arith.constant 1 : index
    %887 = memref.load %arg2[%c0_452, %c1_453] : memref<5x4xf32, #tpu.memory_space<smem>>
    %888 = vector.broadcast %887 : f32 to vector<32x128xf32>
    %889 = arith.mulf %879, %888 : vector<32x128xf32>
    %890 = arith.addf %886, %889 : vector<32x128xf32>
    %c0_454 = arith.constant 0 : index
    %c2_455 = arith.constant 2 : index
    %891 = memref.load %arg2[%c0_454, %c2_455] : memref<5x4xf32, #tpu.memory_space<smem>>
    %892 = vector.broadcast %891 : f32 to vector<32x128xf32>
    %893 = arith.mulf %881, %892 : vector<32x128xf32>
    %894 = arith.addf %890, %893 : vector<32x128xf32>
    %c0_456 = arith.constant 0 : index
    %c3_457 = arith.constant 3 : index
    %895 = memref.load %arg2[%c0_456, %c3_457] : memref<5x4xf32, #tpu.memory_space<smem>>
    %896 = vector.broadcast %895 : f32 to vector<32x128xf32>
    %897 = arith.mulf %883, %896 : vector<32x128xf32>
    %898 = arith.addf %894, %897 : vector<32x128xf32>
    %c0_458 = arith.constant 0 : index
    %899 = memref.load %arg3[%c0_458] : memref<5xf32, #tpu.memory_space<smem>>
    %900 = vector.broadcast %899 : f32 to vector<32x128xf32>
    %901 = arith.addf %898, %900 : vector<32x128xf32>
    %902 = arith.negf %901 : vector<32x128xf32>
    %903 = math.exp %902 : vector<32x128xf32>
    %cst_459 = arith.constant 1.000000e+00 : f32
    %904 = vector.broadcast %cst_459 : f32 to vector<32x128xf32>
    %905 = arith.addf %904, %903 : vector<32x128xf32>
    %906 = arith.divf %904, %905 : vector<32x128xf32>
    %c0_460 = arith.constant 0 : index
    %c0_461 = arith.constant 0 : index
    %907 = memref.load %arg4[%c0_460, %c0_461] : memref<1x5xf32, #tpu.memory_space<smem>>
    %908 = vector.broadcast %907 : f32 to vector<32x128xf32>
    %909 = arith.mulf %906, %908 : vector<32x128xf32>
    %c1_462 = arith.constant 1 : index
    %c0_463 = arith.constant 0 : index
    %910 = memref.load %arg2[%c1_462, %c0_463] : memref<5x4xf32, #tpu.memory_space<smem>>
    %911 = vector.broadcast %910 : f32 to vector<32x128xf32>
    %912 = arith.mulf %877, %911 : vector<32x128xf32>
    %c1_464 = arith.constant 1 : index
    %c1_465 = arith.constant 1 : index
    %913 = memref.load %arg2[%c1_464, %c1_465] : memref<5x4xf32, #tpu.memory_space<smem>>
    %914 = vector.broadcast %913 : f32 to vector<32x128xf32>
    %915 = arith.mulf %879, %914 : vector<32x128xf32>
    %916 = arith.addf %912, %915 : vector<32x128xf32>
    %c1_466 = arith.constant 1 : index
    %c2_467 = arith.constant 2 : index
    %917 = memref.load %arg2[%c1_466, %c2_467] : memref<5x4xf32, #tpu.memory_space<smem>>
    %918 = vector.broadcast %917 : f32 to vector<32x128xf32>
    %919 = arith.mulf %881, %918 : vector<32x128xf32>
    %920 = arith.addf %916, %919 : vector<32x128xf32>
    %c1_468 = arith.constant 1 : index
    %c3_469 = arith.constant 3 : index
    %921 = memref.load %arg2[%c1_468, %c3_469] : memref<5x4xf32, #tpu.memory_space<smem>>
    %922 = vector.broadcast %921 : f32 to vector<32x128xf32>
    %923 = arith.mulf %883, %922 : vector<32x128xf32>
    %924 = arith.addf %920, %923 : vector<32x128xf32>
    %c1_470 = arith.constant 1 : index
    %925 = memref.load %arg3[%c1_470] : memref<5xf32, #tpu.memory_space<smem>>
    %926 = vector.broadcast %925 : f32 to vector<32x128xf32>
    %927 = arith.addf %924, %926 : vector<32x128xf32>
    %928 = arith.negf %927 : vector<32x128xf32>
    %929 = math.exp %928 : vector<32x128xf32>
    %cst_471 = arith.constant 1.000000e+00 : f32
    %930 = vector.broadcast %cst_471 : f32 to vector<32x128xf32>
    %931 = arith.addf %930, %929 : vector<32x128xf32>
    %932 = arith.divf %930, %931 : vector<32x128xf32>
    %c0_472 = arith.constant 0 : index
    %c1_473 = arith.constant 1 : index
    %933 = memref.load %arg4[%c0_472, %c1_473] : memref<1x5xf32, #tpu.memory_space<smem>>
    %934 = vector.broadcast %933 : f32 to vector<32x128xf32>
    %935 = arith.mulf %932, %934 : vector<32x128xf32>
    %936 = arith.addf %909, %935 : vector<32x128xf32>
    %c2_474 = arith.constant 2 : index
    %c0_475 = arith.constant 0 : index
    %937 = memref.load %arg2[%c2_474, %c0_475] : memref<5x4xf32, #tpu.memory_space<smem>>
    %938 = vector.broadcast %937 : f32 to vector<32x128xf32>
    %939 = arith.mulf %877, %938 : vector<32x128xf32>
    %c2_476 = arith.constant 2 : index
    %c1_477 = arith.constant 1 : index
    %940 = memref.load %arg2[%c2_476, %c1_477] : memref<5x4xf32, #tpu.memory_space<smem>>
    %941 = vector.broadcast %940 : f32 to vector<32x128xf32>
    %942 = arith.mulf %879, %941 : vector<32x128xf32>
    %943 = arith.addf %939, %942 : vector<32x128xf32>
    %c2_478 = arith.constant 2 : index
    %c2_479 = arith.constant 2 : index
    %944 = memref.load %arg2[%c2_478, %c2_479] : memref<5x4xf32, #tpu.memory_space<smem>>
    %945 = vector.broadcast %944 : f32 to vector<32x128xf32>
    %946 = arith.mulf %881, %945 : vector<32x128xf32>
    %947 = arith.addf %943, %946 : vector<32x128xf32>
    %c2_480 = arith.constant 2 : index
    %c3_481 = arith.constant 3 : index
    %948 = memref.load %arg2[%c2_480, %c3_481] : memref<5x4xf32, #tpu.memory_space<smem>>
    %949 = vector.broadcast %948 : f32 to vector<32x128xf32>
    %950 = arith.mulf %883, %949 : vector<32x128xf32>
    %951 = arith.addf %947, %950 : vector<32x128xf32>
    %c2_482 = arith.constant 2 : index
    %952 = memref.load %arg3[%c2_482] : memref<5xf32, #tpu.memory_space<smem>>
    %953 = vector.broadcast %952 : f32 to vector<32x128xf32>
    %954 = arith.addf %951, %953 : vector<32x128xf32>
    %955 = arith.negf %954 : vector<32x128xf32>
    %956 = math.exp %955 : vector<32x128xf32>
    %cst_483 = arith.constant 1.000000e+00 : f32
    %957 = vector.broadcast %cst_483 : f32 to vector<32x128xf32>
    %958 = arith.addf %957, %956 : vector<32x128xf32>
    %959 = arith.divf %957, %958 : vector<32x128xf32>
    %c0_484 = arith.constant 0 : index
    %c2_485 = arith.constant 2 : index
    %960 = memref.load %arg4[%c0_484, %c2_485] : memref<1x5xf32, #tpu.memory_space<smem>>
    %961 = vector.broadcast %960 : f32 to vector<32x128xf32>
    %962 = arith.mulf %959, %961 : vector<32x128xf32>
    %963 = arith.addf %936, %962 : vector<32x128xf32>
    %c3_486 = arith.constant 3 : index
    %c0_487 = arith.constant 0 : index
    %964 = memref.load %arg2[%c3_486, %c0_487] : memref<5x4xf32, #tpu.memory_space<smem>>
    %965 = vector.broadcast %964 : f32 to vector<32x128xf32>
    %966 = arith.mulf %877, %965 : vector<32x128xf32>
    %c3_488 = arith.constant 3 : index
    %c1_489 = arith.constant 1 : index
    %967 = memref.load %arg2[%c3_488, %c1_489] : memref<5x4xf32, #tpu.memory_space<smem>>
    %968 = vector.broadcast %967 : f32 to vector<32x128xf32>
    %969 = arith.mulf %879, %968 : vector<32x128xf32>
    %970 = arith.addf %966, %969 : vector<32x128xf32>
    %c3_490 = arith.constant 3 : index
    %c2_491 = arith.constant 2 : index
    %971 = memref.load %arg2[%c3_490, %c2_491] : memref<5x4xf32, #tpu.memory_space<smem>>
    %972 = vector.broadcast %971 : f32 to vector<32x128xf32>
    %973 = arith.mulf %881, %972 : vector<32x128xf32>
    %974 = arith.addf %970, %973 : vector<32x128xf32>
    %c3_492 = arith.constant 3 : index
    %c3_493 = arith.constant 3 : index
    %975 = memref.load %arg2[%c3_492, %c3_493] : memref<5x4xf32, #tpu.memory_space<smem>>
    %976 = vector.broadcast %975 : f32 to vector<32x128xf32>
    %977 = arith.mulf %883, %976 : vector<32x128xf32>
    %978 = arith.addf %974, %977 : vector<32x128xf32>
    %c3_494 = arith.constant 3 : index
    %979 = memref.load %arg3[%c3_494] : memref<5xf32, #tpu.memory_space<smem>>
    %980 = vector.broadcast %979 : f32 to vector<32x128xf32>
    %981 = arith.addf %978, %980 : vector<32x128xf32>
    %982 = arith.negf %981 : vector<32x128xf32>
    %983 = math.exp %982 : vector<32x128xf32>
    %cst_495 = arith.constant 1.000000e+00 : f32
    %984 = vector.broadcast %cst_495 : f32 to vector<32x128xf32>
    %985 = arith.addf %984, %983 : vector<32x128xf32>
    %986 = arith.divf %984, %985 : vector<32x128xf32>
    %c0_496 = arith.constant 0 : index
    %c3_497 = arith.constant 3 : index
    %987 = memref.load %arg4[%c0_496, %c3_497] : memref<1x5xf32, #tpu.memory_space<smem>>
    %988 = vector.broadcast %987 : f32 to vector<32x128xf32>
    %989 = arith.mulf %986, %988 : vector<32x128xf32>
    %990 = arith.addf %963, %989 : vector<32x128xf32>
    %c4_498 = arith.constant 4 : index
    %c0_499 = arith.constant 0 : index
    %991 = memref.load %arg2[%c4_498, %c0_499] : memref<5x4xf32, #tpu.memory_space<smem>>
    %992 = vector.broadcast %991 : f32 to vector<32x128xf32>
    %993 = arith.mulf %877, %992 : vector<32x128xf32>
    %c4_500 = arith.constant 4 : index
    %c1_501 = arith.constant 1 : index
    %994 = memref.load %arg2[%c4_500, %c1_501] : memref<5x4xf32, #tpu.memory_space<smem>>
    %995 = vector.broadcast %994 : f32 to vector<32x128xf32>
    %996 = arith.mulf %879, %995 : vector<32x128xf32>
    %997 = arith.addf %993, %996 : vector<32x128xf32>
    %c4_502 = arith.constant 4 : index
    %c2_503 = arith.constant 2 : index
    %998 = memref.load %arg2[%c4_502, %c2_503] : memref<5x4xf32, #tpu.memory_space<smem>>
    %999 = vector.broadcast %998 : f32 to vector<32x128xf32>
    %1000 = arith.mulf %881, %999 : vector<32x128xf32>
    %1001 = arith.addf %997, %1000 : vector<32x128xf32>
    %c4_504 = arith.constant 4 : index
    %c3_505 = arith.constant 3 : index
    %1002 = memref.load %arg2[%c4_504, %c3_505] : memref<5x4xf32, #tpu.memory_space<smem>>
    %1003 = vector.broadcast %1002 : f32 to vector<32x128xf32>
    %1004 = arith.mulf %883, %1003 : vector<32x128xf32>
    %1005 = arith.addf %1001, %1004 : vector<32x128xf32>
    %c4_506 = arith.constant 4 : index
    %1006 = memref.load %arg3[%c4_506] : memref<5xf32, #tpu.memory_space<smem>>
    %1007 = vector.broadcast %1006 : f32 to vector<32x128xf32>
    %1008 = arith.addf %1005, %1007 : vector<32x128xf32>
    %1009 = arith.negf %1008 : vector<32x128xf32>
    %1010 = math.exp %1009 : vector<32x128xf32>
    %cst_507 = arith.constant 1.000000e+00 : f32
    %1011 = vector.broadcast %cst_507 : f32 to vector<32x128xf32>
    %1012 = arith.addf %1011, %1010 : vector<32x128xf32>
    %1013 = arith.divf %1011, %1012 : vector<32x128xf32>
    %c0_508 = arith.constant 0 : index
    %c4_509 = arith.constant 4 : index
    %1014 = memref.load %arg4[%c0_508, %c4_509] : memref<1x5xf32, #tpu.memory_space<smem>>
    %1015 = vector.broadcast %1014 : f32 to vector<32x128xf32>
    %1016 = arith.mulf %1013, %1015 : vector<32x128xf32>
    %1017 = arith.addf %990, %1016 : vector<32x128xf32>
    %c0_510 = arith.constant 0 : index
    %1018 = memref.load %arg5[%c0_510] : memref<1xf32, #tpu.memory_space<smem>>
    %1019 = vector.broadcast %1018 : f32 to vector<32x128xf32>
    %1020 = arith.addf %1017, %1019 : vector<32x128xf32>
    %c192_511 = arith.constant 192 : index
    %c0_512 = arith.constant 0 : index
    %1021 = vector.load %arg6[%c192_511, %c0_512] : memref<256x128xf32, #tpu.memory_space<vmem>>, vector<32x128xf32>
    tpu.vector_store %arg6[%c192_511, %c0_512], %1020 {strides = array<i32>} : memref<256x128xf32, #tpu.memory_space<vmem>>, vector<32x128xf32>,
    %c0_513 = arith.constant 0 : index
    %c224 = arith.constant 224 : index
    %c0_514 = arith.constant 0 : index
    %1022 = vector.load %arg1[%c0_513, %c224, %c0_514] : memref<4x256x128xf32, #tpu.memory_space<vmem>>, vector<1x32x128xf32>
    %1023 = vector.shape_cast %1022 : vector<1x32x128xf32> to vector<32x128xf32>
    %c1_515 = arith.constant 1 : index
    %c224_516 = arith.constant 224 : index
    %c0_517 = arith.constant 0 : index
    %1024 = vector.load %arg1[%c1_515, %c224_516, %c0_517] : memref<4x256x128xf32, #tpu.memory_space<vmem>>, vector<1x32x128xf32>
    %1025 = vector.shape_cast %1024 : vector<1x32x128xf32> to vector<32x128xf32>
    %c2_518 = arith.constant 2 : index
    %c224_519 = arith.constant 224 : index
    %c0_520 = arith.constant 0 : index
    %1026 = vector.load %arg1[%c2_518, %c224_519, %c0_520] : memref<4x256x128xf32, #tpu.memory_space<vmem>>, vector<1x32x128xf32>
    %1027 = vector.shape_cast %1026 : vector<1x32x128xf32> to vector<32x128xf32>
    %c3_521 = arith.constant 3 : index
    %c224_522 = arith.constant 224 : index
    %c0_523 = arith.constant 0 : index
    %1028 = vector.load %arg1[%c3_521, %c224_522, %c0_523] : memref<4x256x128xf32, #tpu.memory_space<vmem>>, vector<1x32x128xf32>
    %1029 = vector.shape_cast %1028 : vector<1x32x128xf32> to vector<32x128xf32>
    %c0_524 = arith.constant 0 : index
    %c0_525 = arith.constant 0 : index
    %1030 = memref.load %arg2[%c0_524, %c0_525] : memref<5x4xf32, #tpu.memory_space<smem>>
    %1031 = vector.broadcast %1030 : f32 to vector<32x128xf32>
    %1032 = arith.mulf %1023, %1031 : vector<32x128xf32>
    %c0_526 = arith.constant 0 : index
    %c1_527 = arith.constant 1 : index
    %1033 = memref.load %arg2[%c0_526, %c1_527] : memref<5x4xf32, #tpu.memory_space<smem>>
    %1034 = vector.broadcast %1033 : f32 to vector<32x128xf32>
    %1035 = arith.mulf %1025, %1034 : vector<32x128xf32>
    %1036 = arith.addf %1032, %1035 : vector<32x128xf32>
    %c0_528 = arith.constant 0 : index
    %c2_529 = arith.constant 2 : index
    %1037 = memref.load %arg2[%c0_528, %c2_529] : memref<5x4xf32, #tpu.memory_space<smem>>
    %1038 = vector.broadcast %1037 : f32 to vector<32x128xf32>
    %1039 = arith.mulf %1027, %1038 : vector<32x128xf32>
    %1040 = arith.addf %1036, %1039 : vector<32x128xf32>
    %c0_530 = arith.constant 0 : index
    %c3_531 = arith.constant 3 : index
    %1041 = memref.load %arg2[%c0_530, %c3_531] : memref<5x4xf32, #tpu.memory_space<smem>>
    %1042 = vector.broadcast %1041 : f32 to vector<32x128xf32>
    %1043 = arith.mulf %1029, %1042 : vector<32x128xf32>
    %1044 = arith.addf %1040, %1043 : vector<32x128xf32>
    %c0_532 = arith.constant 0 : index
    %1045 = memref.load %arg3[%c0_532] : memref<5xf32, #tpu.memory_space<smem>>
    %1046 = vector.broadcast %1045 : f32 to vector<32x128xf32>
    %1047 = arith.addf %1044, %1046 : vector<32x128xf32>
    %1048 = arith.negf %1047 : vector<32x128xf32>
    %1049 = math.exp %1048 : vector<32x128xf32>
    %cst_533 = arith.constant 1.000000e+00 : f32
    %1050 = vector.broadcast %cst_533 : f32 to vector<32x128xf32>
    %1051 = arith.addf %1050, %1049 : vector<32x128xf32>
    %1052 = arith.divf %1050, %1051 : vector<32x128xf32>
    %c0_534 = arith.constant 0 : index
    %c0_535 = arith.constant 0 : index
    %1053 = memref.load %arg4[%c0_534, %c0_535] : memref<1x5xf32, #tpu.memory_space<smem>>
    %1054 = vector.broadcast %1053 : f32 to vector<32x128xf32>
    %1055 = arith.mulf %1052, %1054 : vector<32x128xf32>
    %c1_536 = arith.constant 1 : index
    %c0_537 = arith.constant 0 : index
    %1056 = memref.load %arg2[%c1_536, %c0_537] : memref<5x4xf32, #tpu.memory_space<smem>>
    %1057 = vector.broadcast %1056 : f32 to vector<32x128xf32>
    %1058 = arith.mulf %1023, %1057 : vector<32x128xf32>
    %c1_538 = arith.constant 1 : index
    %c1_539 = arith.constant 1 : index
    %1059 = memref.load %arg2[%c1_538, %c1_539] : memref<5x4xf32, #tpu.memory_space<smem>>
    %1060 = vector.broadcast %1059 : f32 to vector<32x128xf32>
    %1061 = arith.mulf %1025, %1060 : vector<32x128xf32>
    %1062 = arith.addf %1058, %1061 : vector<32x128xf32>
    %c1_540 = arith.constant 1 : index
    %c2_541 = arith.constant 2 : index
    %1063 = memref.load %arg2[%c1_540, %c2_541] : memref<5x4xf32, #tpu.memory_space<smem>>
    %1064 = vector.broadcast %1063 : f32 to vector<32x128xf32>
    %1065 = arith.mulf %1027, %1064 : vector<32x128xf32>
    %1066 = arith.addf %1062, %1065 : vector<32x128xf32>
    %c1_542 = arith.constant 1 : index
    %c3_543 = arith.constant 3 : index
    %1067 = memref.load %arg2[%c1_542, %c3_543] : memref<5x4xf32, #tpu.memory_space<smem>>
    %1068 = vector.broadcast %1067 : f32 to vector<32x128xf32>
    %1069 = arith.mulf %1029, %1068 : vector<32x128xf32>
    %1070 = arith.addf %1066, %1069 : vector<32x128xf32>
    %c1_544 = arith.constant 1 : index
    %1071 = memref.load %arg3[%c1_544] : memref<5xf32, #tpu.memory_space<smem>>
    %1072 = vector.broadcast %1071 : f32 to vector<32x128xf32>
    %1073 = arith.addf %1070, %1072 : vector<32x128xf32>
    %1074 = arith.negf %1073 : vector<32x128xf32>
    %1075 = math.exp %1074 : vector<32x128xf32>
    %cst_545 = arith.constant 1.000000e+00 : f32
    %1076 = vector.broadcast %cst_545 : f32 to vector<32x128xf32>
    %1077 = arith.addf %1076, %1075 : vector<32x128xf32>
    %1078 = arith.divf %1076, %1077 : vector<32x128xf32>
    %c0_546 = arith.constant 0 : index
    %c1_547 = arith.constant 1 : index
    %1079 = memref.load %arg4[%c0_546, %c1_547] : memref<1x5xf32, #tpu.memory_space<smem>>
    %1080 = vector.broadcast %1079 : f32 to vector<32x128xf32>
    %1081 = arith.mulf %1078, %1080 : vector<32x128xf32>
    %1082 = arith.addf %1055, %1081 : vector<32x128xf32>
    %c2_548 = arith.constant 2 : index
    %c0_549 = arith.constant 0 : index
    %1083 = memref.load %arg2[%c2_548, %c0_549] : memref<5x4xf32, #tpu.memory_space<smem>>
    %1084 = vector.broadcast %1083 : f32 to vector<32x128xf32>
    %1085 = arith.mulf %1023, %1084 : vector<32x128xf32>
    %c2_550 = arith.constant 2 : index
    %c1_551 = arith.constant 1 : index
    %1086 = memref.load %arg2[%c2_550, %c1_551] : memref<5x4xf32, #tpu.memory_space<smem>>
    %1087 = vector.broadcast %1086 : f32 to vector<32x128xf32>
    %1088 = arith.mulf %1025, %1087 : vector<32x128xf32>
    %1089 = arith.addf %1085, %1088 : vector<32x128xf32>
    %c2_552 = arith.constant 2 : index
    %c2_553 = arith.constant 2 : index
    %1090 = memref.load %arg2[%c2_552, %c2_553] : memref<5x4xf32, #tpu.memory_space<smem>>
    %1091 = vector.broadcast %1090 : f32 to vector<32x128xf32>
    %1092 = arith.mulf %1027, %1091 : vector<32x128xf32>
    %1093 = arith.addf %1089, %1092 : vector<32x128xf32>
    %c2_554 = arith.constant 2 : index
    %c3_555 = arith.constant 3 : index
    %1094 = memref.load %arg2[%c2_554, %c3_555] : memref<5x4xf32, #tpu.memory_space<smem>>
    %1095 = vector.broadcast %1094 : f32 to vector<32x128xf32>
    %1096 = arith.mulf %1029, %1095 : vector<32x128xf32>
    %1097 = arith.addf %1093, %1096 : vector<32x128xf32>
    %c2_556 = arith.constant 2 : index
    %1098 = memref.load %arg3[%c2_556] : memref<5xf32, #tpu.memory_space<smem>>
    %1099 = vector.broadcast %1098 : f32 to vector<32x128xf32>
    %1100 = arith.addf %1097, %1099 : vector<32x128xf32>
    %1101 = arith.negf %1100 : vector<32x128xf32>
    %1102 = math.exp %1101 : vector<32x128xf32>
    %cst_557 = arith.constant 1.000000e+00 : f32
    %1103 = vector.broadcast %cst_557 : f32 to vector<32x128xf32>
    %1104 = arith.addf %1103, %1102 : vector<32x128xf32>
    %1105 = arith.divf %1103, %1104 : vector<32x128xf32>
    %c0_558 = arith.constant 0 : index
    %c2_559 = arith.constant 2 : index
    %1106 = memref.load %arg4[%c0_558, %c2_559] : memref<1x5xf32, #tpu.memory_space<smem>>
    %1107 = vector.broadcast %1106 : f32 to vector<32x128xf32>
    %1108 = arith.mulf %1105, %1107 : vector<32x128xf32>
    %1109 = arith.addf %1082, %1108 : vector<32x128xf32>
    %c3_560 = arith.constant 3 : index
    %c0_561 = arith.constant 0 : index
    %1110 = memref.load %arg2[%c3_560, %c0_561] : memref<5x4xf32, #tpu.memory_space<smem>>
    %1111 = vector.broadcast %1110 : f32 to vector<32x128xf32>
    %1112 = arith.mulf %1023, %1111 : vector<32x128xf32>
    %c3_562 = arith.constant 3 : index
    %c1_563 = arith.constant 1 : index
    %1113 = memref.load %arg2[%c3_562, %c1_563] : memref<5x4xf32, #tpu.memory_space<smem>>
    %1114 = vector.broadcast %1113 : f32 to vector<32x128xf32>
    %1115 = arith.mulf %1025, %1114 : vector<32x128xf32>
    %1116 = arith.addf %1112, %1115 : vector<32x128xf32>
    %c3_564 = arith.constant 3 : index
    %c2_565 = arith.constant 2 : index
    %1117 = memref.load %arg2[%c3_564, %c2_565] : memref<5x4xf32, #tpu.memory_space<smem>>
    %1118 = vector.broadcast %1117 : f32 to vector<32x128xf32>
    %1119 = arith.mulf %1027, %1118 : vector<32x128xf32>
    %1120 = arith.addf %1116, %1119 : vector<32x128xf32>
    %c3_566 = arith.constant 3 : index
    %c3_567 = arith.constant 3 : index
    %1121 = memref.load %arg2[%c3_566, %c3_567] : memref<5x4xf32, #tpu.memory_space<smem>>
    %1122 = vector.broadcast %1121 : f32 to vector<32x128xf32>
    %1123 = arith.mulf %1029, %1122 : vector<32x128xf32>
    %1124 = arith.addf %1120, %1123 : vector<32x128xf32>
    %c3_568 = arith.constant 3 : index
    %1125 = memref.load %arg3[%c3_568] : memref<5xf32, #tpu.memory_space<smem>>
    %1126 = vector.broadcast %1125 : f32 to vector<32x128xf32>
    %1127 = arith.addf %1124, %1126 : vector<32x128xf32>
    %1128 = arith.negf %1127 : vector<32x128xf32>
    %1129 = math.exp %1128 : vector<32x128xf32>
    %cst_569 = arith.constant 1.000000e+00 : f32
    %1130 = vector.broadcast %cst_569 : f32 to vector<32x128xf32>
    %1131 = arith.addf %1130, %1129 : vector<32x128xf32>
    %1132 = arith.divf %1130, %1131 : vector<32x128xf32>
    %c0_570 = arith.constant 0 : index
    %c3_571 = arith.constant 3 : index
    %1133 = memref.load %arg4[%c0_570, %c3_571] : memref<1x5xf32, #tpu.memory_space<smem>>
    %1134 = vector.broadcast %1133 : f32 to vector<32x128xf32>
    %1135 = arith.mulf %1132, %1134 : vector<32x128xf32>
    %1136 = arith.addf %1109, %1135 : vector<32x128xf32>
    %c4_572 = arith.constant 4 : index
    %c0_573 = arith.constant 0 : index
    %1137 = memref.load %arg2[%c4_572, %c0_573] : memref<5x4xf32, #tpu.memory_space<smem>>
    %1138 = vector.broadcast %1137 : f32 to vector<32x128xf32>
    %1139 = arith.mulf %1023, %1138 : vector<32x128xf32>
    %c4_574 = arith.constant 4 : index
    %c1_575 = arith.constant 1 : index
    %1140 = memref.load %arg2[%c4_574, %c1_575] : memref<5x4xf32, #tpu.memory_space<smem>>
    %1141 = vector.broadcast %1140 : f32 to vector<32x128xf32>
    %1142 = arith.mulf %1025, %1141 : vector<32x128xf32>
    %1143 = arith.addf %1139, %1142 : vector<32x128xf32>
    %c4_576 = arith.constant 4 : index
    %c2_577 = arith.constant 2 : index
    %1144 = memref.load %arg2[%c4_576, %c2_577] : memref<5x4xf32, #tpu.memory_space<smem>>
    %1145 = vector.broadcast %1144 : f32 to vector<32x128xf32>
    %1146 = arith.mulf %1027, %1145 : vector<32x128xf32>
    %1147 = arith.addf %1143, %1146 : vector<32x128xf32>
    %c4_578 = arith.constant 4 : index
    %c3_579 = arith.constant 3 : index
    %1148 = memref.load %arg2[%c4_578, %c3_579] : memref<5x4xf32, #tpu.memory_space<smem>>
    %1149 = vector.broadcast %1148 : f32 to vector<32x128xf32>
    %1150 = arith.mulf %1029, %1149 : vector<32x128xf32>
    %1151 = arith.addf %1147, %1150 : vector<32x128xf32>
    %c4_580 = arith.constant 4 : index
    %1152 = memref.load %arg3[%c4_580] : memref<5xf32, #tpu.memory_space<smem>>
    %1153 = vector.broadcast %1152 : f32 to vector<32x128xf32>
    %1154 = arith.addf %1151, %1153 : vector<32x128xf32>
    %1155 = arith.negf %1154 : vector<32x128xf32>
    %1156 = math.exp %1155 : vector<32x128xf32>
    %cst_581 = arith.constant 1.000000e+00 : f32
    %1157 = vector.broadcast %cst_581 : f32 to vector<32x128xf32>
    %1158 = arith.addf %1157, %1156 : vector<32x128xf32>
    %1159 = arith.divf %1157, %1158 : vector<32x128xf32>
    %c0_582 = arith.constant 0 : index
    %c4_583 = arith.constant 4 : index
    %1160 = memref.load %arg4[%c0_582, %c4_583] : memref<1x5xf32, #tpu.memory_space<smem>>
    %1161 = vector.broadcast %1160 : f32 to vector<32x128xf32>
    %1162 = arith.mulf %1159, %1161 : vector<32x128xf32>
    %1163 = arith.addf %1136, %1162 : vector<32x128xf32>
    %c0_584 = arith.constant 0 : index
    %1164 = memref.load %arg5[%c0_584] : memref<1xf32, #tpu.memory_space<smem>>
    %1165 = vector.broadcast %1164 : f32 to vector<32x128xf32>
    %1166 = arith.addf %1163, %1165 : vector<32x128xf32>
    %c224_585 = arith.constant 224 : index
    %c0_586 = arith.constant 0 : index
    %1167 = vector.load %arg6[%c224_585, %c0_586] : memref<256x128xf32, #tpu.memory_space<vmem>>, vector<32x128xf32>
    tpu.vector_store %arg6[%c224_585, %c0_586], %1166 {strides = array<i32>} : memref<256x128xf32, #tpu.memory_space<vmem>>, vector<32x128xf32>,
    return
  }
  func.func @transform_0(%arg0: i32) -> (i32, i32, i32) {
    %c0_i32 = arith.constant 0 : i32
    %c0_i32_0 = arith.constant 0 : i32
    %c0_i32_1 = arith.constant 0 : i32
    return %c0_i32, %arg0, %c0_i32_0 : i32, i32, i32
  }
  func.func @transform_1(%arg0: i32) -> (i32, i32) {
    %c0_i32 = arith.constant 0 : i32
    %c0_i32_0 = arith.constant 0 : i32
    %c0_i32_1 = arith.constant 0 : i32
    return %c0_i32, %c0_i32_0 : i32, i32
  }
  func.func @transform_2(%arg0: i32) -> i32 {
    %c0_i32 = arith.constant 0 : i32
    %c0_i32_0 = arith.constant 0 : i32
    return %c0_i32 : i32
  }
  func.func @transform_3(%arg0: i32) -> (i32, i32) {
    %c0_i32 = arith.constant 0 : i32
    %c0_i32_0 = arith.constant 0 : i32
    %c0_i32_1 = arith.constant 0 : i32
    return %c0_i32, %c0_i32_0 : i32, i32
  }
  func.func @transform_4(%arg0: i32) -> i32 {
    %c0_i32 = arith.constant 0 : i32
    %c0_i32_0 = arith.constant 0 : i32
    return %c0_i32 : i32
  }
  func.func @transform_5(%arg0: i32) -> (i32, i32) {
    %c0_i32 = arith.constant 0 : i32
    %c0_i32_0 = arith.constant 0 : i32
    return %arg0, %c0_i32 : i32, i32
  }
}

</mosaic_0001>

<bundles_post_ra>
// kernel: tpu_custom_call.1
= control target key start
LH: loop header
LB: loop body
LE: loop exit
PB: predicated region body
PF: predicated region fallthrough
CT: control target
= control target key end

     0   :  { %11 = vsyncpa [#allocation6], 0  ;;  %s7186_s0 = inlined_call_operand.vmem [shape: f32[4,1,128], index: 0, kind: input, shape index: {}]   ;;  %s7187_s1 = inlined_call_operand.vmem [shape: f32[5,4], index: 1, kind: input, shape index: {}]   ;;  %s7188_s2 = inlined_call_operand.vmem [shape: f32[5], index: 2, kind: input, shape index: {}]   ;;  %s7189_s3 = inlined_call_operand.vmem [shape: f32[1,5], index: 3, kind: input, shape index: {}]   ;;  %s7190_s4 = inlined_call_operand.<no memory space> [shape: f32[1], index: 4, kind: input, shape index: {}]   ;;  %s7191_s5 = inlined_call_operand.hbm [shape: f32[1,128], index: 5, kind: output, shape index: {}]  }
   0x1   :  { %12 = vsyncpa [#allocation8], 0  ;;  %s75_s20 = sshll.u32 %s7188_s2, 4  ;;  %s76_s20 = int_to_ptr.vmem [resolvable:$true] %s75_s20 }
   0x2   :  { %13 = vsyncpa [#allocation5], 0  ;;  %v31_v0 = vld [vmem:[%s7186_s0] sm:$0x1]  ;;  %v33_v1 = vld [vmem:[%s7186_s0 + $0x1] sm:$0x1]  ;;  %p4373_p1 = scmp.lt.s32.totalorder %s76_s20, %s76_s20 }
   0x3   :  { %32 = vst [vmem:[#allocation3] sm:$0x1] %v31_v0  ;;  %v35_v2 = vld [vmem:[%s7186_s0 + $0x2] sm:$0x1]  ;;  %v37_v3 = vld [vmem:[%s7186_s0 + $0x3] sm:$0x1] }
   0x4   :  { %s4368_s2 = scalar_lea.vmem %s76_s20, 16 }
   0x5   :  { %p4369_p0 = scmp.ne.s32.totalorder %s76_s20, %s4368_s2  ;;  %p4374_p2 = scmp.lt.s32.totalorder %s4368_s2, %s4368_s2 }
   0x7   :  { %p4375_p3 = por %p4374_p2, %p4373_p1 }
   0x9   :  { %p4376_p4 = pnand %p4375_p3, %p4369_p0 }
   0xb   :  { %4379 = shalt.err (!%p4376_p4)
}
   0xc   :  { %s4432_s29 = smov [#allocation7]   ;;  %34 = vst [vmem:[#allocation3 + $0x100] sm:$0x1] %v33_v1  ;;  %36 = vst [vmem:[#allocation3 + $0x200] sm:$0x1] %v35_v2  ;;  %s65_s7 = sshll.u32 %s7187_s1, 4  ;;  %s66_s7 = int_to_ptr.vmem [resolvable:$true] %s65_s7 }
   0xd   :  { %78 = dma.vmem_to_smem %s76_s20, 16, %s4432_s29, [#allocation8]   ;;  %38 = vst [vmem:[#allocation3 + $0x300] sm:$0x1] %v37_v3 }
   0xe   :  { %s85_s0 = sshll.u32 %s7189_s3, 4  ;;  %s4380_s10 = scalar_lea.vmem %s66_s7, 128  ;;  %s86_s0 = int_to_ptr.vmem [resolvable:$true] %s85_s0 }
   0xf   :  { %p4381_p5 = scmp.ne.s32.totalorder %s66_s7, %s4380_s10  ;;  %p4385_p6 = scmp.lt.s32.totalorder %s66_s7, %s66_s7 }
  0x10   :  { %p4386_p7 = scmp.lt.s32.totalorder %s4380_s10, %s4380_s10 }
  0x12   :  { %p4387_p8 = por %p4386_p7, %p4385_p6 }
  0x14   :  { %p4388_p9 = pnand %p4387_p8, %p4381_p5 }
  0x16   :  { %4391 = shalt.err (!%p4388_p9)
}
  0x17   :  { %s4433_s11 = smov [#allocation4]   ;;  %s4392_s12 = scalar_lea.vmem %s86_s0, 16 }
  0x18   :  { %68 = dma.vmem_to_smem %s66_s7, 128, %s4433_s11, [#allocation6]  }
  0x19   :  { %p4393_p10 = scmp.ne.s32.totalorder %s86_s0, %s4392_s12  ;;  %p4397_p11 = scmp.lt.s32.totalorder %s86_s0, %s86_s0 }
  0x1a   :  { %p4398_p12 = scmp.lt.s32.totalorder %s4392_s12, %s4392_s12 }
  0x1c   :  { %p4399_p13 = por %p4398_p12, %p4397_p11 }
  0x1e   :  { %p4400_p0 = pnand %p4399_p13, %p4393_p10 }
  0x20   :  { %4403 = shalt.err (!%p4400_p0)
}
  0x21   :  { %s4434_s1 = smov [#allocation9]  }
  0x22   :  { %88 = dma.vmem_to_smem %s86_s0, 16, %s4434_s1, [#allocation8]  }
  0x23   :  { %4426 = dma.done.wait [#allocation6], 128  }
  0x24   :  { %4427 = vsyncadd [#allocation6], 4294967168 }
  0x25   :  { %4428 = dma.done.wait [#allocation8], 32  }
  0x26   :  { %4429 = vsyncadd [#allocation8], 4294967264 }
  0x27   :  { %102 = sfence }
  0x28   :  { %s122_s3 = sld [smem:[#allocation4]]  ;;  %s3344_s13 = sld [smem:[#allocation4 + $0x1]]  ;;  %v4489_v4 = vld [vmem:[#allocation3] sm:$0xff]  ;;  %v4491_v5 = vld [vmem:[#allocation3 + $0x8] sm:$0xff]  ;;  %v4493_v6 = vld [vmem:[#allocation3 + $0x10] sm:$0xff]  ;;  %v4542_v24 = vstv %s7190_s4 }
  0x29   :  { %s3345_s14 = sld [smem:[#allocation4 + $0x2]]  ;;  %v4495_v7 = vld [vmem:[#allocation3 + $0x18] sm:$0xff]  ;;  %s4497_s15 = sld [smem:[#allocation4 + $0x3]]  ;;  %v4501_v8 = vld [vmem:[#allocation3 + $0x100] sm:$0xff]  ;;  %v4503_v9 = vld [vmem:[#allocation3 + $0x108] sm:$0xff] }
  0x2a   :  { %s4499_s16 = sld [smem:[#allocation7]]  ;;  %v4507_v10 = vld [vmem:[#allocation3 + $0x20] sm:$0xff]  ;;  %v4509_v11 = vld [vmem:[#allocation3 + $0x110] sm:$0xff]  ;;  %v4511_v12 = vld [vmem:[#allocation3 + $0x118] sm:$0xff]  ;;  %s4535_s18 = sld [smem:[#allocation4 + $0x81]] }
  0x2b   :  { %s4505_s17 = sld [smem:[#allocation4 + $0x80]]  ;;  %v4513_v13 = vld [vmem:[#allocation3 + $0x200] sm:$0xff]  ;;  %v4517_v15 = vld [vmem:[#allocation3 + $0x208] sm:$0xff]  ;;  %v4519_v16 = vld [vmem:[#allocation3 + $0x210] sm:$0xff]  ;;  %s4537_s19 = sld [smem:[#allocation4 + $0x82]] }
  0x2c   :  { %v4521_v17 = vld [vmem:[#allocation3 + $0x218] sm:$0xff]  ;;  %s4556_s22 = sld [smem:[#allocation4 + $0x83]]  ;;  %s4558_s4 = sld [smem:[#allocation7 + $0x1]]  ;;  %v4560_v30 = vld [vmem:[#allocation3 + $0x28] sm:$0xff]  ;;  %v4562_v31 = vld [vmem:[#allocation3 + $0x300] sm:$0xff] }
  0x2d   :  { %v4572_v36 = vld [vmem:[#allocation3 + $0x308] sm:$0xff]  ;;  %v4574_v37 = vld [vmem:[#allocation3 + $0x310] sm:$0xff]  ;;  %v4576_v38 = vld [vmem:[#allocation3 + $0x318] sm:$0xff]  ;;  %s4623_s23 = sld [smem:[#allocation9]]  ;;  %s4637_s25 = sld [smem:[#allocation4 + $0x101]] }
  0x2e   :  { %v4515_v14 = vstv %s122_s3  ;;  %v4531_v22 = vstv %s3344_s13  ;;  %s4625_s24 = sld [smem:[#allocation4 + $0x100]]  ;;  %s4639_s26 = sld [smem:[#allocation4 + $0x102]] }
  0x2f   :  { %v124_v18 = vmul.f32 %v4515_v14, %v4489_v4  ;;  %v125_v19 = vmul.f32 %v4515_v14, %v4491_v5  ;;  %v126_v20 = vmul.f32 %v4515_v14, %v4493_v6  ;;  %v127_v21 = vmul.f32 %v4515_v14, %v4495_v7  ;;  %s4673_s27 = sld [smem:[#allocation9 + $0x1]]  ;;  %s4681_s28 = sld [smem:[#allocation4 + $0x103]] }
  0x30   :  { %v4533_v23 = vstv %s3345_s14  ;;  %v4546_v25 = vmul.f32 %v4507_v10, %v4515_v14  ;;  %v130_v26 = vmul.f32 %v4531_v22, %v4501_v8  ;;  %v131_v27 = vmul.f32 %v4531_v22, %v4503_v9  ;;  %s4687_s2 = sld [smem:[#allocation7 + $0x2]]  ;;  %s4693_s29 = sld [smem:[#allocation4 + $0x180]] }
  0x31   :  { %v132_v28 = vmul.f32 %v4531_v22, %v4509_v11  ;;  %v133_v29 = vmul.f32 %v4531_v22, %v4511_v12  ;;  %v140_v32 = vmul.f32 %v4533_v23, %v4513_v13  ;;  %v141_v33 = vmul.f32 %v4533_v23, %v4517_v15  ;;  %s4697_s30 = sld [smem:[#allocation9 + $0x2]]  ;;  %s4703_s6 = sld [smem:[#allocation4 + $0x181]] }
  0x32   :  { %v142_v34 = vmul.f32 %v4533_v23, %v4519_v16  ;;  %v143_v35 = vmul.f32 %v4533_v23, %v4521_v17  ;;  %v134_v39 = vadd.f32 %v130_v26, %v124_v18  ;;  %v135_v40 = vadd.f32 %v131_v27, %v125_v19  ;;  %s4730_s7 = sld [smem:[#allocation4 + $0x182]]  ;;  %s4749_s8 = sld [smem:[#allocation4 + $0x183]] }
  0x33   :  { %v136_v41 = vadd.f32 %v132_v28, %v126_v20  ;;  %v137_v42 = vadd.f32 %v133_v29, %v127_v21  ;;  %v4579_v43 = vstv %s4497_s15  ;;  %v4582_v44 = vstv %s4499_s16  ;;  %s4755_s9 = sld [smem:[#allocation7 + $0x3]]  ;;  %s4762_s10 = sld [smem:[#allocation4 + $0x200]] }
  0x34   :  { %v4585_v45 = vstv %s4505_s17  ;;  %v4589_v46 = vmul.f32 %v4560_v30, %v4515_v14  ;;  %v144_v47 = vadd.f32 %v140_v32, %v134_v39  ;;  %v145_v48 = vadd.f32 %v141_v33, %v135_v40  ;;  %s4760_s0 = sld [smem:[#allocation9 + $0x3]]  ;;  %s4765_s11 = sld [smem:[#allocation4 + $0x201]] }
  0x35   :  { %v146_v49 = vadd.f32 %v142_v34, %v136_v41  ;;  %v147_v50 = vadd.f32 %v143_v35, %v137_v42  ;;  %v150_v51 = vmul.f32 %v4579_v43, %v4562_v31  ;;  %v151_v52 = vmul.f32 %v4579_v43, %v4572_v36  ;;  %s4811_s12 = sld [smem:[#allocation4 + $0x202]]  ;;  %s4822_s1 = sld [smem:[#allocation4 + $0x203]] }
  0x36   :  { %v152_v53 = vmul.f32 %v4579_v43, %v4574_v37  ;;  %v153_v54 = vmul.f32 %v4579_v43, %v4576_v38  ;;  %v196_v55 = vmul.f32 %v4585_v45, %v4489_v4  ;;  %v197_v56 = vmul.f32 %v4585_v45, %v4491_v5  ;;  %s4834_s3 = sld [smem:[#allocation7 + $0x4]]  ;;  %s5107_s14 = sld [smem:[#allocation4]] }
  0x37   :  { %v198_v57 = vmul.f32 %v4585_v45, %v4493_v6  ;;  %v199_v58 = vmul.f32 %v4585_v45, %v4495_v7  ;;  %v154_v59 = vadd.f32 %v150_v51, %v144_v47  ;;  %v155_v60 = vadd.f32 %v151_v52, %v145_v48  ;;  %s4840_s13 = sld [smem:[#allocation9 + $0x4]]  ;;  %s5109_s15 = sld [smem:[#allocation4 + $0x1]] }
  0x38   :  { %v156_v61 = vadd.f32 %v152_v53, %v146_v49  ;;  %v157_v62 = vadd.f32 %v153_v54, %v147_v50  ;;  %v4608_v63 = vstv %s4535_s18  ;;  %v4611_v0 = vstv %s4537_s19  ;;  %s5161_s16 = sld [smem:[#allocation4 + $0x2]]  ;;  %s5176_s17 = sld [smem:[#allocation4 + $0x3]] }
  0x39   :  { %v4614_v1 = vstv %s4556_s22  ;;  %v4617_v2 = vstv %s4558_s4  ;;  %v160_v3 = vadd.f32 %v4582_v44, %v154_v59  ;;  %v161_v18 = vadd.f32 %v4582_v44, %v155_v60  ;;  %s5192_s18 = sld [smem:[#allocation7]]  ;;  %s5205_s20 = sld [smem:[#allocation4 + $0x81]] }
  0x3a   :  { %v162_v19 = vadd.f32 %v4582_v44, %v156_v61  ;;  %v163_v20 = vadd.f32 %v4582_v44, %v157_v62  ;;  %v202_v21 = vmul.f32 %v4608_v63, %v4501_v8  ;;  %v203_v26 = vmul.f32 %v4608_v63, %v4503_v9  ;;  %s5199_s19 = sld [smem:[#allocation4 + $0x80]]  ;;  %s5257_s21 = sld [smem:[#allocation4 + $0x82]] }
  0x3b   :  { %v204_v27 = vmul.f32 %v4608_v63, %v4509_v11  ;;  %v205_v28 = vmul.f32 %v4608_v63, %v4511_v12  ;;  %v3347_v29 = vmul.f32 -1.442695, %v160_v3  ;;  %v3348_v32 = vmul.f32 -1.442695, %v161_v18  ;;  %s5264_s22 = sld [smem:[#allocation4 + $0x83]]  ;;  %s5266_s4 = sld [smem:[#allocation7 + $0x1]] }
  0x3c   :  { %v3349_v33 = vmul.f32 -1.442695, %v162_v19  ;;  %v212_v34 = vmul.f32 %v4611_v0, %v4513_v13  ;;  %v3350_v35 = vmul.f32 -1.442695, %v163_v20  ;;  %v206_v39 = vadd.f32 %v202_v21, %v196_v55 }
  0x3d   :  { %v207_v40 = vadd.f32 %v203_v26, %v197_v56  ;;  %v208_v41 = vadd.f32 %v204_v27, %v198_v57  ;;  %3726 = vpow2.f32 %v3347_v29  ;;  %v209_v42 = vadd.f32 %v205_v28, %v199_v58 }
  0x3e   :  { %v213_v47 = vmul.f32 %v4611_v0, %v4517_v15  ;;  %v214_v48 = vmul.f32 %v4611_v0, %v4519_v16  ;;  %3728 = vpow2.f32 %v3348_v32  ;;  %v215_v49 = vmul.f32 %v4611_v0, %v4521_v17 }
  0x3f   :  { %v216_v50 = vadd.f32 %v212_v34, %v206_v39  ;;  %v222_v51 = vmul.f32 %v4614_v1, %v4562_v31  ;;  %3730 = vpow2.f32 %v3349_v33  ;;  %v223_v54 = vmul.f32 %v4614_v1, %v4572_v36 }
  0x40   :  { %v217_v52 = vadd.f32 %v213_v47, %v207_v40  ;;  %v218_v53 = vadd.f32 %v214_v48, %v208_v41  ;;  %3732 = vpow2.f32 %v3350_v35  ;;  %v219_v55 = vadd.f32 %v215_v49, %v209_v42 }
  0x41   :  { %v224_v56 = vmul.f32 %v4614_v1, %v4574_v37  ;;  %v225_v57 = vmul.f32 %v4614_v1, %v4576_v38  ;;  %v4656_v58 = vstv %s4623_s23  ;;  %v226_v59 = vadd.f32 %v222_v51, %v216_v50  ;;  %s5281_s23 = sld [smem:[#allocation4 + $0x100]] }
  0x42   :  { %7266 = vst [vmem:[#allocation14_spill] sm:$0xff] %v4656_v58  ;;  %v227_v60 = vadd.f32 %v223_v54, %v217_v52  ;;  %v4659_v61 = vstv %s4625_s24  ;;  %v4676_v32 = vstv %s4637_s25  ;;  %v4679_v33 = vstv %s4639_s26  ;;  %s5307_s24 = sld [smem:[#allocation9]]  ;;  %s5318_s25 = sld [smem:[#allocation4 + $0x101]] }
  0x43   :  { %v228_v62 = vadd.f32 %v224_v56, %v218_v53  ;;  %v229_v3 = vadd.f32 %v225_v57, %v219_v55  ;;  %v272_v18 = vmul.f32 %v4659_v61, %v4489_v4  ;;  %v273_v19 = vmul.f32 %v4659_v61, %v4491_v5  ;;  %s5324_s26 = sld [smem:[#allocation4 + $0x102]] }
  0x44   :  { %v232_v20 = vadd.f32 %v4617_v2, %v226_v59  ;;  %v233_v21 = vadd.f32 %v4617_v2, %v227_v60  ;;  %v274_v26 = vmul.f32 %v4659_v61, %v4493_v6  ;;  %v275_v27 = vmul.f32 %v4659_v61, %v4495_v7 }
  0x45   :  { %v234_v28 = vadd.f32 %v4617_v2, %v228_v62  ;;  %v235_v29 = vadd.f32 %v4617_v2, %v229_v3  ;;  %v278_v39 = vmul.f32 %v4676_v32, %v4501_v8  ;;  %v279_v40 = vmul.f32 %v4676_v32, %v4503_v9 }
  0x46   :  { %v3356_v34 = vmul.f32 -1.442695, %v232_v20  ;;  %v3357_v35 = vmul.f32 -1.442695, %v233_v21  ;;  %v280_v47 = vmul.f32 %v4676_v32, %v4509_v11  ;;  %v281_v48 = vmul.f32 %v4676_v32, %v4511_v12 }
  0x47   :  { %v3358_v41 = vmul.f32 -1.442695, %v234_v28  ;;  %v3359_v42 = vmul.f32 -1.442695, %v235_v29  ;;  %v3727_v49 = vpop.eup %3726  ;;  %v282_v50 = vadd.f32 %v278_v39, %v272_v18  ;;  %v283_v51 = vadd.f32 %v279_v40, %v273_v19 }
  0x48   :  { %3734 = vpow2.f32 %v3356_v34  ;;  %v288_v52 = vmul.f32 %v4679_v33, %v4513_v13  ;;  %v3729_v53 = vpop.eup %3728  ;;  %v176_v54 = vadd.f32 1.0, %v3727_v49  ;;  %v284_v55 = vadd.f32 %v280_v47, %v274_v26 }
  0x49   :  { %3736 = vpow2.f32 %v3357_v35  ;;  %v285_v56 = vadd.f32 %v281_v48, %v275_v27  ;;  %v3731_v57 = vpop.eup %3730  ;;  %v177_v59 = vadd.f32 1.0, %v3729_v53  ;;  %v289_v60 = vmul.f32 %v4679_v33, %v4517_v15 }
  0x4a   :  { %3738 = vpow2.f32 %v3358_v41  ;;  %v290_v62 = vmul.f32 %v4679_v33, %v4519_v16  ;;  %v3733_v3 = vpop.eup %3732  ;;  %v178_v18 = vadd.f32 1.0, %v3731_v57  ;;  %v291_v19 = vmul.f32 %v4679_v33, %v4521_v17 }
  0x4b   :  { %3740 = vrcp.f32 %v176_v54  ;;  %v292_v20 = vadd.f32 %v288_v52, %v282_v50  ;;  %v179_v21 = vadd.f32 1.0, %v3733_v3  ;;  %v293_v26 = vadd.f32 %v289_v60, %v283_v51 }
  0x4c   :  { %3742 = vrcp.f32 %v177_v59  ;;  %v294_v27 = vadd.f32 %v290_v62, %v284_v55  ;;  %v4708_v28 = vstv %s4673_s27  ;;  %v295_v29 = vadd.f32 %v291_v19, %v285_v56  ;;  %s5330_s27 = sld [smem:[#allocation9 + $0x1]] }
  0x4d   :  { %3744 = vrcp.f32 %v178_v18  ;;  %v4711_v34 = vstv %s4681_s28  ;;  %v4722_v47 = vstv %s4687_s2  ;;  %v4725_v48 = vstv %s4693_s29  ;;  %s5332_s28 = sld [smem:[#allocation4 + $0x103]]  ;;  %s5342_s2 = sld [smem:[#allocation7 + $0x2]] }
  0x4e   :  { %7267 = vst [vmem:[#allocation15_spill] sm:$0xff] %v4711_v34  ;;  %3746 = vrcp.f32 %v179_v21  ;;  %v298_v35 = vmul.f32 %v4711_v34, %v4562_v31  ;;  %v299_v39 = vmul.f32 %v4711_v34, %v4572_v36  ;;  %v300_v40 = vmul.f32 %v4711_v34, %v4574_v37  ;;  %7268 = vst [vmem:[#allocation16_spill] sm:$0xff] %v4722_v47  ;;  %s5351_s29 = sld [smem:[#allocation4 + $0x180]] }
  0x4f   :  { %3748 = vpow2.f32 %v3359_v42  ;;  %v301_v41 = vmul.f32 %v4711_v34, %v4576_v38  ;;  %7269 = vst [vmem:[#allocation17_spill] sm:$0xff] %v4725_v48  ;;  %v4728_v52 = vstv %s4697_s30  ;;  %v348_v54 = vmul.f32 %v4725_v48, %v4489_v4  ;;  %s5381_s30 = sld [smem:[#allocation4 + $0x181]] }
  0x50   :  { %v302_v49 = vadd.f32 %v298_v35, %v292_v20  ;;  %v303_v50 = vadd.f32 %v299_v39, %v293_v26  ;;  %v304_v51 = vadd.f32 %v300_v40, %v294_v27  ;;  %v349_v42 = vmul.f32 %v4725_v48, %v4491_v5 }
  0x51   :  { %v305_v53 = vadd.f32 %v301_v41, %v295_v29  ;;  %v350_v55 = vmul.f32 %v4725_v48, %v4493_v6  ;;  %v4742_v62 = vstv %s4703_s6  ;;  %v351_v35 = vmul.f32 %v4725_v48, %v4495_v7  ;;  %s5395_s6 = sld [smem:[#allocation4 + $0x182]] }
  0x52   :  { %v3735_v56 = vpop.eup %3734  ;;  %v308_v57 = vadd.f32 %v4722_v47, %v302_v49  ;;  %v309_v59 = vadd.f32 %v4722_v47, %v303_v50  ;;  %v310_v60 = vadd.f32 %v4722_v47, %v304_v51  ;;  %7270 = vst [vmem:[#allocation18_spill] sm:$0xff] %v4742_v62  ;;  %v354_v20 = vmul.f32 %v4742_v62, %v4501_v8 }
  0x53   :  { %v3737_v3 = vpop.eup %3736  ;;  %v248_v18 = vadd.f32 1.0, %v3735_v56  ;;  %v311_v19 = vadd.f32 %v4722_v47, %v305_v53  ;;  %v355_v21 = vmul.f32 %v4742_v62, %v4503_v9  ;;  %v356_v39 = vmul.f32 %v4742_v62, %v4509_v11 }
  0x54   :  { %v3739_v26 = vpop.eup %3738  ;;  %v249_v27 = vadd.f32 1.0, %v3737_v3  ;;  %v3366_v29 = vmul.f32 -1.442695, %v308_v57  ;;  %v3367_v49 = vmul.f32 -1.442695, %v309_v59  ;;  %v357_v57 = vmul.f32 %v4742_v62, %v4511_v12 }
  0x55   :  { %v3741_v40 = vpop.eup %3740  ;;  %v250_v41 = vadd.f32 1.0, %v3739_v26  ;;  %3750 = vrcp.f32 %v248_v18  ;;  %v3368_v50 = vmul.f32 -1.442695, %v310_v60  ;;  %v3369_v56 = vmul.f32 -1.442695, %v311_v19 }
  0x56   :  { %v3743_v51 = vpop.eup %3742  ;;  %v190_v53 = vmul.f32 %v3741_v40, %v4656_v58  ;;  %3752 = vrcp.f32 %v249_v27  ;;  %v358_v18 = vadd.f32 %v354_v20, %v348_v54  ;;  %v359_v59 = vadd.f32 %v355_v21, %v349_v42 }
  0x57   :  { %v3745_v3 = vpop.eup %3744  ;;  %v191_v47 = vmul.f32 %v3743_v51, %v4656_v58  ;;  %3754 = vrcp.f32 %v250_v41  ;;  %v360_v26 = vadd.f32 %v356_v39, %v350_v55  ;;  %v361_v19 = vadd.f32 %v357_v57, %v351_v35 }
  0x58   :  { %v3747_v60 = vpop.eup %3746  ;;  %3756 = vpow2.f32 %v3366_v29  ;;  %v4768_v27 = vstv %s4730_s7  ;;  %v192_v62 = vmul.f32 %v3745_v3, %v4656_v58  ;;  %v4780_v35 = vstv %s4749_s8  ;;  %s5397_s7 = sld [smem:[#allocation4 + $0x183]]  ;;  %s5415_s8 = sld [smem:[#allocation9 + $0x2]] }
  0x59   :  { %7271 = vst [vmem:[#allocation19_spill] sm:$0xff] %v4768_v27  ;;  %v3749_v40 = vpop.eup %3748  ;;  %3758 = vpow2.f32 %v3367_v49  ;;  %v364_v48 = vmul.f32 %v4768_v27, %v4513_v13  ;;  %v365_v54 = vmul.f32 %v4768_v27, %v4517_v15  ;;  %v366_v20 = vmul.f32 %v4768_v27, %v4519_v16  ;;  %7272 = vst [vmem:[#allocation20_spill] sm:$0xff] %v4780_v35 }
  0x5a   :  { %v251_v42 = vadd.f32 1.0, %v3749_v40  ;;  %3760 = vpow2.f32 %v3368_v50  ;;  %v367_v55 = vmul.f32 %v4768_v27, %v4521_v17  ;;  %v374_v49 = vmul.f32 %v4780_v35, %v4562_v31 }
  0x5b   :  { %3762 = vpow2.f32 %v3369_v56  ;;  %v368_v21 = vadd.f32 %v364_v48, %v358_v18  ;;  %v369_v29 = vadd.f32 %v365_v54, %v359_v59  ;;  %v370_v39 = vadd.f32 %v366_v20, %v360_v26 }
  0x5c   :  { %3764 = vrcp.f32 %v251_v42  ;;  %v371_v41 = vadd.f32 %v367_v55, %v361_v19  ;;  %v375_v50 = vmul.f32 %v4780_v35, %v4572_v36  ;;  %v376_v51 = vmul.f32 %v4780_v35, %v4574_v37 }
  0x5d   :  { %v377_v56 = vmul.f32 %v4780_v35, %v4576_v38  ;;  %v4791_v48 = vstv %s4755_s9  ;;  %v4794_v57 = vmul.f32 %v3747_v60, %v4656_v58  ;;  %v378_v3 = vadd.f32 %v374_v49, %v368_v21  ;;  %s5422_s9 = sld [smem:[#allocation7 + $0x3]] }
  0x5e   :  { %v4797_v18 = vstv %s4760_s0  ;;  %v4800_v59 = vstv %s4762_s10  ;;  %v379_v19 = vadd.f32 %v375_v50, %v369_v29  ;;  %v380_v40 = vadd.f32 %v376_v51, %v370_v39  ;;  %s5438_s0 = sld [smem:[#allocation9 + $0x3]]  ;;  %s5440_s10 = sld [smem:[#allocation4 + $0x200]] }
  0x5f   :  { %v3751_v26 = vpop.eup %3750  ;;  %v381_v54 = vadd.f32 %v377_v56, %v371_v41  ;;  %v4803_v42 = vstv %s4765_s11  ;;  %v384_v35 = vadd.f32 %v4791_v48, %v378_v3  ;;  %v424_v60 = vmul.f32 %v4800_v59, %v4489_v4  ;;  %s5446_s11 = sld [smem:[#allocation4 + $0x201]] }
  0x60   :  { %v3753_v20 = vpop.eup %3752  ;;  %v262_v55 = vmul.f32 %v3751_v26, %v4708_v28  ;;  %v425_v21 = vmul.f32 %v4800_v59, %v4491_v5  ;;  %v385_v39 = vadd.f32 %v4791_v48, %v379_v19  ;;  %v386_v41 = vadd.f32 %v4791_v48, %v380_v40 }
  0x61   :  { %v3755_v49 = vpop.eup %3754  ;;  %v263_v29 = vmul.f32 %v3753_v20, %v4708_v28  ;;  %v426_v50 = vmul.f32 %v4800_v59, %v4493_v6  ;;  %v387_v4 = vadd.f32 %v4791_v48, %v381_v54  ;;  %v3376_v5 = vmul.f32 -1.442695, %v384_v35 }
  0x62   :  { %v3757_v51 = vpop.eup %3756  ;;  %v264_v56 = vmul.f32 %v3755_v49, %v4708_v28  ;;  %v4819_v3 = vadd.f32 %v262_v55, %v190_v53  ;;  %v3377_v19 = vmul.f32 -1.442695, %v385_v39  ;;  %v427_v40 = vmul.f32 %v4800_v59, %v4495_v7 }
  0x63   :  { %v3759_v26 = vpop.eup %3758  ;;  %v4824_v27 = vadd.f32 %v263_v29, %v191_v47  ;;  %v324_v20 = vadd.f32 1.0, %v3757_v51  ;;  %3766 = vpow2.f32 %v3376_v5  ;;  %v3378_v53 = vmul.f32 -1.442695, %v386_v41  ;;  %v4859_v5 = vld [vmem:[#allocation3 + $0x30] sm:$0xff] }
  0x64   :  { %v3761_v58 = vpop.eup %3760  ;;  %v4828_v6 = vadd.f32 %v264_v56, %v192_v62  ;;  %v325_v34 = vadd.f32 1.0, %v3759_v26  ;;  %v430_v35 = vmul.f32 %v4803_v42, %v4501_v8  ;;  %v431_v47 = vmul.f32 %v4803_v42, %v4503_v9 }
  0x65   :  { %v3763_v55 = vpop.eup %3762  ;;  %v326_v49 = vadd.f32 1.0, %v3761_v58  ;;  %3768 = vrcp.f32 %v324_v20  ;;  %v432_v62 = vmul.f32 %v4803_v42, %v4509_v11  ;;  %v433_v29 = vmul.f32 %v4803_v42, %v4511_v12 }
  0x66   :  { %v3765_v54 = vpop.eup %3764  ;;  %v327_v7 = vadd.f32 1.0, %v3763_v55  ;;  %3770 = vrcp.f32 %v325_v34  ;;  %v3379_v8 = vmul.f32 -1.442695, %v387_v4  ;;  %v434_v58 = vadd.f32 %v430_v35, %v424_v60  ;;  %v4875_v55 = vld [vmem:[#allocation3 + $0x120] sm:$0xff] }
  0x67   :  { %3772 = vrcp.f32 %v326_v49  ;;  %v435_v39 = vadd.f32 %v431_v47, %v425_v21  ;;  %v436_v9 = vadd.f32 %v432_v62, %v426_v50  ;;  %v437_v41 = vadd.f32 %v433_v29, %v427_v40  ;;  %v4883_v29 = vld [vmem:[#allocation3 + $0x128] sm:$0xff] }
  0x68   :  { %3774 = vrcp.f32 %v327_v7  ;;  %v4843_v51 = vstv %s4811_s12  ;;  %v265_v34 = vmul.f32 %v3765_v54, %v4708_v28  ;;  %v4855_v21 = vstv %s4822_s1  ;;  %s5473_s12 = sld [smem:[#allocation4 + $0x202]]  ;;  %s5494_s1 = sld [smem:[#allocation4 + $0x203]] }
  0x69   :  { %3776 = vpow2.f32 %v3377_v19  ;;  %v440_v11 = vmul.f32 %v4843_v51, %v4513_v13  ;;  %v441_v12 = vmul.f32 %v4843_v51, %v4517_v15  ;;  %v442_v56 = vmul.f32 %v4843_v51, %v4519_v16 }
  0x6a   :  { %3778 = vpow2.f32 %v3378_v53  ;;  %v443_v60 = vmul.f32 %v4843_v51, %v4521_v17  ;;  %v450_v13 = vmul.f32 %v4855_v21, %v4562_v31  ;;  %v451_v16 = vmul.f32 %v4855_v21, %v4572_v36  ;;  %v4865_v17 = vld [vmem:[#allocation3 + $0x38] sm:$0xff] }
  0x6b   :  { %3780 = vpow2.f32 %v3379_v8  ;;  %v444_v50 = vadd.f32 %v440_v11, %v434_v58  ;;  %v445_v4 = vadd.f32 %v441_v12, %v435_v39  ;;  %v446_v15 = vadd.f32 %v442_v56, %v436_v9 }
  0x6c   :  { %v447_v26 = vadd.f32 %v443_v60, %v437_v41  ;;  %v452_v20 = vmul.f32 %v4855_v21, %v4574_v37  ;;  %v4868_v19 = vadd.f32 %v265_v34, %v4794_v57  ;;  %v453_v40 = vmul.f32 %v4855_v21, %v4576_v38  ;;  %v4894_v60 = vld [vmem:[#allocation3 + $0x130] sm:$0xff] }
  0x6d   :  { %v454_v53 = vadd.f32 %v450_v13, %v444_v50  ;;  %v4873_v31 = vstv %s4834_s3  ;;  %v3767_v49 = vpop.eup %3766  ;;  %v455_v35 = vadd.f32 %v451_v16, %v445_v4  ;;  %v4878_v36 = vstv %s4840_s13  ;;  %s5504_s3 = sld [smem:[#allocation7 + $0x4]] }
  0x6e   :  { %v456_v47 = vadd.f32 %v452_v20, %v446_v15  ;;  %v528_v37 = vmul.f32 %v4859_v5, %v4515_v14  ;;  %v400_v7 = vadd.f32 1.0, %v3767_v49  ;;  %v457_v57 = vadd.f32 %v453_v40, %v447_v26  ;;  %v4897_v15 = vld [vmem:[#allocation3 + $0x138] sm:$0xff]  ;;  %s5510_s13 = sld [smem:[#allocation9 + $0x4]] }
  0x6f   :  { %v3769_v54 = vpop.eup %3768  ;;  %v460_v62 = vadd.f32 %v4873_v31, %v454_v53  ;;  %v529_v38 = vmul.f32 %v4865_v17, %v4515_v14  ;;  %v461_v39 = vadd.f32 %v4873_v31, %v455_v35  ;;  %v532_v41 = vmul.f32 %v4875_v55, %v4531_v22 }
  0x70   :  { %v3771_v8 = vpop.eup %3770  ;;  %v338_v58 = vmul.f32 %v3769_v54, %v4728_v52  ;;  %v462_v9 = vadd.f32 %v4873_v31, %v456_v47  ;;  %3782 = vrcp.f32 %v400_v7  ;;  %v463_v12 = vadd.f32 %v4873_v31, %v457_v57  ;;  %v4906_v54 = vld [vmem:[#allocation3 + $0x220] sm:$0xff] }
  0x71   :  { %v3773_v34 = vpop.eup %3772  ;;  %v339_v11 = vmul.f32 %v3771_v8, %v4728_v52  ;;  %v3386_v56 = vmul.f32 -1.442695, %v460_v62  ;;  %v3387_v4 = vmul.f32 -1.442695, %v461_v39  ;;  %v533_v26 = vmul.f32 %v4883_v29, %v4531_v22 }
  0x72   :  { %v3775_v14 = vpop.eup %3774  ;;  %v340_v50 = vmul.f32 %v3773_v34, %v4728_v52  ;;  %v3388_v13 = vmul.f32 -1.442695, %v462_v9  ;;  %v342_v40 = vadd.f32 %v338_v58, %v4819_v3  ;;  %v3389_v47 = vmul.f32 -1.442695, %v463_v12  ;;  %v4913_v3 = vld [vmem:[#allocation3 + $0x228] sm:$0xff]  ;;  %v4917_v58 = vld [vmem:[#allocation3 + $0x238] sm:$0xff] }
  0x73   :  { %v3777_v16 = vpop.eup %3776  ;;  %v341_v20 = vmul.f32 %v3775_v14, %v4728_v52  ;;  %v4904_v53 = vadd.f32 %v339_v11, %v4824_v27  ;;  %3784 = vpow2.f32 %v3386_v56  ;;  %v534_v7 = vmul.f32 %v4894_v60, %v4531_v22  ;;  %v4915_v27 = vld [vmem:[#allocation3 + $0x230] sm:$0xff]  ;;  %v4921_v34 = vld [vmem:[#allocation3 + $0x320] sm:$0xff]  ;;  %v4923_v11 = vld [vmem:[#allocation3 + $0x328] sm:$0xff] }
  0x74   :  { %v3779_v49 = vpop.eup %3778  ;;  %v401_v35 = vadd.f32 1.0, %v3777_v16  ;;  %3786 = vpow2.f32 %v3387_v4  ;;  %v4911_v62 = vadd.f32 %v340_v50, %v4828_v6  ;;  %v535_v39 = vmul.f32 %v4897_v15, %v4531_v22  ;;  %v4927_v56 = vld [vmem:[#allocation3 + $0x330] sm:$0xff]  ;;  %v4931_v22 = vld [vmem:[#allocation3 + $0x338] sm:$0xff] }
  0x75   :  { %v3781_v57 = vpop.eup %3780  ;;  %v402_v8 = vadd.f32 1.0, %v3779_v49  ;;  %3788 = vpow2.f32 %v3388_v13  ;;  %v536_v6 = vadd.f32 %v532_v41, %v4546_v25  ;;  %v537_v12 = vadd.f32 %v533_v26, %v4589_v46 }
  0x76   :  { %v403_v9 = vadd.f32 1.0, %v3781_v57  ;;  %3790 = vrcp.f32 %v401_v35  ;;  %v538_v14 = vadd.f32 %v534_v7, %v528_v37  ;;  %v539_v50 = vadd.f32 %v535_v39, %v529_v38 }
  0x77   :  { %3792 = vrcp.f32 %v402_v8  ;;  %v542_v4 = vmul.f32 %v4906_v54, %v4533_v23  ;;  %v543_v13 = vmul.f32 %v4913_v3, %v4533_v23  ;;  %v544_v16 = vmul.f32 %v4915_v27, %v4533_v23 }
  0x78   :  { %3794 = vrcp.f32 %v403_v9  ;;  %v545_v25 = vmul.f32 %v4917_v58, %v4533_v23  ;;  %v552_v37 = vmul.f32 %v4921_v34, %v4579_v43  ;;  %v553_v38 = vmul.f32 %v4923_v11, %v4579_v43 }
  0x79   :  { %3796 = vpow2.f32 %v3389_v47  ;;  %v546_v46 = vadd.f32 %v542_v4, %v536_v6  ;;  %v547_v41 = vadd.f32 %v543_v13, %v537_v12  ;;  %v548_v26 = vadd.f32 %v544_v16, %v538_v14 }
  0x7a   :  { %v549_v49 = vadd.f32 %v545_v25, %v539_v50  ;;  %v554_v35 = vmul.f32 %v4927_v56, %v4579_v43  ;;  %v3783_v7 = vpop.eup %3782  ;;  %v4946_v57 = vadd.f32 %v341_v20, %v4868_v19  ;;  %v555_v23 = vmul.f32 %v4931_v22, %v4579_v43 }
  0x7b   :  { %v556_v47 = vadd.f32 %v552_v37, %v546_v46  ;;  %v598_v8 = vmul.f32 %v4507_v10, %v4585_v45  ;;  %v414_v39 = vmul.f32 %v3783_v7, %v4797_v18  ;;  %v557_v9 = vadd.f32 %v553_v38, %v547_v41 }
  0x7c   :  { %v558_v6 = vadd.f32 %v554_v35, %v548_v26  ;;  %v599_v12 = vmul.f32 %v4560_v30, %v4585_v45  ;;  %v559_v50 = vadd.f32 %v555_v23, %v549_v49  ;;  %v600_v19 = vmul.f32 %v4859_v5, %v4585_v45 }
  0x7d   :  { %v3785_v14 = vpop.eup %3784  ;;  %v562_v4 = vadd.f32 %v556_v47, %v4582_v44  ;;  %v601_v43 = vmul.f32 %v4865_v17, %v4585_v45  ;;  %v563_v16 = vadd.f32 %v557_v9, %v4582_v44  ;;  %v604_v46 = vmul.f32 %v4875_v55, %v4608_v63 }
  0x7e   :  { %v3787_v20 = vpop.eup %3786  ;;  %v476_v13 = vadd.f32 1.0, %v3785_v14  ;;  %v564_v25 = vadd.f32 %v558_v6, %v4582_v44  ;;  %v4964_v38 = vadd.f32 %v414_v39, %v342_v40  ;;  %v565_v26 = vadd.f32 %v559_v50, %v4582_v44 }
  0x7f   :  { %v3789_v37 = vpop.eup %3788  ;;  %v477_v41 = vadd.f32 1.0, %v3787_v20  ;;  %v3394_v49 = vmul.f32 -1.442695, %v562_v4  ;;  %v3395_v45 = vmul.f32 -1.442695, %v563_v16  ;;  %v605_v23 = vmul.f32 %v4883_v29, %v4608_v63 }
  0x80   :  { %v3791_v35 = vpop.eup %3790  ;;  %v478_v7 = vadd.f32 1.0, %v3789_v37  ;;  %3798 = vrcp.f32 %v476_v13  ;;  %v3396_v6 = vmul.f32 -1.442695, %v564_v25  ;;  %v606_v40 = vmul.f32 %v4894_v60, %v4608_v63 }
  0x81   :  { %v3793_v47 = vpop.eup %3792  ;;  %v415_v9 = vmul.f32 %v3791_v35, %v4797_v18  ;;  %3800 = vrcp.f32 %v477_v41  ;;  %v3397_v44 = vmul.f32 -1.442695, %v565_v26  ;;  %v607_v50 = vmul.f32 %v4897_v15, %v4608_v63 }
  0x82   :  { %v3795_v39 = vpop.eup %3794  ;;  %v416_v14 = vmul.f32 %v3793_v47, %v4797_v18  ;;  %3802 = vrcp.f32 %v478_v7  ;;  %v608_v16 = vadd.f32 %v604_v46, %v598_v8  ;;  %v609_v25 = vadd.f32 %v605_v23, %v599_v12 }
  0x83   :  { %v3797_v4 = vpop.eup %3796  ;;  %v417_v20 = vmul.f32 %v3795_v39, %v4797_v18  ;;  %v419_v13 = vadd.f32 %v415_v9, %v4904_v53  ;;  %3804 = vpow2.f32 %v3394_v49  ;;  %v610_v41 = vadd.f32 %v606_v40, %v600_v19 }
  0x84   :  { %v479_v37 = vadd.f32 1.0, %v3797_v4  ;;  %3806 = vpow2.f32 %v3395_v45  ;;  %v420_v35 = vadd.f32 %v416_v14, %v4911_v62  ;;  %v611_v47 = vadd.f32 %v607_v50, %v601_v43 }
  0x85   :  { %3808 = vpow2.f32 %v3396_v6  ;;  %v614_v26 = vmul.f32 %v4906_v54, %v4611_v0  ;;  %v615_v63 = vmul.f32 %v4913_v3, %v4611_v0  ;;  %v616_v53 = vmul.f32 %v4915_v27, %v4611_v0 }
  0x86   :  { %3810 = vrcp.f32 %v479_v37  ;;  %v617_v8 = vmul.f32 %v4917_v58, %v4611_v0  ;;  %v624_v62 = vmul.f32 %v4921_v34, %v4614_v1  ;;  %v625_v19 = vmul.f32 %v4923_v11, %v4614_v1 }
  0x87   :  { %3812 = vpow2.f32 %v3397_v44  ;;  %v618_v12 = vadd.f32 %v614_v26, %v608_v16  ;;  %v619_v43 = vadd.f32 %v615_v63, %v609_v25  ;;  %v620_v46 = vadd.f32 %v616_v53, %v610_v41 }
  0x88   :  { %v621_v49 = vadd.f32 %v617_v8, %v611_v47  ;;  %v626_v7 = vmul.f32 %v4927_v56, %v4614_v1  ;;  %v421_v45 = vadd.f32 %v417_v20, %v4946_v57  ;;  %v627_v23 = vmul.f32 %v4931_v22, %v4614_v1 }
  0x89   :  { %v628_v0 = vadd.f32 %v624_v62, %v618_v12  ;;  %v674_v9 = vmul.f32 %v4507_v10, %v4659_v61  ;;  %v629_v40 = vadd.f32 %v625_v19, %v619_v43  ;;  %v675_v14 = vmul.f32 %v4560_v30, %v4659_v61 }
  0x8a   :  { %v3799_v6 = vpop.eup %3798  ;;  %v630_v39 = vadd.f32 %v626_v7, %v620_v46  ;;  %v676_v44 = vmul.f32 %v4859_v5, %v4659_v61  ;;  %v631_v57 = vadd.f32 %v627_v23, %v621_v49  ;;  %v677_v1 = vmul.f32 %v4865_v17, %v4659_v61 }
  0x8b   :  { %v3801_v50 = vpop.eup %3800  ;;  %v490_v4 = vmul.f32 %v3799_v6, %v4878_v36  ;;  %v634_v20 = vadd.f32 %v628_v0, %v4617_v2  ;;  %v635_v37 = vadd.f32 %v629_v40, %v4617_v2  ;;  %v680_v41 = vmul.f32 %v4875_v55, %v4676_v32 }
  0x8c   :  { %v3803_v16 = vpop.eup %3802  ;;  %v491_v10 = vmul.f32 %v3801_v50, %v4878_v36  ;;  %v636_v25 = vadd.f32 %v630_v39, %v4617_v2  ;;  %v681_v8 = vmul.f32 %v4883_v29, %v4676_v32  ;;  %v637_v19 = vadd.f32 %v631_v57, %v4617_v2 }
  0x8d   :  { %v3805_v47 = vpop.eup %3804  ;;  %v492_v26 = vmul.f32 %v3803_v16, %v4878_v36  ;;  %v494_v63 = vadd.f32 %v490_v4, %v4964_v38  ;;  %v3403_v53 = vmul.f32 -1.442695, %v634_v20  ;;  %v3404_v43 = vmul.f32 -1.442695, %v635_v37 }
  0x8e   :  { %v3807_v61 = vpop.eup %3806  ;;  %v495_v12 = vadd.f32 %v491_v10, %v419_v13  ;;  %v578_v62 = vadd.f32 1.0, %v3805_v47  ;;  %v3405_v40 = vmul.f32 -1.442695, %v636_v25  ;;  %v682_v2 = vmul.f32 %v4894_v60, %v4676_v32 }
  0x8f   :  { %v3809_v46 = vpop.eup %3808  ;;  %v496_v49 = vadd.f32 %v492_v26, %v420_v35  ;;  %v500_v7 = vadd.f32 %v4542_v24, %v494_v63  ;;  %v579_v23 = vadd.f32 1.0, %v3807_v61  ;;  %3814 = vpow2.f32 %v3403_v53 }
  0x90   :  { %v3811_v0 = vpop.eup %3810  ;;  %v501_v6 = vadd.f32 %v4542_v24, %v495_v12  ;;  %v580_v38 = vadd.f32 1.0, %v3809_v46  ;;  %3816 = vrcp.f32 %v578_v62  ;;  %v3406_v4 = vmul.f32 -1.442695, %v637_v19  ;;  %v4366_v46 = vld [vmem:[#allocation3 + $0x20] sm:$0xff] }
  0x91   :  { %v3813_v39 = vpop.eup %3812  ;;  %v493_v50 = vmul.f32 %v3811_v0, %v4878_v36  ;;  %v502_v13 = vadd.f32 %v4542_v24, %v496_v49  ;;  %504 = vst [vmem:[#allocation10] sm:$0xff] %v500_v7  ;;  %3818 = vrcp.f32 %v579_v23  ;;  %v683_v57 = vmul.f32 %v4897_v15, %v4676_v32  ;;  %v7274_v49 = vld [vmem:[#allocation17_spill] sm:$0xff] }
  0x92   :  { %505 = vst [vmem:[#allocation10 + $0x8] sm:$0xff] %v501_v6  ;;  %v581_v35 = vadd.f32 1.0, %v3813_v39  ;;  %v684_v20 = vadd.f32 %v680_v41, %v674_v9  ;;  %3820 = vpow2.f32 %v3404_v43  ;;  %v685_v10 = vadd.f32 %v681_v8, %v675_v14 }
  0x93   :  { %v497_v16 = vadd.f32 %v493_v50, %v421_v45  ;;  %506 = vst [vmem:[#allocation10 + $0x10] sm:$0xff] %v502_v13  ;;  %v686_v37 = vadd.f32 %v682_v2, %v676_v44  ;;  %3822 = vrcp.f32 %v580_v38  ;;  %v687_v25 = vadd.f32 %v683_v57, %v677_v1  ;;  %v7273_v44 = vld [vmem:[#allocation15_spill] sm:$0xff] }
  0x94   :  { %v690_v47 = vmul.f32 %v4906_v54, %v4679_v33  ;;  %v691_v26 = vmul.f32 %v4913_v3, %v4679_v33  ;;  %3824 = vpow2.f32 %v3405_v40  ;;  %v692_v32 = vmul.f32 %v4915_v27, %v4679_v33  ;;  %v7275_v40 = vld [vmem:[#allocation16_spill] sm:$0xff] }
  0x95   :  { %v503_v63 = vadd.f32 %v4542_v24, %v497_v16  ;;  %v693_v45 = vmul.f32 %v4917_v58, %v4679_v33  ;;  %3826 = vpow2.f32 %v3406_v4  ;;  %v700_v1 = vmul.f32 %v4921_v34, %v7273_v44  ;;  %v7276_v4 = vld [vmem:[#allocation18_spill] sm:$0xff] }
  0x96   :  { %v694_v9 = vadd.f32 %v690_v47, %v684_v20  ;;  %v695_v14 = vadd.f32 %v691_v26, %v685_v10  ;;  %v696_v41 = vadd.f32 %v692_v32, %v686_v37  ;;  %v701_v8 = vmul.f32 %v4923_v11, %v7273_v44 }
  0x97   :  { %507 = vst [vmem:[#allocation10 + $0x18] sm:$0xff] %v503_v63  ;;  %v697_v53 = vadd.f32 %v693_v45, %v687_v25  ;;  %v702_v61 = vmul.f32 %v4927_v56, %v7273_v44  ;;  %3828 = vrcp.f32 %v581_v35  ;;  %v703_v12 = vmul.f32 %v4931_v22, %v7273_v44  ;;  %v7277_v25 = vld [vmem:[#allocation14_spill] sm:$0xff] }
  0x98   :  { %v704_v33 = vadd.f32 %v700_v1, %v694_v9  ;;  %v705_v19 = vadd.f32 %v701_v8, %v695_v14  ;;  %v750_v7 = vmul.f32 %v4366_v46, %v7274_v49  ;;  %v751_v23 = vmul.f32 %v4560_v30, %v7274_v49 }
  0x99   :  { %v3815_v62 = vpop.eup %3814  ;;  %v706_v43 = vadd.f32 %v702_v61, %v696_v41  ;;  %v707_v38 = vadd.f32 %v703_v12, %v697_v53  ;;  %v752_v50 = vmul.f32 %v4859_v5, %v7274_v49  ;;  %v756_v57 = vmul.f32 %v4875_v55, %v7276_v4 }
  0x9a   :  { %v3817_v0 = vpop.eup %3816  ;;  %v650_v6 = vadd.f32 1.0, %v3815_v62  ;;  %v710_v39 = vadd.f32 %v704_v33, %v7275_v40  ;;  %v711_v2 = vadd.f32 %v705_v19, %v7275_v40  ;;  %v757_v20 = vmul.f32 %v4883_v29, %v7276_v4 }
  0x9b   :  { %v3819_v13 = vpop.eup %3818  ;;  %v712_v35 = vadd.f32 %v706_v43, %v7275_v40  ;;  %v713_v30 = vadd.f32 %v707_v38, %v7275_v40  ;;  %v753_v10 = vmul.f32 %v4865_v17, %v7274_v49  ;;  %v592_v47 = vmul.f32 %v3817_v0, %v7277_v25  ;;  %v7278_v43 = vld [vmem:[#allocation19_spill] sm:$0xff] }
  0x9c   :  { %3830 = vrcp.f32 %v650_v6  ;;  %v3413_v16 = vmul.f32 -1.442695, %v710_v39  ;;  %v3821_v37 = vpop.eup %3820  ;;  %v3414_v26 = vmul.f32 -1.442695, %v711_v2  ;;  %v758_v32 = vmul.f32 %v4894_v60, %v7276_v4 }
  0x9d   :  { %v3415_v63 = vmul.f32 -1.442695, %v712_v35  ;;  %v3823_v45 = vpop.eup %3822  ;;  %v5059_v9 = vmul.f32 %v3819_v13, %v7277_v25  ;;  %v651_v14 = vadd.f32 1.0, %v3821_v37  ;;  %v759_v44 = vmul.f32 %v4897_v15, %v7276_v4 }
  0x9e   :  { %3832 = vpow2.f32 %v3413_v16  ;;  %v3825_v1 = vpop.eup %3824  ;;  %v3416_v41 = vmul.f32 -1.442695, %v713_v30  ;;  %v760_v53 = vadd.f32 %v756_v57, %v750_v7  ;;  %v761_v8 = vadd.f32 %v757_v20, %v751_v23  ;;  %v7279_v23 = vld [vmem:[#allocation20_spill] sm:$0xff] }
  0x9f   :  { %3834 = vpow2.f32 %v3414_v26  ;;  %v3827_v61 = vpop.eup %3826  ;;  %v652_v12 = vadd.f32 1.0, %v3825_v1  ;;  %v762_v33 = vadd.f32 %v758_v32, %v752_v50  ;;  %v763_v62 = vadd.f32 %v759_v44, %v753_v10  ;;  %v4367_v32 = vld [vmem:[#allocation3 + $0x28] sm:$0xff] }
  0xa0   :  { %3836 = vrcp.f32 %v651_v14  ;;  %v653_v19 = vadd.f32 1.0, %v3827_v61  ;;  %v766_v49 = vmul.f32 %v4906_v54, %v7278_v43  ;;  %v767_v0 = vmul.f32 %v4913_v3, %v7278_v43 }
  0xa1   :  { %3838 = vpow2.f32 %v3415_v63  ;;  %v3829_v6 = vpop.eup %3828  ;;  %v768_v38 = vmul.f32 %v4915_v27, %v7278_v43  ;;  %v769_v7 = vmul.f32 %v4917_v58, %v7278_v43  ;;  %v776_v40 = vmul.f32 %v4921_v34, %v7279_v23 }
  0xa2   :  { %3840 = vrcp.f32 %v652_v12  ;;  %v770_v39 = vadd.f32 %v766_v49, %v760_v53  ;;  %v771_v50 = vadd.f32 %v767_v0, %v761_v8  ;;  %v777_v13 = vmul.f32 %v4923_v11, %v7279_v23 }
  0xa3   :  { %3842 = vrcp.f32 %v653_v19  ;;  %v772_v2 = vadd.f32 %v768_v38, %v762_v33  ;;  %v773_v35 = vadd.f32 %v769_v7, %v763_v62  ;;  %v778_v4 = vmul.f32 %v4927_v56, %v7279_v23 }
  0xa4   :  { %3844 = vpow2.f32 %v3416_v41  ;;  %v5078_v57 = vmul.f32 %v3823_v45, %v7277_v25  ;;  %v779_v20 = vmul.f32 %v4931_v22, %v7279_v23  ;;  %v780_v30 = vadd.f32 %v776_v40, %v770_v39 }
  0xa5   :  { %v781_v16 = vadd.f32 %v777_v13, %v771_v50  ;;  %v5083_v37 = vmul.f32 %v3829_v6, %v7277_v25  ;;  %v782_v26 = vadd.f32 %v778_v4, %v772_v2  ;;  %v826_v63 = vmul.f32 %v4366_v46, %v4800_v59 }
  0xa6   :  { %v3831_v10 = vpop.eup %3830  ;;  %v827_v14 = vmul.f32 %v4367_v32, %v4800_v59  ;;  %v783_v1 = vadd.f32 %v779_v20, %v773_v35  ;;  %v786_v45 = vadd.f32 %v780_v30, %v4791_v48  ;;  %v828_v25 = vmul.f32 %v4859_v5, %v4800_v59 }
  0xa7   :  { %v664_v44 = vmul.f32 %v3831_v10, %v4708_v28  ;;  %v787_v41 = vadd.f32 %v781_v16, %v4791_v48  ;;  %v788_v8 = vadd.f32 %v782_v26, %v4791_v48  ;;  %v832_v61 = vmul.f32 %v4875_v55, %v4803_v42 }
  0xa8   :  { %v3833_v53 = vpop.eup %3832  ;;  %v833_v46 = vmul.f32 %v4883_v29, %v4803_v42  ;;  %v789_v62 = vadd.f32 %v783_v1, %v4791_v48  ;;  %v3423_v19 = vmul.f32 -1.442695, %v786_v45  ;;  %v834_v43 = vmul.f32 %v4894_v60, %v4803_v42  ;;  %v5147_v45 = vld [vmem:[#allocation3 + $0x58] sm:$0xff] }
  0xa9   :  { %v3835_v12 = vpop.eup %3834  ;;  %v726_v33 = vadd.f32 1.0, %v3833_v53  ;;  %v5100_v0 = vadd.f32 %v664_v44, %v592_v47  ;;  %v829_v5 = vmul.f32 %v4865_v17, %v4800_v59  ;;  %v835_v55 = vmul.f32 %v4897_v15, %v4803_v42 }
  0xaa   :  { %v3837_v49 = vpop.eup %3836  ;;  %v727_v6 = vadd.f32 1.0, %v3835_v12  ;;  %v3424_v7 = vmul.f32 -1.442695, %v787_v41  ;;  %v3425_v48 = vmul.f32 -1.442695, %v788_v8  ;;  %v836_v40 = vadd.f32 %v832_v61, %v826_v63  ;;  %v5130_v63 = vld [vmem:[#allocation3 + $0x40] sm:$0xff] }
  0xab   :  { %v3839_v38 = vpop.eup %3838  ;;  %v665_v29 = vmul.f32 %v3837_v49, %v4708_v28  ;;  %3846 = vrcp.f32 %v726_v33  ;;  %v3426_v47 = vmul.f32 -1.442695, %v789_v62  ;;  %v837_v42 = vadd.f32 %v833_v46, %v827_v14  ;;  %v5139_v14 = vld [vmem:[#allocation3 + $0x50] sm:$0xff] }
  0xac   :  { %v3841_v23 = vpop.eup %3840  ;;  %v728_v60 = vadd.f32 1.0, %v3839_v38  ;;  %3848 = vrcp.f32 %v727_v6  ;;  %v838_v17 = vadd.f32 %v834_v43, %v828_v25  ;;  %v839_v50 = vadd.f32 %v835_v55, %v829_v5  ;;  %v5153_v25 = vld [vmem:[#allocation3 + $0x140] sm:$0xff]  ;;  %v5170_v5 = vld [vmem:[#allocation3 + $0x150] sm:$0xff]  ;;  %v5172_v55 = vld [vmem:[#allocation3 + $0x158] sm:$0xff] }
  0xad   :  { %v3843_v39 = vpop.eup %3842  ;;  %v666_v59 = vmul.f32 %v3841_v23, %v4708_v28  ;;  %3850 = vpow2.f32 %v3423_v19  ;;  %v842_v13 = vmul.f32 %v4906_v54, %v4843_v51  ;;  %v843_v2 = vmul.f32 %v4913_v3, %v4843_v51 }
  0xae   :  { %v3845_v15 = vpop.eup %3844  ;;  %3852 = vrcp.f32 %v728_v60  ;;  %v5117_v35 = vadd.f32 %v665_v29, %v5059_v9  ;;  %v844_v20 = vmul.f32 %v4915_v27, %v4843_v51  ;;  %v667_v30 = vmul.f32 %v3843_v39, %v4708_v28 }
  0xaf   :  { %v729_v4 = vadd.f32 1.0, %v3845_v15  ;;  %3854 = vpow2.f32 %v3424_v7  ;;  %v845_v16 = vmul.f32 %v4917_v58, %v4843_v51  ;;  %v846_v10 = vadd.f32 %v842_v13, %v836_v40  ;;  %v5132_v51 = vld [vmem:[#allocation3 + $0x48] sm:$0xff] }
  0xb0   :  { %3856 = vpow2.f32 %v3425_v48  ;;  %v847_v54 = vadd.f32 %v843_v2, %v837_v42  ;;  %v848_v26 = vadd.f32 %v844_v20, %v838_v17  ;;  %v852_v3 = vmul.f32 %v4921_v34, %v4855_v21  ;;  %v5186_v17 = vld [vmem:[#allocation3 + $0x240] sm:$0xff]  ;;  %v5197_v20 = vld [vmem:[#allocation3 + $0x248] sm:$0xff] }
  0xb1   :  { %3858 = vrcp.f32 %v729_v4  ;;  %v849_v9 = vadd.f32 %v845_v16, %v839_v50  ;;  %v853_v27 = vmul.f32 %v4923_v11, %v4855_v21  ;;  %v854_v28 = vmul.f32 %v4927_v56, %v4855_v21  ;;  %v5201_v16 = vld [vmem:[#allocation3 + $0x250] sm:$0xff] }
  0xb2   :  { %3860 = vpow2.f32 %v3426_v47  ;;  %v5135_v58 = vadd.f32 %v666_v59, %v5078_v57  ;;  %v855_v32 = vmul.f32 %v4931_v22, %v4855_v21  ;;  %v856_v34 = vadd.f32 %v852_v3, %v846_v10  ;;  %v5155_v21 = vld [vmem:[#allocation3 + $0x148] sm:$0xff]  ;;  %v5203_v10 = vld [vmem:[#allocation3 + $0x258] sm:$0xff] }
  0xb3   :  { %v5142_v44 = vstv %s5107_s14  ;;  %v5145_v11 = vadd.f32 %v667_v30, %v5083_v37  ;;  %v857_v1 = vadd.f32 %v853_v27, %v847_v54  ;;  %v858_v56 = vadd.f32 %v854_v28, %v848_v26  ;;  %s5784_s14 = sld [smem:[#allocation4]] }
  0xb4   :  { %v5150_v41 = vstv %s5109_s15  ;;  %v859_v57 = vadd.f32 %v855_v32, %v849_v9  ;;  %v862_v8 = vadd.f32 %v856_v34, %v4873_v31  ;;  %v928_v22 = vmul.f32 %v5142_v44, %v5130_v63  ;;  %v5207_v9 = vld [vmem:[#allocation3 + $0x340] sm:$0xff]  ;;  %v5213_v34 = vld [vmem:[#allocation3 + $0x348] sm:$0xff]  ;;  %s5791_s15 = sld [smem:[#allocation4 + $0x1]] }
  0xb5   :  { %v3847_v53 = vpop.eup %3846  ;;  %v929_v37 = vmul.f32 %v5142_v44, %v5132_v51  ;;  %v863_v12 = vadd.f32 %v857_v1, %v4873_v31  ;;  %v864_v33 = vadd.f32 %v858_v56, %v4873_v31  ;;  %v930_v62 = vmul.f32 %v5142_v44, %v5139_v14  ;;  %v5215_v1 = vld [vmem:[#allocation3 + $0x350] sm:$0xff] }
  0xb6   :  { %v3849_v61 = vpop.eup %3848  ;;  %v740_v46 = vmul.f32 %v3847_v53, %v4728_v52  ;;  %v865_v49 = vadd.f32 %v859_v57, %v4873_v31  ;;  %v3433_v6 = vmul.f32 -1.442695, %v862_v8  ;;  %v931_v38 = vmul.f32 %v5142_v44, %v5147_v45  ;;  %v5221_v57 = vld [vmem:[#allocation3 + $0x358] sm:$0xff] }
  0xb7   :  { %v3851_v19 = vpop.eup %3850  ;;  %v741_v43 = vmul.f32 %v3849_v61, %v4728_v52  ;;  %v3434_v48 = vmul.f32 -1.442695, %v863_v12  ;;  %v934_v23 = vmul.f32 %v5150_v41, %v5153_v25  ;;  %v935_v60 = vmul.f32 %v5150_v41, %v5155_v21 }
  0xb8   :  { %v3853_v29 = vpop.eup %3852  ;;  %v802_v7 = vadd.f32 1.0, %v3851_v19  ;;  %v5184_v40 = vadd.f32 %v740_v46, %v5100_v0  ;;  %3862 = vpow2.f32 %v3433_v6  ;;  %v3435_v39 = vmul.f32 -1.442695, %v864_v33 }
  0xb9   :  { %v3855_v31 = vpop.eup %3854  ;;  %v742_v47 = vmul.f32 %v3853_v29, %v4728_v52  ;;  %v936_v15 = vmul.f32 %v5150_v41, %v5170_v5  ;;  %v937_v50 = vmul.f32 %v5150_v41, %v5172_v55  ;;  %v5195_v2 = vadd.f32 %v741_v43, %v5117_v35 }
  0xba   :  { %v3857_v59 = vpop.eup %3856  ;;  %v803_v42 = vadd.f32 1.0, %v3855_v31  ;;  %3864 = vrcp.f32 %v802_v7  ;;  %v3436_v4 = vmul.f32 -1.442695, %v865_v49  ;;  %v938_v54 = vadd.f32 %v934_v23, %v928_v22 }
  0xbb   :  { %v3859_v13 = vpop.eup %3858  ;;  %v804_v0 = vadd.f32 1.0, %v3857_v59  ;;  %3866 = vpow2.f32 %v3434_v48  ;;  %v939_v26 = vadd.f32 %v935_v60, %v929_v37  ;;  %v940_v3 = vadd.f32 %v936_v15, %v930_v62 }
  0xbc   :  { %v3861_v30 = vpop.eup %3860  ;;  %3868 = vrcp.f32 %v803_v42  ;;  %v941_v27 = vadd.f32 %v937_v50, %v931_v38  ;;  %v5210_v28 = vstv %s5161_s16  ;;  %v743_v32 = vmul.f32 %v3859_v13, %v4728_v52  ;;  %s5830_s16 = sld [smem:[#allocation4 + $0x2]] }
  0xbd   :  { %v805_v35 = vadd.f32 1.0, %v3861_v30  ;;  %3870 = vrcp.f32 %v804_v0  ;;  %v944_v56 = vmul.f32 %v5210_v28, %v5186_v17  ;;  %v945_v53 = vmul.f32 %v5210_v28, %v5197_v20 }
  0xbe   :  { %3872 = vpow2.f32 %v3435_v39  ;;  %v946_v8 = vmul.f32 %v5210_v28, %v5201_v16  ;;  %v947_v52 = vmul.f32 %v5210_v28, %v5203_v10  ;;  %v5228_v22 = vstv %s5176_s17  ;;  %s5856_s17 = sld [smem:[#allocation4 + $0x3]] }
  0xbf   :  { %3874 = vrcp.f32 %v805_v35  ;;  %v948_v37 = vadd.f32 %v944_v56, %v938_v54  ;;  %v949_v61 = vadd.f32 %v945_v53, %v939_v26  ;;  %v954_v46 = vmul.f32 %v5228_v22, %v5207_v9 }
  0xc0   :  { %3876 = vpow2.f32 %v3436_v4  ;;  %v950_v12 = vadd.f32 %v946_v8, %v940_v3  ;;  %v951_v33 = vadd.f32 %v947_v52, %v941_v27  ;;  %v955_v62 = vmul.f32 %v5228_v22, %v5213_v34 }
  0xc1   :  { %v956_v19 = vmul.f32 %v5228_v22, %v5215_v1  ;;  %v746_v43 = vadd.f32 %v742_v47, %v5135_v58  ;;  %v957_v49 = vmul.f32 %v5228_v22, %v5221_v57  ;;  %v958_v6 = vadd.f32 %v954_v46, %v948_v37 }
  0xc2   :  { %v5240_v38 = vstv %s5192_s18  ;;  %v3863_v29 = vpop.eup %3862  ;;  %v5243_v7 = vadd.f32 %v743_v32, %v5145_v11  ;;  %v959_v48 = vadd.f32 %v955_v62, %v949_v61  ;;  %v5246_v60 = vstv %s5199_s19  ;;  %s5864_s18 = sld [smem:[#allocation4 + $0x80]] }
  0xc3   :  { %v960_v23 = vadd.f32 %v956_v19, %v950_v12  ;;  %v878_v39 = vadd.f32 1.0, %v3863_v29  ;;  %v961_v59 = vadd.f32 %v957_v49, %v951_v33  ;;  %v964_v42 = vadd.f32 %v5240_v38, %v958_v6  ;;  %s5870_s19 = sld [smem:[#allocation7]] }
  0xc4   :  { %v3865_v31 = vpop.eup %3864  ;;  %v5250_v58 = vstv %s5205_s20  ;;  %v965_v50 = vadd.f32 %v5240_v38, %v959_v48  ;;  %v1000_v11 = vmul.f32 %v5246_v60, %v5130_v63  ;;  %v1001_v32 = vmul.f32 %v5246_v60, %v5132_v51  ;;  %s5880_s20 = sld [smem:[#allocation9]] }
  0xc5   :  { %v3867_v47 = vpop.eup %3866  ;;  %v816_v15 = vmul.f32 %v3865_v31, %v4797_v18  ;;  %v966_v13 = vadd.f32 %v5240_v38, %v960_v23  ;;  %3878 = vrcp.f32 %v878_v39  ;;  %v967_v30 = vadd.f32 %v5240_v38, %v961_v59 }
  0xc6   :  { %v3869_v0 = vpop.eup %3868  ;;  %v879_v4 = vadd.f32 1.0, %v3867_v47  ;;  %v3441_v54 = vmul.f32 -1.442695, %v964_v42  ;;  %v3442_v27 = vmul.f32 -1.442695, %v965_v50  ;;  %v1003_v62 = vmul.f32 %v5246_v60, %v5147_v45 }
  0xc7   :  { %v3871_v26 = vpop.eup %3870  ;;  %v817_v3 = vmul.f32 %v3869_v0, %v4797_v18  ;;  %v820_v35 = vadd.f32 %v816_v15, %v5184_v40  ;;  %v3443_v8 = vmul.f32 -1.442695, %v966_v13  ;;  %v3444_v52 = vmul.f32 -1.442695, %v967_v30 }
  0xc8   :  { %v3873_v56 = vpop.eup %3872  ;;  %v818_v53 = vmul.f32 %v3871_v26, %v4797_v18  ;;  %3880 = vrcp.f32 %v879_v4  ;;  %v1002_v40 = vmul.f32 %v5246_v60, %v5139_v14  ;;  %v1006_v19 = vmul.f32 %v5250_v58, %v5153_v25 }
  0xc9   :  { %v3875_v37 = vpop.eup %3874  ;;  %v821_v61 = vadd.f32 %v817_v3, %v5195_v2  ;;  %v880_v46 = vadd.f32 1.0, %v3873_v56  ;;  %3882 = vpow2.f32 %v3441_v54  ;;  %v1007_v2 = vmul.f32 %v5250_v58, %v5155_v21 }
  0xca   :  { %v3877_v12 = vpop.eup %3876  ;;  %v819_v33 = vmul.f32 %v3875_v37, %v4797_v18  ;;  %3884 = vpow2.f32 %v3442_v27  ;;  %v1008_v6 = vmul.f32 %v5250_v58, %v5170_v5  ;;  %v822_v18 = vadd.f32 %v818_v53, %v746_v43 }
  0xcb   :  { %v881_v49 = vadd.f32 1.0, %v3877_v12  ;;  %3886 = vrcp.f32 %v880_v46  ;;  %v1009_v29 = vmul.f32 %v5250_v58, %v5172_v55  ;;  %v1010_v48 = vadd.f32 %v1006_v19, %v1000_v11 }
  0xcc   :  { %3888 = vpow2.f32 %v3443_v8  ;;  %v1011_v23 = vadd.f32 %v1007_v2, %v1001_v32  ;;  %v1012_v31 = vadd.f32 %v1008_v6, %v1002_v40  ;;  %v5286_v39 = vstv %s5257_s21  ;;  %s5882_s21 = sld [smem:[#allocation4 + $0x81]] }
  0xcd   :  { %3890 = vrcp.f32 %v881_v49  ;;  %v1013_v59 = vadd.f32 %v1009_v29, %v1003_v62  ;;  %v1016_v42 = vmul.f32 %v5286_v39, %v5186_v17  ;;  %v1017_v47 = vmul.f32 %v5286_v39, %v5197_v20 }
  0xce   :  { %3892 = vpow2.f32 %v3444_v52  ;;  %v1018_v43 = vmul.f32 %v5286_v39, %v5201_v16  ;;  %v1019_v15 = vmul.f32 %v5286_v39, %v5203_v10  ;;  %v5297_v50 = vstv %s5264_s22  ;;  %s5927_s22 = sld [smem:[#allocation4 + $0x82]] }
  0xcf   :  { %v5300_v13 = vstv %s5266_s4  ;;  %v3879_v11 = vpop.eup %3878  ;;  %v1020_v0 = vadd.f32 %v1016_v42, %v1010_v48  ;;  %v1021_v4 = vadd.f32 %v1017_v47, %v1011_v23  ;;  %v1026_v30 = vmul.f32 %v5297_v50, %v5207_v9  ;;  %s5953_s4 = sld [smem:[#allocation4 + $0x83]] }
  0xd0   :  { %v1027_v54 = vmul.f32 %v5297_v50, %v5213_v34  ;;  %v892_v26 = vmul.f32 %v3879_v11, %v4878_v36  ;;  %v1022_v3 = vadd.f32 %v1018_v43, %v1012_v31  ;;  %v1023_v27 = vadd.f32 %v1019_v15, %v1013_v59 }
  0xd1   :  { %v1028_v32 = vmul.f32 %v5297_v50, %v5215_v1  ;;  %v823_v53 = vadd.f32 %v819_v33, %v5243_v7  ;;  %v1029_v8 = vmul.f32 %v5297_v50, %v5221_v57  ;;  %v1030_v52 = vadd.f32 %v1026_v30, %v1020_v0 }
  0xd2   :  { %v3881_v56 = vpop.eup %3880  ;;  %v1031_v37 = vadd.f32 %v1027_v54, %v1021_v4  ;;  %v896_v12 = vadd.f32 %v892_v26, %v820_v35  ;;  %v5316_v19 = vstv %s5281_s23  ;;  %s5955_s23 = sld [smem:[#allocation4 + $0x100]] }
  0xd3   :  { %v3883_v46 = vpop.eup %3882  ;;  %v893_v40 = vmul.f32 %v3881_v56, %v4878_v36  ;;  %v1032_v62 = vadd.f32 %v1028_v32, %v1022_v3  ;;  %v1033_v6 = vadd.f32 %v1029_v8, %v1023_v27  ;;  %v1036_v29 = vadd.f32 %v5300_v13, %v1030_v52 }
  0xd4   :  { %v3885_v49 = vpop.eup %3884  ;;  %v980_v2 = vadd.f32 1.0, %v3883_v46  ;;  %v1037_v7 = vadd.f32 %v5300_v13, %v1031_v37  ;;  %v902_v23 = vadd.f32 %v896_v12, %v4542_v24  ;;  %v5335_v3 = vstv %s5307_s24  ;;  %s5959_s24 = sld [smem:[#allocation7 + $0x1]] }
  0xd5   :  { %v3887_v33 = vpop.eup %3886  ;;  %v897_v48 = vadd.f32 %v893_v40, %v821_v61  ;;  %v981_v31 = vadd.f32 1.0, %v3885_v49  ;;  %v1038_v59 = vadd.f32 %v5300_v13, %v1032_v62  ;;  %v1039_v47 = vadd.f32 %v5300_v13, %v1033_v6 }
  0xd6   :  { %v3889_v35 = vpop.eup %3888  ;;  %v894_v42 = vmul.f32 %v3887_v33, %v4878_v36  ;;  %3894 = vrcp.f32 %v980_v2  ;;  %v3450_v43 = vmul.f32 -1.442695, %v1036_v29  ;;  %906 = vst [vmem:[#allocation10 + $0x20] sm:$0xff] %v902_v23  ;;  %v3451_v61 = vmul.f32 -1.442695, %v1037_v7 }
  0xd7   :  { %v3891_v15 = vpop.eup %3890  ;;  %v903_v11 = vadd.f32 %v897_v48, %v4542_v24  ;;  %3896 = vrcp.f32 %v981_v31  ;;  %v3452_v54 = vmul.f32 -1.442695, %v1038_v59  ;;  %v982_v26 = vadd.f32 1.0, %v3889_v35 }
  0xd8   :  { %v3893_v0 = vpop.eup %3892  ;;  %v895_v4 = vmul.f32 %v3891_v15, %v4878_v36  ;;  %v898_v30 = vadd.f32 %v894_v42, %v822_v18  ;;  %3898 = vpow2.f32 %v3450_v43  ;;  %v3453_v27 = vmul.f32 -1.442695, %v1039_v47 }
  0xd9   :  { %907 = vst [vmem:[#allocation10 + $0x28] sm:$0xff] %v903_v11  ;;  %v1076_v32 = vmul.f32 %v5316_v19, %v5130_v63  ;;  %3900 = vpow2.f32 %v3451_v61  ;;  %v1077_v36 = vmul.f32 %v5316_v19, %v5132_v51  ;;  %v983_v18 = vadd.f32 1.0, %v3893_v0 }
  0xda   :  { %v899_v56 = vadd.f32 %v895_v4, %v823_v53  ;;  %v904_v8 = vadd.f32 %v898_v30, %v4542_v24  ;;  %v1078_v52 = vmul.f32 %v5316_v19, %v5139_v14  ;;  %v1079_v37 = vmul.f32 %v5316_v19, %v5147_v45 }
  0xdb   :  { %v5349_v46 = vstv %s5318_s25  ;;  %3902 = vpow2.f32 %v3452_v54  ;;  %v5363_v2 = vstv %s5324_s26  ;;  %v5374_v42 = vstv %s5330_s27  ;;  %s5972_s25 = sld [smem:[#allocation9 + $0x1]]  ;;  %s6012_s27 = sld [smem:[#allocation4 + $0x102]] }
  0xdc   :  { %v905_v53 = vadd.f32 %v899_v56, %v4542_v24  ;;  %908 = vst [vmem:[#allocation10 + $0x30] sm:$0xff] %v904_v8  ;;  %v1082_v40 = vmul.f32 %v5349_v46, %v5153_v25  ;;  %v1083_v12 = vmul.f32 %v5349_v46, %v5155_v21  ;;  %3904 = vpow2.f32 %v3453_v27  ;;  %7280 = vst [vmem:[#allocation15_spill] sm:$0xff] %v5374_v42  ;;  %s6002_s26 = sld [smem:[#allocation4 + $0x101]] }
  0xdd   :  { %v1084_v62 = vmul.f32 %v5349_v46, %v5170_v5  ;;  %v1085_v49 = vmul.f32 %v5349_v46, %v5172_v55  ;;  %v1092_v7 = vmul.f32 %v5363_v2, %v5186_v17  ;;  %v1093_v33 = vmul.f32 %v5363_v2, %v5197_v20 }
  0xde   :  { %909 = vst [vmem:[#allocation10 + $0x38] sm:$0xff] %v905_v53  ;;  %v1086_v6 = vadd.f32 %v1082_v40, %v1076_v32  ;;  %v1087_v29 = vadd.f32 %v1083_v12, %v1077_v36  ;;  %v1094_v31 = vmul.f32 %v5363_v2, %v5201_v16  ;;  %v1095_v59 = vmul.f32 %v5363_v2, %v5203_v10 }
  0xdf   :  { %v1088_v48 = vadd.f32 %v1084_v62, %v1078_v52  ;;  %v1089_v23 = vadd.f32 %v1085_v49, %v1079_v37  ;;  %v5377_v15 = vstv %s5332_s28  ;;  %3906 = vrcp.f32 %v982_v26  ;;  %s6023_s28 = sld [smem:[#allocation4 + $0x103]] }
  0xe0   :  { %v3895_v35 = vpop.eup %3894  ;;  %v1096_v47 = vadd.f32 %v1092_v7, %v1086_v6  ;;  %v1097_v43 = vadd.f32 %v1093_v33, %v1087_v29  ;;  %v1102_v4 = vmul.f32 %v5377_v15, %v5207_v9  ;;  %v1103_v54 = vmul.f32 %v5377_v15, %v5213_v34 }
  0xe1   :  { %v3897_v11 = vpop.eup %3896  ;;  %v1098_v61 = vadd.f32 %v1094_v31, %v1088_v48  ;;  %v1099_v0 = vadd.f32 %v1095_v59, %v1089_v23  ;;  %v1104_v27 = vmul.f32 %v5377_v15, %v5215_v1  ;;  %v1105_v32 = vmul.f32 %v5377_v15, %v5221_v57 }
  0xe2   :  { %v3899_v30 = vpop.eup %3898  ;;  %v5390_v56 = vstv %s5342_s2  ;;  %3908 = vrcp.f32 %v983_v18  ;;  %v1106_v8 = vadd.f32 %v1102_v4, %v1096_v47  ;;  %v5393_v36 = vstv %s5351_s29  ;;  %s6034_s2 = sld [smem:[#allocation7 + $0x2]]  ;;  %s6048_s29 = sld [smem:[#allocation4 + $0x180]] }
  0xe3   :  { %v1052_v26 = vadd.f32 1.0, %v3899_v30  ;;  %v3901_v52 = vpop.eup %3900  ;;  %v5400_v37 = vmul.f32 %v3895_v35, %v5335_v3  ;;  %v1107_v53 = vadd.f32 %v1103_v54, %v1097_v43  ;;  %v1108_v40 = vadd.f32 %v1104_v27, %v1098_v61 }
  0xe4   :  { %v1109_v12 = vadd.f32 %v1105_v32, %v1099_v0  ;;  %v5403_v62 = vmul.f32 %v3897_v11, %v5335_v3  ;;  %v1053_v49 = vadd.f32 1.0, %v3901_v52  ;;  %v1112_v18 = vadd.f32 %v5390_v56, %v1106_v8 }
  0xe5   :  { %3910 = vrcp.f32 %v1052_v26  ;;  %v3903_v6 = vpop.eup %3902  ;;  %v1113_v29 = vadd.f32 %v5390_v56, %v1107_v53  ;;  %v1114_v7 = vadd.f32 %v5390_v56, %v1108_v40  ;;  %v1152_v48 = vmul.f32 %v5393_v36, %v5130_v63 }
  0xe6   :  { %v1115_v33 = vadd.f32 %v5390_v56, %v1109_v12  ;;  %v3905_v23 = vpop.eup %3904  ;;  %v1054_v31 = vadd.f32 1.0, %v3903_v6  ;;  %3912 = vrcp.f32 %v1053_v49  ;;  %v3460_v59 = vmul.f32 -1.442695, %v1112_v18 }
  0xe7   :  { %v1153_v35 = vmul.f32 %v5393_v36, %v5132_v51  ;;  %v1055_v47 = vadd.f32 1.0, %v3905_v23  ;;  %v3461_v43 = vmul.f32 -1.442695, %v1113_v29  ;;  %v3462_v11 = vmul.f32 -1.442695, %v1114_v7 }
  0xe8   :  { %v1154_v61 = vmul.f32 %v5393_v36, %v5139_v14  ;;  %3914 = vrcp.f32 %v1054_v31  ;;  %v3463_v0 = vmul.f32 -1.442695, %v1115_v33  ;;  %v1155_v4 = vmul.f32 %v5393_v36, %v5147_v45 }
  0xe9   :  { %v5420_v30 = vstv %s5381_s30  ;;  %3916 = vrcp.f32 %v1055_v47  ;;  %v3907_v26 = vpop.eup %3906  ;;  %v5433_v52 = vstv %s5395_s6  ;;  %v5436_v53 = vstv %s5397_s7  ;;  %s6054_s30 = sld [smem:[#allocation9 + $0x2]]  ;;  %s6071_s6 = sld [smem:[#allocation4 + $0x181]] }
  0xea   :  { %v1158_v54 = vmul.f32 %v5420_v30, %v5153_v25  ;;  %v1159_v27 = vmul.f32 %v5420_v30, %v5155_v21  ;;  %v1160_v32 = vmul.f32 %v5420_v30, %v5170_v5  ;;  %3918 = vpow2.f32 %v3460_v59  ;;  %7281 = vst [vmem:[#allocation17_spill] sm:$0xff] %v5433_v52  ;;  %7282 = vst [vmem:[#allocation16_spill] sm:$0xff] %v5436_v53  ;;  %s6073_s7 = sld [smem:[#allocation4 + $0x182]] }
  0xeb   :  { %v1161_v8 = vmul.f32 %v5420_v30, %v5172_v55  ;;  %3920 = vpow2.f32 %v3461_v43  ;;  %v1168_v29 = vmul.f32 %v5433_v52, %v5186_v17  ;;  %v1169_v7 = vmul.f32 %v5433_v52, %v5197_v20 }
  0xec   :  { %v1162_v40 = vadd.f32 %v1158_v54, %v1152_v48  ;;  %v1163_v12 = vadd.f32 %v1159_v27, %v1153_v35  ;;  %v1164_v49 = vadd.f32 %v1160_v32, %v1154_v61  ;;  %v3909_v18 = vpop.eup %3908  ;;  %3922 = vpow2.f32 %v3462_v11 }
  0xed   :  { %v1165_v6 = vadd.f32 %v1161_v8, %v1155_v4  ;;  %3924 = vpow2.f32 %v3463_v0  ;;  %v1170_v33 = vmul.f32 %v5433_v52, %v5201_v16  ;;  %v1171_v48 = vmul.f32 %v5433_v52, %v5203_v10 }
  0xee   :  { %v1178_v23 = vmul.f32 %v5436_v53, %v5207_v9  ;;  %v1172_v59 = vadd.f32 %v1168_v29, %v1162_v40  ;;  %v1173_v35 = vadd.f32 %v1169_v7, %v1163_v12  ;;  %v1179_v47 = vmul.f32 %v5436_v53, %v5213_v34 }
  0xef   :  { %v3911_v31 = vpop.eup %3910  ;;  %v1180_v43 = vmul.f32 %v5436_v53, %v5215_v1  ;;  %v1174_v61 = vadd.f32 %v1170_v33, %v1164_v49  ;;  %v1175_v0 = vadd.f32 %v1171_v48, %v1165_v6  ;;  %v1181_v4 = vmul.f32 %v5436_v53, %v5221_v57 }
  0xf0   :  { %v1066_v11 = vmul.f32 %v3911_v31, %v5374_v42  ;;  %v3913_v54 = vpop.eup %3912  ;;  %v5462_v27 = vstv %s5415_s8  ;;  %v1182_v32 = vadd.f32 %v1178_v23, %v1172_v59  ;;  %v1183_v8 = vadd.f32 %v1179_v47, %v1173_v35  ;;  %s6091_s8 = sld [smem:[#allocation4 + $0x183]] }
  0xf1   :  { %7283 = vst [vmem:[#allocation18_spill] sm:$0xff] %v5462_v27  ;;  %v5465_v40 = vstv %s5422_s9  ;;  %v5468_v12 = vmul.f32 %v3907_v26, %v5335_v3  ;;  %v5471_v29 = vmul.f32 %v3909_v18, %v5335_v3  ;;  %v1184_v49 = vadd.f32 %v1180_v43, %v1174_v61  ;;  %s6101_s9 = sld [smem:[#allocation7 + $0x3]] }
  0xf2   :  { %7284 = vst [vmem:[#allocation14_spill] sm:$0xff] %v5465_v40  ;;  %v1185_v7 = vadd.f32 %v1181_v4, %v1175_v0  ;;  %v3915_v6 = vpop.eup %3914  ;;  %v1188_v33 = vadd.f32 %v5465_v40, %v1182_v32  ;;  %v1189_v48 = vadd.f32 %v5465_v40, %v1183_v8  ;;  %v5478_v23 = vstv %s5438_s0  ;;  %s6115_s0 = sld [smem:[#allocation9 + $0x3]] }
  0xf3   :  { %v5481_v31 = vstv %s5440_s10  ;;  %v3917_v59 = vpop.eup %3916  ;;  %v1067_v26 = vmul.f32 %v3913_v54, %v5374_v42  ;;  %v5485_v18 = vadd.f32 %v1066_v11, %v5400_v37  ;;  %v1190_v35 = vadd.f32 %v5465_v40, %v1184_v49  ;;  %s6117_s10 = sld [smem:[#allocation4 + $0x200]] }
  0xf4   :  { %v1191_v47 = vadd.f32 %v5465_v40, %v1185_v7  ;;  %v3919_v43 = vpop.eup %3918  ;;  %v1068_v61 = vmul.f32 %v3915_v6, %v5374_v42  ;;  %v1069_v0 = vmul.f32 %v3917_v59, %v5374_v42  ;;  %v3470_v4 = vmul.f32 -1.442695, %v1188_v33 }
  0xf5   :  { %v5492_v32 = vstv %s5446_s11  ;;  %v3921_v8 = vpop.eup %3920  ;;  %v1128_v53 = vadd.f32 1.0, %v3919_v43  ;;  %v3471_v54 = vmul.f32 -1.442695, %v1189_v48  ;;  %v3472_v52 = vmul.f32 -1.442695, %v1190_v35  ;;  %s6147_s11 = sld [smem:[#allocation4 + $0x201]] }
  0xf6   :  { %7285 = vst [vmem:[#allocation19_spill] sm:$0xff] %v5492_v32  ;;  %v1228_v37 = vmul.f32 %v5481_v31, %v5130_v63  ;;  %v3923_v11 = vpop.eup %3922  ;;  %v1129_v49 = vadd.f32 1.0, %v3921_v8  ;;  %3926 = vpow2.f32 %v3470_v4  ;;  %v3473_v7 = vmul.f32 -1.442695, %v1191_v47 }
  0xf7   :  { %v1229_v6 = vmul.f32 %v5481_v31, %v5132_v51  ;;  %v3925_v33 = vpop.eup %3924  ;;  %v1130_v59 = vadd.f32 1.0, %v3923_v11  ;;  %3928 = vrcp.f32 %v1128_v53  ;;  %v1230_v42 = vmul.f32 %v5481_v31, %v5139_v14 }
  0xf8   :  { %v1231_v48 = vmul.f32 %v5481_v31, %v5147_v45  ;;  %v1131_v63 = vadd.f32 1.0, %v3925_v33  ;;  %3930 = vrcp.f32 %v1129_v49  ;;  %v1234_v35 = vmul.f32 %v5492_v32, %v5153_v25 }
  0xf9   :  { %v1235_v47 = vmul.f32 %v5492_v32, %v5155_v21  ;;  %3932 = vrcp.f32 %v1130_v59  ;;  %v1236_v51 = vmul.f32 %v5492_v32, %v5170_v5  ;;  %v1237_v14 = vmul.f32 %v5492_v32, %v5172_v55 }
  0xfa   :  { %v5517_v45 = vstv %s5473_s12  ;;  %3934 = vrcp.f32 %v1131_v63  ;;  %v1238_v53 = vadd.f32 %v1234_v35, %v1228_v37  ;;  %v5528_v37 = vadd.f32 %v1067_v26, %v5403_v62  ;;  %s6155_s12 = sld [smem:[#allocation4 + $0x202]] }
  0xfb   :  { %7286 = vst [vmem:[#allocation20_spill] sm:$0xff] %v5517_v45  ;;  %v1239_v43 = vadd.f32 %v1235_v47, %v1229_v6  ;;  %v1244_v25 = vmul.f32 %v5517_v45, %v5186_v17  ;;  %3936 = vpow2.f32 %v3471_v54  ;;  %v1240_v21 = vadd.f32 %v1236_v51, %v1230_v42  ;;  %v5549_v6 = vld [vmem:[#allocation3 + $0x68] sm:$0xff]  ;;  %v5559_v47 = vld [vmem:[#allocation3 + $0x78] sm:$0xff] }
  0xfc   :  { %v1241_v4 = vadd.f32 %v1237_v14, %v1231_v48  ;;  %v1245_v8 = vmul.f32 %v5517_v45, %v5197_v20  ;;  %3938 = vpow2.f32 %v3472_v52  ;;  %v1246_v5 = vmul.f32 %v5517_v45, %v5201_v16  ;;  %v5537_v52 = vld [vmem:[#allocation3 + $0x60] sm:$0xff] }
  0xfd   :  { %v1247_v55 = vmul.f32 %v5517_v45, %v5203_v10  ;;  %v1248_v11 = vadd.f32 %v1244_v25, %v1238_v53  ;;  %3940 = vpow2.f32 %v3473_v7  ;;  %v5531_v42 = vstv %s5494_s1  ;;  %s6157_s1 = sld [smem:[#allocation4 + $0x203]] }
  0xfe   :  { %v1249_v17 = vadd.f32 %v1245_v8, %v1239_v43  ;;  %7287 = vst [vmem:[#allocation21_spill] sm:$0xff] %v5531_v42  ;;  %v1250_v54 = vadd.f32 %v1246_v5, %v1240_v21  ;;  %v1254_v20 = vmul.f32 %v5531_v42, %v5207_v9  ;;  %v1255_v16 = vmul.f32 %v5531_v42, %v5213_v34  ;;  %v5572_v8 = vld [vmem:[#allocation3 + $0x168] sm:$0xff] }
  0xff   :  { %v1251_v49 = vadd.f32 %v1247_v55, %v1241_v4  ;;  %v5540_v10 = vadd.f32 %v1068_v61, %v5468_v12  ;;  %v1256_v62 = vmul.f32 %v5531_v42, %v5215_v1  ;;  %v1257_v26 = vmul.f32 %v5531_v42, %v5221_v57  ;;  %v5557_v12 = vld [vmem:[#allocation3 + $0x70] sm:$0xff]  ;;  %v5561_v57 = vld [vmem:[#allocation3 + $0x160] sm:$0xff] }
 0x100   :  { %v5547_v7 = vstv %s5504_s3  ;;  %v3927_v33 = vpop.eup %3926  ;;  %v5552_v9 = vadd.f32 %v1069_v0, %v5471_v29  ;;  %v1258_v34 = vadd.f32 %v1254_v20, %v1248_v11  ;;  %v1259_v59 = vadd.f32 %v1255_v16, %v1249_v17  ;;  %v5612_v42 = vld [vmem:[#allocation3 + $0x370] sm:$0xff]  ;;  %s6179_s3 = sld [smem:[#allocation7 + $0x4]] }
 0x101   :  { %7288 = vst [vmem:[#allocation22_spill] sm:$0xff] %v5547_v7  ;;  %v5555_v48 = vstv %s5510_s13  ;;  %v3929_v61 = vpop.eup %3928  ;;  %v1204_v63 = vadd.f32 1.0, %v3927_v33  ;;  %v1260_v1 = vadd.f32 %v1256_v62, %v1250_v54  ;;  %v1261_v35 = vadd.f32 %v1257_v26, %v1251_v49  ;;  %v5576_v54 = vld [vmem:[#allocation3 + $0x170] sm:$0xff]  ;;  %s6200_s13 = sld [smem:[#allocation9 + $0x4]] }
 0x102   :  { %v1330_v51 = vmul.f32 %v5537_v52, %v5142_v44  ;;  %v3931_v14 = vpop.eup %3930  ;;  %v1142_v29 = vmul.f32 %v3929_v61, %v5462_v27  ;;  %v1264_v0 = vadd.f32 %v5547_v7, %v1258_v34  ;;  %v1265_v53 = vadd.f32 %v5547_v7, %v1259_v59  ;;  %v5590_v59 = vld [vmem:[#allocation3 + $0x178] sm:$0xff] }
 0x103   :  { %v1331_v43 = vmul.f32 %v5549_v6, %v5142_v44  ;;  %v3933_v25 = vpop.eup %3932  ;;  %3942 = vrcp.f32 %v1204_v63  ;;  %v1266_v21 = vadd.f32 %v5547_v7, %v1260_v1  ;;  %v1267_v4 = vadd.f32 %v5547_v7, %v1261_v35  ;;  %v5592_v1 = vld [vmem:[#allocation3 + $0x260] sm:$0xff] }
 0x104   :  { %v1332_v5 = vmul.f32 %v5557_v12, %v5142_v44  ;;  %v3935_v55 = vpop.eup %3934  ;;  %v3480_v11 = vmul.f32 -1.442695, %v1264_v0  ;;  %v3481_v17 = vmul.f32 -1.442695, %v1265_v53  ;;  %v1333_v49 = vmul.f32 %v5559_v47, %v5142_v44 }
 0x105   :  { %v1336_v20 = vmul.f32 %v5561_v57, %v5150_v41  ;;  %v3937_v16 = vpop.eup %3936  ;;  %v1143_v62 = vmul.f32 %v3931_v14, %v5462_v27  ;;  %v1144_v26 = vmul.f32 %v3933_v25, %v5462_v27  ;;  %v5585_v33 = vmul.f32 %v3935_v55, %v5462_v27  ;;  %v5596_v25 = vld [vmem:[#allocation3 + $0x268] sm:$0xff]  ;;  %v5598_v55 = vld [vmem:[#allocation3 + $0x270] sm:$0xff] }
 0x106   :  { %v5588_v34 = vadd.f32 %v1142_v29, %v5485_v18  ;;  %v3939_v61 = vpop.eup %3938  ;;  %v1205_v63 = vadd.f32 1.0, %v3937_v16  ;;  %3944 = vpow2.f32 %v3480_v11  ;;  %v3482_v44 = vmul.f32 -1.442695, %v1266_v21  ;;  %v5602_v11 = vld [vmem:[#allocation3 + $0x278] sm:$0xff]  ;;  %v5604_v21 = vld [vmem:[#allocation3 + $0x360] sm:$0xff] }
 0x107   :  { %v1337_v35 = vmul.f32 %v5572_v8, %v5150_v41  ;;  %v3941_v14 = vpop.eup %3940  ;;  %v1206_v0 = vadd.f32 1.0, %v3939_v61  ;;  %3946 = vpow2.f32 %v3481_v17  ;;  %v3483_v53 = vmul.f32 -1.442695, %v1267_v4  ;;  %v5608_v17 = vld [vmem:[#allocation3 + $0x368] sm:$0xff] }
 0x108   :  { %v1338_v18 = vmul.f32 %v5576_v54, %v5150_v41  ;;  %v1207_v29 = vadd.f32 1.0, %v3941_v14  ;;  %3948 = vrcp.f32 %v1205_v63  ;;  %v1339_v16 = vmul.f32 %v5590_v59, %v5150_v41  ;;  %v5614_v63 = vld [vmem:[#allocation3 + $0x378] sm:$0xff] }
 0x109   :  { %v1340_v27 = vadd.f32 %v1336_v20, %v1330_v51  ;;  %3950 = vrcp.f32 %v1206_v0  ;;  %v1341_v4 = vadd.f32 %v1337_v35, %v1331_v43  ;;  %v1346_v7 = vmul.f32 %v5592_v1, %v5210_v28 }
 0x10a   :  { %v1342_v61 = vadd.f32 %v1338_v18, %v1332_v5  ;;  %3952 = vrcp.f32 %v1207_v29  ;;  %v1343_v14 = vadd.f32 %v1339_v16, %v1333_v49  ;;  %v1347_v45 = vmul.f32 %v5596_v25, %v5210_v28 }
 0x10b   :  { %v1348_v41 = vmul.f32 %v5598_v55, %v5210_v28  ;;  %3954 = vpow2.f32 %v3482_v44  ;;  %v1349_v51 = vmul.f32 %v5602_v11, %v5210_v28  ;;  %v1350_v43 = vadd.f32 %v1346_v7, %v1340_v27 }
 0x10c   :  { %v1356_v5 = vmul.f32 %v5604_v21, %v5228_v22  ;;  %3956 = vpow2.f32 %v3483_v53  ;;  %v1351_v20 = vadd.f32 %v1347_v45, %v1341_v4  ;;  %v1357_v49 = vmul.f32 %v5608_v17, %v5228_v22 }
 0x10d   :  { %v1352_v35 = vadd.f32 %v1348_v41, %v1342_v61  ;;  %v3943_v0 = vpop.eup %3942  ;;  %v1353_v18 = vadd.f32 %v1349_v51, %v1343_v14  ;;  %v1358_v29 = vmul.f32 %v5612_v42, %v5228_v22  ;;  %v1359_v44 = vmul.f32 %v5614_v63, %v5228_v22 }
 0x10e   :  { %v1360_v16 = vadd.f32 %v1356_v5, %v1350_v43  ;;  %v1147_v28 = vadd.f32 %v1143_v62, %v5528_v37  ;;  %v1148_v27 = vadd.f32 %v1144_v26, %v5540_v10  ;;  %v1218_v7 = vmul.f32 %v3943_v0, %v5478_v23 }
 0x10f   :  { %v1361_v45 = vadd.f32 %v1357_v49, %v1351_v20  ;;  %v1362_v53 = vadd.f32 %v1358_v29, %v1352_v35  ;;  %v1363_v4 = vadd.f32 %v1359_v44, %v1353_v18  ;;  %v1402_v14 = vmul.f32 %v5537_v52, %v5246_v60 }
 0x110   :  { %v1366_v61 = vadd.f32 %v1360_v16, %v5240_v38  ;;  %v3945_v41 = vpop.eup %3944  ;;  %v1403_v22 = vmul.f32 %v5549_v6, %v5246_v60  ;;  %v1404_v37 = vmul.f32 %v5557_v12, %v5246_v60  ;;  %v1408_v10 = vmul.f32 %v5561_v57, %v5250_v58 }
 0x111   :  { %v1367_v51 = vadd.f32 %v1361_v45, %v5240_v38  ;;  %v3947_v62 = vpop.eup %3946  ;;  %v1280_v26 = vadd.f32 1.0, %v3945_v41  ;;  %v1368_v43 = vadd.f32 %v1362_v53, %v5240_v38  ;;  %v1369_v5 = vadd.f32 %v1363_v4, %v5240_v38 }
 0x112   :  { %v3488_v20 = vmul.f32 -1.442695, %v1366_v61  ;;  %v3949_v35 = vpop.eup %3948  ;;  %v1281_v49 = vadd.f32 1.0, %v3947_v62  ;;  %v1409_v18 = vmul.f32 %v5572_v8, %v5250_v58  ;;  %v1410_v29 = vmul.f32 %v5576_v54, %v5250_v58 }
 0x113   :  { %v3489_v0 = vmul.f32 -1.442695, %v1367_v51  ;;  %v3951_v44 = vpop.eup %3950  ;;  %v1149_v16 = vadd.f32 %v5585_v33, %v5552_v9  ;;  %3958 = vrcp.f32 %v1280_v26  ;;  %v3490_v45 = vmul.f32 -1.442695, %v1368_v43 }
 0x114   :  { %v1405_v53 = vmul.f32 %v5559_v47, %v5246_v60  ;;  %v3953_v38 = vpop.eup %3952  ;;  %v1219_v4 = vmul.f32 %v3949_v35, %v5478_v23  ;;  %v1222_v61 = vadd.f32 %v1218_v7, %v5588_v34  ;;  %3960 = vrcp.f32 %v1281_v49 }
 0x115   :  { %v1411_v41 = vmul.f32 %v5590_v59, %v5250_v58  ;;  %v3955_v51 = vpop.eup %3954  ;;  %v1220_v62 = vmul.f32 %v3951_v44, %v5478_v23  ;;  %3962 = vpow2.f32 %v3488_v20  ;;  %v3491_v32 = vmul.f32 -1.442695, %v1369_v5 }
 0x116   :  { %v1412_v9 = vadd.f32 %v1408_v10, %v1402_v14  ;;  %v3957_v33 = vpop.eup %3956  ;;  %v1282_v26 = vadd.f32 1.0, %v3955_v51  ;;  %3964 = vpow2.f32 %v3489_v0  ;;  %v1413_v43 = vadd.f32 %v1409_v18, %v1403_v22 }
 0x117   :  { %v1414_v60 = vadd.f32 %v1410_v29, %v1404_v37  ;;  %v1221_v40 = vmul.f32 %v3953_v38, %v5478_v23  ;;  %v1283_v35 = vadd.f32 1.0, %v3957_v33  ;;  %3966 = vpow2.f32 %v3490_v45 }
 0x118   :  { %v1415_v34 = vadd.f32 %v1411_v41, %v1405_v53  ;;  %3968 = vrcp.f32 %v1282_v26  ;;  %v1418_v58 = vmul.f32 %v5592_v1, %v5286_v39  ;;  %v1419_v7 = vmul.f32 %v5596_v25, %v5286_v39 }
 0x119   :  { %v1420_v14 = vmul.f32 %v5598_v55, %v5286_v39  ;;  %3970 = vrcp.f32 %v1283_v35  ;;  %v1421_v22 = vmul.f32 %v5602_v11, %v5286_v39  ;;  %v1428_v37 = vmul.f32 %v5604_v21, %v5297_v50 }
 0x11a   :  { %v1429_v10 = vmul.f32 %v5608_v17, %v5297_v50  ;;  %v1223_v5 = vadd.f32 %v1219_v4, %v1147_v28  ;;  %v1422_v20 = vadd.f32 %v1418_v58, %v1412_v9  ;;  %v1423_v49 = vadd.f32 %v1419_v7, %v1413_v43 }
 0x11b   :  { %v1424_v0 = vadd.f32 %v1420_v14, %v1414_v60  ;;  %v1224_v18 = vadd.f32 %v1220_v62, %v1148_v27  ;;  %v1425_v29 = vadd.f32 %v1421_v22, %v1415_v34  ;;  %v1430_v44 = vmul.f32 %v5612_v42, %v5297_v50 }
 0x11c   :  { %v1431_v45 = vmul.f32 %v5614_v63, %v5297_v50  ;;  %v1225_v53 = vadd.f32 %v1221_v40, %v1149_v16  ;;  %3972 = vpow2.f32 %v3491_v32  ;;  %v1432_v39 = vadd.f32 %v1428_v37, %v1422_v20 }
 0x11d   :  { %v1433_v38 = vadd.f32 %v1429_v10, %v1423_v49  ;;  %v3959_v41 = vpop.eup %3958  ;;  %v1434_v51 = vadd.f32 %v1430_v44, %v1424_v0  ;;  %v1478_v28 = vmul.f32 %v5537_v52, %v5316_v19  ;;  %v1479_v27 = vmul.f32 %v5549_v6, %v5316_v19 }
 0x11e   :  { %v1435_v33 = vadd.f32 %v1431_v45, %v1425_v29  ;;  %v3961_v4 = vpop.eup %3960  ;;  %v1294_v62 = vmul.f32 %v3959_v41, %v5555_v48  ;;  %v1438_v9 = vadd.f32 %v1432_v39, %v5300_v13  ;;  %v1480_v40 = vmul.f32 %v5557_v12, %v5316_v19 }
 0x11f   :  { %v1439_v50 = vadd.f32 %v1433_v38, %v5300_v13  ;;  %v3963_v32 = vpop.eup %3962  ;;  %v1295_v16 = vmul.f32 %v3961_v4, %v5555_v48  ;;  %v1440_v26 = vadd.f32 %v1434_v51, %v5300_v13  ;;  %v1481_v60 = vmul.f32 %v5559_v47, %v5316_v19 }
 0x120   :  { %v1441_v43 = vadd.f32 %v1435_v33, %v5300_v13  ;;  %v3965_v35 = vpop.eup %3964  ;;  %v1298_v34 = vadd.f32 %v1294_v62, %v1222_v61  ;;  %v1382_v58 = vadd.f32 1.0, %v3963_v32  ;;  %v1484_v7 = vmul.f32 %v5561_v57, %v5349_v46 }
 0x121   :  { %v1485_v14 = vmul.f32 %v5572_v8, %v5349_v46  ;;  %v3967_v22 = vpop.eup %3966  ;;  %v1299_v37 = vadd.f32 %v1295_v16, %v1223_v5  ;;  %v3497_v10 = vmul.f32 -1.442695, %v1438_v9  ;;  %v3498_v20 = vmul.f32 -1.442695, %v1439_v50 }
 0x122   :  { %v1486_v49 = vmul.f32 %v5576_v54, %v5349_v46  ;;  %v3969_v13 = vpop.eup %3968  ;;  %v1304_v0 = vadd.f32 %v1298_v34, %v4542_v24  ;;  %v1383_v19 = vadd.f32 1.0, %v3965_v35  ;;  %3974 = vrcp.f32 %v1382_v58 }
 0x123   :  { %v1487_v61 = vmul.f32 %v5590_v59, %v5349_v46  ;;  %v3971_v29 = vpop.eup %3970  ;;  %v1296_v44 = vmul.f32 %v3969_v13, %v5555_v48  ;;  %v1305_v45 = vadd.f32 %v1299_v37, %v4542_v24  ;;  %v3499_v39 = vmul.f32 -1.442695, %v1440_v26 }
 0x124   :  { %v3500_v5 = vmul.f32 -1.442695, %v1441_v43  ;;  %v1297_v38 = vmul.f32 %v3971_v29, %v5555_v48  ;;  %1308 = vst [vmem:[#allocation10 + $0x40] sm:$0xff] %v1304_v0  ;;  %v1384_v41 = vadd.f32 1.0, %v3967_v22  ;;  %v1488_v51 = vadd.f32 %v1484_v7, %v1478_v28 }
 0x125   :  { %v1489_v33 = vadd.f32 %v1485_v14, %v1479_v27  ;;  %v1300_v4 = vadd.f32 %v1296_v44, %v1224_v18  ;;  %1309 = vst [vmem:[#allocation10 + $0x48] sm:$0xff] %v1305_v45  ;;  %3976 = vpow2.f32 %v3497_v10  ;;  %v1490_v62 = vadd.f32 %v1486_v49, %v1480_v40 }
 0x126   :  { %v1491_v9 = vadd.f32 %v1487_v61, %v1481_v60  ;;  %v3973_v50 = vpop.eup %3972  ;;  %v1301_v46 = vadd.f32 %v1297_v38, %v1225_v53  ;;  %3978 = vpow2.f32 %v3498_v20  ;;  %v1494_v32 = vmul.f32 %v5592_v1, %v5363_v2 }
 0x127   :  { %v1495_v16 = vmul.f32 %v5596_v25, %v5363_v2  ;;  %v1306_v26 = vadd.f32 %v1300_v4, %v4542_v24  ;;  %3980 = vrcp.f32 %v1383_v19  ;;  %v1496_v28 = vmul.f32 %v5598_v55, %v5363_v2 }
 0x128   :  { %v1497_v18 = vmul.f32 %v5602_v11, %v5363_v2  ;;  %v1307_v27 = vadd.f32 %v1301_v46, %v4542_v24  ;;  %3982 = vpow2.f32 %v3499_v39  ;;  %v1498_v53 = vadd.f32 %v1494_v32, %v1488_v51 }
 0x129   :  { %v1499_v40 = vadd.f32 %v1495_v16, %v1489_v33  ;;  %1310 = vst [vmem:[#allocation10 + $0x50] sm:$0xff] %v1306_v26  ;;  %3984 = vpow2.f32 %v3500_v5  ;;  %v1500_v43 = vadd.f32 %v1496_v28, %v1490_v62  ;;  %v1504_v35 = vmul.f32 %v5604_v21, %v5377_v15 }
 0x12a   :  { %v1501_v60 = vadd.f32 %v1497_v18, %v1491_v9  ;;  %1311 = vst [vmem:[#allocation10 + $0x58] sm:$0xff] %v1307_v27  ;;  %3986 = vrcp.f32 %v1384_v41  ;;  %v1505_v34 = vmul.f32 %v5608_v17, %v5377_v15  ;;  %v1506_v2 = vmul.f32 %v5612_v42, %v5377_v15  ;;  %v7289_v27 = vld [vmem:[#allocation17_spill] sm:$0xff] }
 0x12b   :  { %v1507_v58 = vmul.f32 %v5614_v63, %v5377_v15  ;;  %v1385_v7 = vadd.f32 1.0, %v3973_v50  ;;  %v1508_v14 = vadd.f32 %v1504_v35, %v1498_v53  ;;  %v1554_v22 = vmul.f32 %v5537_v52, %v5393_v36 }
 0x12c   :  { %v1555_v37 = vmul.f32 %v5549_v6, %v5393_v36  ;;  %v3975_v10 = vpop.eup %3974  ;;  %v1509_v20 = vadd.f32 %v1505_v34, %v1499_v40  ;;  %v1510_v49 = vadd.f32 %v1506_v2, %v1500_v43  ;;  %v1560_v0 = vmul.f32 %v5561_v57, %v5420_v30 }
 0x12d   :  { %v1511_v13 = vadd.f32 %v1507_v58, %v1501_v60  ;;  %v1514_v19 = vadd.f32 %v1508_v14, %v5390_v56  ;;  %v1556_v15 = vmul.f32 %v5557_v12, %v5393_v36  ;;  %v1561_v61 = vmul.f32 %v5572_v8, %v5420_v30 }
 0x12e   :  { %v1562_v29 = vmul.f32 %v5576_v54, %v5420_v30  ;;  %v1515_v44 = vadd.f32 %v1509_v20, %v5390_v56  ;;  %v1516_v45 = vadd.f32 %v1510_v49, %v5390_v56  ;;  %v1557_v5 = vmul.f32 %v5559_v47, %v5393_v36 }
 0x12f   :  { %v1517_v39 = vadd.f32 %v1511_v13, %v5390_v56  ;;  %v3977_v38 = vpop.eup %3976  ;;  %3988 = vrcp.f32 %v1385_v7  ;;  %v5738_v41 = vmul.f32 %v3975_v10, %v5335_v3  ;;  %v3507_v51 = vmul.f32 -1.442695, %v1514_v19 }
 0x130   :  { %v1563_v33 = vmul.f32 %v5590_v59, %v5420_v30  ;;  %v3979_v4 = vpop.eup %3978  ;;  %v1454_v62 = vadd.f32 1.0, %v3977_v38  ;;  %v3508_v9 = vmul.f32 -1.442695, %v1515_v44  ;;  %v3509_v50 = vmul.f32 -1.442695, %v1516_v45 }
 0x131   :  { %v1564_v46 = vadd.f32 %v1560_v0, %v1554_v22  ;;  %v3981_v32 = vpop.eup %3980  ;;  %v1455_v16 = vadd.f32 1.0, %v3979_v4  ;;  %3990 = vpow2.f32 %v3507_v51  ;;  %v1565_v56 = vadd.f32 %v1561_v61, %v1555_v37  ;;  %v7290_v22 = vld [vmem:[#allocation16_spill] sm:$0xff] }
 0x132   :  { %v1566_v26 = vadd.f32 %v1562_v29, %v1556_v15  ;;  %v3983_v36 = vpop.eup %3982  ;;  %3992 = vrcp.f32 %v1454_v62  ;;  %v3510_v28 = vmul.f32 -1.442695, %v1517_v39  ;;  %v1567_v18 = vadd.f32 %v1563_v33, %v1557_v5  ;;  %v7291_v39 = vld [vmem:[#allocation14_spill] sm:$0xff]  ;;  %v7292_v62 = vld [vmem:[#allocation19_spill] sm:$0xff] }
 0x133   :  { %v1570_v53 = vmul.f32 %v5592_v1, %v7289_v27  ;;  %v3985_v40 = vpop.eup %3984  ;;  %v1456_v43 = vadd.f32 1.0, %v3983_v36  ;;  %3994 = vrcp.f32 %v1455_v16  ;;  %v1571_v30 = vmul.f32 %v5596_v25, %v7289_v27 }
 0x134   :  { %v1572_v60 = vmul.f32 %v5598_v55, %v7289_v27  ;;  %v3987_v35 = vpop.eup %3986  ;;  %v1457_v34 = vadd.f32 1.0, %v3985_v40  ;;  %3996 = vpow2.f32 %v3508_v9  ;;  %v1573_v2 = vmul.f32 %v5602_v11, %v7289_v27  ;;  %v7293_v27 = vld [vmem:[#allocation15_spill] sm:$0xff] }
 0x135   :  { %v1574_v58 = vadd.f32 %v1570_v53, %v1564_v46  ;;  %3998 = vrcp.f32 %v1456_v43  ;;  %v1575_v7 = vadd.f32 %v1571_v30, %v1565_v56  ;;  %v1580_v37 = vmul.f32 %v5604_v21, %v7290_v22 }
 0x136   :  { %v1576_v14 = vadd.f32 %v1572_v60, %v1566_v26  ;;  %4000 = vrcp.f32 %v1457_v34  ;;  %v1577_v10 = vadd.f32 %v1573_v2, %v1567_v18  ;;  %v1581_v20 = vmul.f32 %v5608_v17, %v7290_v22 }
 0x137   :  { %v1582_v49 = vmul.f32 %v5612_v42, %v7290_v22  ;;  %v5757_v13 = vmul.f32 %v3981_v32, %v5335_v3  ;;  %4002 = vpow2.f32 %v3509_v50  ;;  %v1583_v0 = vmul.f32 %v5614_v63, %v7290_v22 }
 0x138   :  { %v1584_v19 = vadd.f32 %v1580_v37, %v1574_v58  ;;  %4004 = vpow2.f32 %v3510_v28  ;;  %v1585_v15 = vadd.f32 %v1581_v20, %v1575_v7  ;;  %v1630_v29 = vmul.f32 %v5537_v52, %v5481_v31 }
 0x139   :  { %v1586_v61 = vadd.f32 %v1582_v49, %v1576_v14  ;;  %v3989_v44 = vpop.eup %3988  ;;  %v1587_v45 = vadd.f32 %v1583_v0, %v1577_v10  ;;  %v1631_v38 = vmul.f32 %v5549_v6, %v5481_v31  ;;  %v1632_v51 = vmul.f32 %v5557_v12, %v5481_v31 }
 0x13a   :  { %v1590_v5 = vadd.f32 %v1584_v19, %v7291_v39  ;;  %v1591_v33 = vadd.f32 %v1585_v15, %v7291_v39  ;;  %v1636_v9 = vmul.f32 %v5561_v57, %v7292_v62  ;;  %v1637_v52 = vmul.f32 %v5572_v8, %v7292_v62 }
 0x13b   :  { %v1592_v4 = vadd.f32 %v1586_v61, %v7291_v39  ;;  %v3991_v50 = vpop.eup %3990  ;;  %v1593_v46 = vadd.f32 %v1587_v45, %v7291_v39  ;;  %v1633_v6 = vmul.f32 %v5559_v47, %v5481_v31  ;;  %v1638_v12 = vmul.f32 %v5576_v54, %v7292_v62  ;;  %v7295_v61 = vld [vmem:[#allocation21_spill] sm:$0xff] }
 0x13c   :  { %v3517_v32 = vmul.f32 -1.442695, %v1590_v5  ;;  %v3993_v16 = vpop.eup %3992  ;;  %v1530_v56 = vadd.f32 1.0, %v3991_v50  ;;  %v3518_v26 = vmul.f32 -1.442695, %v1591_v33  ;;  %v1639_v57 = vmul.f32 %v5590_v59, %v7292_v62  ;;  %v7294_v59 = vld [vmem:[#allocation20_spill] sm:$0xff] }
 0x13d   :  { %v3519_v36 = vmul.f32 -1.442695, %v1592_v4  ;;  %v3995_v28 = vpop.eup %3994  ;;  %v1398_v8 = vmul.f32 %v3987_v35, %v5335_v3  ;;  %v1399_v18 = vmul.f32 %v3989_v44, %v5335_v3  ;;  %v1468_v53 = vmul.f32 %v3993_v16, %v7293_v27  ;;  %v5822_v33 = vld [vmem:[#allocation3 + $0x90] sm:$0xff] }
 0x13e   :  { %4006 = vpow2.f32 %v3517_v32  ;;  %v3997_v31 = vpop.eup %3996  ;;  %v3520_v47 = vmul.f32 -1.442695, %v1593_v46  ;;  %v1640_v54 = vadd.f32 %v1636_v9, %v1630_v29  ;;  %v1641_v40 = vadd.f32 %v1637_v52, %v1631_v38  ;;  %v5806_v29 = vld [vmem:[#allocation3 + $0x80] sm:$0xff] }
 0x13f   :  { %4008 = vrcp.f32 %v1530_v56  ;;  %v3999_v43 = vpop.eup %3998  ;;  %v1531_v30 = vadd.f32 1.0, %v3997_v31  ;;  %v1642_v60 = vadd.f32 %v1638_v12, %v1632_v51  ;;  %v1646_v34 = vmul.f32 %v5592_v1, %v7294_v59  ;;  %v5826_v9 = vld [vmem:[#allocation3 + $0x180] sm:$0xff]  ;;  %v5834_v12 = vld [vmem:[#allocation3 + $0x98] sm:$0xff] }
 0x140   :  { %4010 = vpow2.f32 %v3518_v26  ;;  %v4001_v35 = vpop.eup %4000  ;;  %v1469_v3 = vmul.f32 %v3995_v28, %v7293_v27  ;;  %v1643_v2 = vadd.f32 %v1639_v57, %v1633_v6  ;;  %v1647_v58 = vmul.f32 %v5596_v25, %v7294_v59  ;;  %v7296_v46 = vld [vmem:[#allocation22_spill] sm:$0xff]  ;;  %v5841_v57 = vld [vmem:[#allocation3 + $0x188] sm:$0xff]  ;;  %v5843_v28 = vld [vmem:[#allocation3 + $0x190] sm:$0xff] }
 0x141   :  { %4012 = vpow2.f32 %v3519_v36  ;;  %v4003_v7 = vpop.eup %4002  ;;  %v5794_v14 = vadd.f32 %v1468_v53, %v5738_v41  ;;  %v1648_v22 = vmul.f32 %v5598_v55, %v7294_v59  ;;  %v1649_v1 = vmul.f32 %v5602_v11, %v7294_v59 }
 0x142   :  { %4014 = vrcp.f32 %v1531_v30  ;;  %v4005_v37 = vpop.eup %4004  ;;  %v1470_v10 = vmul.f32 %v3999_v43, %v7293_v27  ;;  %v1532_v20 = vadd.f32 1.0, %v4003_v7  ;;  %v1650_v25 = vadd.f32 %v1646_v34, %v1640_v54  ;;  %v7297_v43 = vld [vmem:[#allocation18_spill] sm:$0xff] }
 0x143   :  { %4016 = vpow2.f32 %v3520_v47  ;;  %v1471_v49 = vmul.f32 %v4001_v35, %v7293_v27  ;;  %v1533_v0 = vadd.f32 1.0, %v4005_v37  ;;  %v1651_v19 = vadd.f32 %v1647_v58, %v1641_v40  ;;  %v5849_v47 = vld [vmem:[#allocation3 + $0x198] sm:$0xff]  ;;  %v5866_v37 = vld [vmem:[#allocation3 + $0x288] sm:$0xff] }
 0x144   :  { %v1652_v41 = vadd.f32 %v1648_v22, %v1642_v60  ;;  %4018 = vrcp.f32 %v1532_v20  ;;  %v1653_v15 = vadd.f32 %v1649_v1, %v1643_v2  ;;  %v1656_v55 = vmul.f32 %v5604_v21, %v7295_v61  ;;  %v5858_v2 = vld [vmem:[#allocation3 + $0x280] sm:$0xff] }
 0x145   :  { %v1657_v11 = vmul.f32 %v5608_v17, %v7295_v61  ;;  %v5809_v44 = vadd.f32 %v1469_v3, %v5757_v13  ;;  %v1658_v45 = vmul.f32 %v5612_v42, %v7295_v61  ;;  %v1659_v39 = vmul.f32 %v5614_v63, %v7295_v61  ;;  %v5820_v17 = vld [vmem:[#allocation3 + $0x88] sm:$0xff] }
 0x146   :  { %v5816_v5 = vstv %s5784_s14  ;;  %v5818_v38 = vadd.f32 %v1470_v10, %v1398_v8  ;;  %4020 = vrcp.f32 %v1533_v0  ;;  %v1660_v21 = vadd.f32 %v1656_v55, %v1650_v25  ;;  %v5875_v0 = vld [vmem:[#allocation3 + $0x298] sm:$0xff]  ;;  %s6464_s14 = sld [smem:[#allocation4]] }
 0x147   :  { %v1661_v51 = vadd.f32 %v1657_v11, %v1651_v19  ;;  %v5824_v4 = vadd.f32 %v1471_v49, %v1399_v18  ;;  %v1662_v62 = vadd.f32 %v1658_v45, %v1652_v41  ;;  %v1663_v42 = vadd.f32 %v1659_v39, %v1653_v15  ;;  %v5873_v49 = vld [vmem:[#allocation3 + $0x290] sm:$0xff]  ;;  %v5885_v39 = vld [vmem:[#allocation3 + $0x380] sm:$0xff] }
 0x148   :  { %v4007_v13 = vpop.eup %4006  ;;  %v1732_v63 = vmul.f32 %v5816_v5, %v5806_v29  ;;  %v1666_v32 = vadd.f32 %v1660_v21, %v7296_v46  ;;  %v5837_v16 = vstv %s5791_s15  ;;  %v1733_v8 = vmul.f32 %v5816_v5, %v5820_v17  ;;  %s6466_s15 = sld [smem:[#allocation4 + $0x1]] }
 0x149   :  { %v4009_v52 = vpop.eup %4008  ;;  %v1606_v50 = vadd.f32 1.0, %v4007_v13  ;;  %v1667_v6 = vadd.f32 %v1661_v51, %v7296_v46  ;;  %v1668_v26 = vadd.f32 %v1662_v62, %v7296_v46  ;;  %v1669_v36 = vadd.f32 %v1663_v42, %v7296_v46  ;;  %v5892_v62 = vld [vmem:[#allocation3 + $0x388] sm:$0xff]  ;;  %v5894_v42 = vld [vmem:[#allocation3 + $0x390] sm:$0xff] }
 0x14a   :  { %v4011_v56 = vpop.eup %4010  ;;  %v1734_v18 = vmul.f32 %v5816_v5, %v5822_v33  ;;  %v3527_v31 = vmul.f32 -1.442695, %v1666_v32  ;;  %v1738_v54 = vmul.f32 %v5837_v16, %v5826_v9  ;;  %v1544_v30 = vmul.f32 %v4009_v52, %v7297_v43 }
 0x14b   :  { %v4013_v27 = vpop.eup %4012  ;;  %v1607_v53 = vadd.f32 1.0, %v4011_v56  ;;  %4022 = vrcp.f32 %v1606_v50  ;;  %v3528_v59 = vmul.f32 -1.442695, %v1667_v6  ;;  %v1735_v34 = vmul.f32 %v5816_v5, %v5834_v12 }
 0x14c   :  { %v4015_v40 = vpop.eup %4014  ;;  %v1608_v60 = vadd.f32 1.0, %v4013_v27  ;;  %v3529_v3 = vmul.f32 -1.442695, %v1668_v26  ;;  %v1739_v58 = vmul.f32 %v5837_v16, %v5841_v57  ;;  %v1740_v7 = vmul.f32 %v5837_v16, %v5843_v28 }
 0x14d   :  { %v4017_v35 = vpop.eup %4016  ;;  %4024 = vrcp.f32 %v1607_v53  ;;  %v3530_v1 = vmul.f32 -1.442695, %v1669_v36  ;;  %v1741_v10 = vmul.f32 %v5837_v16, %v5849_v47  ;;  %v1545_v25 = vmul.f32 %v4015_v40, %v7297_v43 }
 0x14e   :  { %v1609_v22 = vadd.f32 1.0, %v4017_v35  ;;  %4026 = vrcp.f32 %v1608_v60  ;;  %v4019_v20 = vpop.eup %4018  ;;  %v1742_v19 = vadd.f32 %v1738_v54, %v1732_v63  ;;  %v1743_v41 = vadd.f32 %v1739_v58, %v1733_v8  ;;  %v5896_v63 = vld [vmem:[#allocation3 + $0x398] sm:$0xff] }
 0x14f   :  { %4028 = vpow2.f32 %v3527_v31  ;;  %v1744_v15 = vadd.f32 %v1740_v7, %v1734_v18  ;;  %v1745_v61 = vadd.f32 %v1741_v10, %v1735_v34  ;;  %v5878_v55 = vstv %s5830_s16  ;;  %s6499_s16 = sld [smem:[#allocation4 + $0x2]] }
 0x150   :  { %4030 = vrcp.f32 %v1609_v22  ;;  %v4021_v11 = vpop.eup %4020  ;;  %v1548_v45 = vadd.f32 %v1544_v30, %v5794_v14  ;;  %v1748_v21 = vmul.f32 %v5878_v55, %v5858_v2  ;;  %v1749_v51 = vmul.f32 %v5878_v55, %v5866_v37 }
 0x151   :  { %4032 = vpow2.f32 %v3528_v59  ;;  %v1546_v13 = vmul.f32 %v4019_v20, %v7297_v43  ;;  %v1750_v14 = vmul.f32 %v5878_v55, %v5873_v49  ;;  %v1751_v52 = vmul.f32 %v5878_v55, %v5875_v0 }
 0x152   :  { %4034 = vpow2.f32 %v3529_v3  ;;  %v5903_v50 = vadd.f32 %v1545_v25, %v5809_v44  ;;  %v1752_v46 = vadd.f32 %v1748_v21, %v1742_v19  ;;  %v1753_v32 = vadd.f32 %v1749_v51, %v1743_v41 }
 0x153   :  { %4036 = vpow2.f32 %v3530_v1  ;;  %v1547_v6 = vmul.f32 %v4021_v11, %v7297_v43  ;;  %v1754_v56 = vadd.f32 %v1750_v14, %v1744_v15  ;;  %v1755_v26 = vadd.f32 %v1751_v52, %v1745_v61 }
 0x154   :  { %v5907_v36 = vstv %s5856_s17  ;;  %v5918_v31 = vadd.f32 %v1546_v13, %v5818_v38  ;;  %v5922_v40 = vstv %s5870_s19  ;;  %v5925_v43 = vstv %s5864_s18  ;;  %s6532_s17 = sld [smem:[#allocation4 + $0x3]]  ;;  %s6541_s18 = sld [smem:[#allocation7]] }
 0x155   :  { %v4023_v8 = vpop.eup %4022  ;;  %v1758_v18 = vmul.f32 %v5907_v36, %v5885_v39  ;;  %v1759_v27 = vmul.f32 %v5907_v36, %v5892_v62  ;;  %v1760_v44 = vmul.f32 %v5907_v36, %v5894_v42  ;;  %v1761_v53 = vmul.f32 %v5907_v36, %v5896_v63  ;;  %s6552_s19 = sld [smem:[#allocation4 + $0x80]] }
 0x156   :  { %v1620_v54 = vmul.f32 %v4023_v8, %v5478_v23  ;;  %v5930_v58 = vadd.f32 %v1547_v6, %v5824_v4  ;;  %v5934_v7 = vstv %s5880_s20  ;;  %v5937_v22 = vstv %s5882_s21  ;;  %s6593_s20 = sld [smem:[#allocation4 + $0x81]]  ;;  %s6599_s21 = sld [smem:[#allocation4 + $0x82]] }
 0x157   :  { %v4025_v30 = vpop.eup %4024  ;;  %v1762_v60 = vadd.f32 %v1758_v18, %v1752_v46  ;;  %v1763_v59 = vadd.f32 %v1759_v27, %v1753_v32  ;;  %v1764_v34 = vadd.f32 %v1760_v44, %v1754_v56  ;;  %v1765_v35 = vadd.f32 %v1761_v53, %v1755_v26  ;;  %7298 = vst [vmem:[#allocation17_spill] sm:$0xff] %v5934_v7 }
 0x158   :  { %v4027_v3 = vpop.eup %4026  ;;  %v1621_v38 = vmul.f32 %v4025_v30, %v5478_v23  ;;  %v5939_v10 = vadd.f32 %v1620_v54, %v1548_v45  ;;  %v1804_v61 = vmul.f32 %v5925_v43, %v5806_v29  ;;  %v1805_v11 = vmul.f32 %v5925_v43, %v5820_v17 }
 0x159   :  { %v4029_v1 = vpop.eup %4028  ;;  %v1768_v20 = vadd.f32 %v5922_v40, %v1762_v60  ;;  %v1769_v25 = vadd.f32 %v5922_v40, %v1763_v59  ;;  %v1770_v19 = vadd.f32 %v5922_v40, %v1764_v34  ;;  %v1771_v4 = vadd.f32 %v5922_v40, %v1765_v35 }
 0x15a   :  { %v4031_v41 = vpop.eup %4030  ;;  %v1682_v15 = vadd.f32 1.0, %v4029_v1  ;;  %v1622_v45 = vmul.f32 %v4027_v3, %v5478_v23  ;;  %v1806_v14 = vmul.f32 %v5925_v43, %v5822_v33  ;;  %v1810_v27 = vmul.f32 %v5937_v22, %v5826_v9 }
 0x15b   :  { %v4033_v21 = vpop.eup %4032  ;;  %v1623_v51 = vmul.f32 %v4031_v41, %v5478_v23  ;;  %v3535_v13 = vmul.f32 -1.442695, %v1768_v20  ;;  %v3536_v32 = vmul.f32 -1.442695, %v1769_v25  ;;  %v3537_v6 = vmul.f32 -1.442695, %v1770_v19 }
 0x15c   :  { %v4035_v52 = vpop.eup %4034  ;;  %v1683_v46 = vadd.f32 1.0, %v4033_v21  ;;  %4038 = vrcp.f32 %v1682_v15  ;;  %v3538_v8 = vmul.f32 -1.442695, %v1771_v4  ;;  %v1807_v23 = vmul.f32 %v5925_v43, %v5834_v12 }
 0x15d   :  { %v4037_v56 = vpop.eup %4036  ;;  %v1684_v26 = vadd.f32 1.0, %v4035_v52  ;;  %4040 = vpow2.f32 %v3535_v13  ;;  %v1811_v44 = vmul.f32 %v5937_v22, %v5841_v57  ;;  %v1812_v53 = vmul.f32 %v5937_v22, %v5843_v28 }
 0x15e   :  { %v1685_v18 = vadd.f32 1.0, %v4037_v56  ;;  %4042 = vrcp.f32 %v1683_v46  ;;  %v1813_v54 = vmul.f32 %v5937_v22, %v5849_v47  ;;  %v5970_v30 = vstv %s5927_s22  ;;  %s6601_s22 = sld [smem:[#allocation4 + $0x83]] }
 0x15f   :  { %4044 = vrcp.f32 %v1684_v26  ;;  %v1814_v60 = vadd.f32 %v1810_v27, %v1804_v61  ;;  %v1815_v59 = vadd.f32 %v1811_v44, %v1805_v11  ;;  %v1820_v34 = vmul.f32 %v5970_v30, %v5858_v2 }
 0x160   :  { %4046 = vrcp.f32 %v1685_v18  ;;  %v1816_v35 = vadd.f32 %v1812_v53, %v1806_v14  ;;  %v1817_v3 = vadd.f32 %v1813_v54, %v1807_v23  ;;  %v1821_v1 = vmul.f32 %v5970_v30, %v5866_v37 }
 0x161   :  { %4048 = vpow2.f32 %v3536_v32  ;;  %v1822_v20 = vmul.f32 %v5970_v30, %v5873_v49  ;;  %v1823_v25 = vmul.f32 %v5970_v30, %v5875_v0  ;;  %v1824_v19 = vadd.f32 %v1820_v34, %v1814_v60 }
 0x162   :  { %4050 = vpow2.f32 %v3537_v6  ;;  %v1625_v41 = vadd.f32 %v1621_v38, %v5903_v50  ;;  %v1825_v15 = vadd.f32 %v1821_v1, %v1815_v59  ;;  %v5984_v4 = vstv %s5953_s4  ;;  %s6619_s4 = sld [smem:[#allocation7 + $0x1]] }
 0x163   :  { %4052 = vpow2.f32 %v3538_v8  ;;  %v1826_v61 = vadd.f32 %v1822_v20, %v1816_v35  ;;  %v1827_v11 = vadd.f32 %v1823_v25, %v1817_v3  ;;  %v1830_v21 = vmul.f32 %v5984_v4, %v5885_v39 }
 0x164   :  { %v1831_v13 = vmul.f32 %v5984_v4, %v5892_v62  ;;  %v1832_v14 = vmul.f32 %v5984_v4, %v5894_v42  ;;  %v1833_v52 = vmul.f32 %v5984_v4, %v5896_v63  ;;  %v5995_v50 = vstv %s5959_s24  ;;  %s6669_s24 = sld [smem:[#allocation4 + $0x101]] }
 0x165   :  { %v5998_v38 = vstv %s5955_s23  ;;  %v1626_v32 = vadd.f32 %v1622_v45, %v5918_v31  ;;  %v1627_v6 = vadd.f32 %v1623_v51, %v5930_v58  ;;  %v1834_v56 = vadd.f32 %v1830_v21, %v1824_v19  ;;  %s6657_s23 = sld [smem:[#allocation4 + $0x100]] }
 0x166   :  { %v4039_v46 = vpop.eup %4038  ;;  %v1835_v26 = vadd.f32 %v1831_v13, %v1825_v15  ;;  %v1836_v18 = vadd.f32 %v1832_v14, %v1826_v61  ;;  %v1837_v27 = vadd.f32 %v1833_v52, %v1827_v11  ;;  %v6006_v44 = vstv %s5972_s25  ;;  %s6671_s25 = sld [smem:[#allocation4 + $0x102]] }
 0x167   :  { %v4041_v8 = vpop.eup %4040  ;;  %v1696_v23 = vmul.f32 %v4039_v46, %v5555_v48  ;;  %7299 = vst [vmem:[#allocation16_spill] sm:$0xff] %v6006_v44  ;;  %v1840_v60 = vadd.f32 %v5995_v50, %v1834_v56  ;;  %v1880_v31 = vmul.f32 %v5998_v38, %v5806_v29  ;;  %v1881_v35 = vmul.f32 %v5998_v38, %v5820_v17 }
 0x168   :  { %v4043_v53 = vpop.eup %4042  ;;  %v1784_v54 = vadd.f32 1.0, %v4041_v8  ;;  %v1841_v59 = vadd.f32 %v5995_v50, %v1835_v26  ;;  %v1842_v34 = vadd.f32 %v5995_v50, %v1836_v18  ;;  %v1843_v20 = vadd.f32 %v5995_v50, %v1837_v27 }
 0x169   :  { %v4045_v58 = vpop.eup %4044  ;;  %v1697_v45 = vmul.f32 %v4043_v53, %v5555_v48  ;;  %v1700_v51 = vadd.f32 %v1696_v23, %v5939_v10  ;;  %v3544_v25 = vmul.f32 -1.442695, %v1840_v60  ;;  %v1882_v14 = vmul.f32 %v5998_v38, %v5822_v33 }
 0x16a   :  { %v4047_v3 = vpop.eup %4046  ;;  %v1698_v1 = vmul.f32 %v4045_v58, %v5555_v48  ;;  %v3545_v19 = vmul.f32 -1.442695, %v1841_v59  ;;  %4054 = vrcp.f32 %v1784_v54  ;;  %v1883_v52 = vmul.f32 %v5998_v38, %v5834_v12 }
 0x16b   :  { %v4049_v15 = vpop.eup %4048  ;;  %v1699_v61 = vmul.f32 %v4047_v3, %v5555_v48  ;;  %v1701_v11 = vadd.f32 %v1697_v45, %v1625_v41  ;;  %v1706_v21 = vadd.f32 %v1700_v51, %v4542_v24  ;;  %4056 = vpow2.f32 %v3544_v25 }
 0x16c   :  { %v4051_v10 = vpop.eup %4050  ;;  %v1702_v13 = vadd.f32 %v1698_v1, %v1626_v32  ;;  %4058 = vpow2.f32 %v3545_v19  ;;  %v3546_v41 = vmul.f32 -1.442695, %v1842_v34  ;;  %v1785_v8 = vadd.f32 1.0, %v4049_v15 }
 0x16d   :  { %v4053_v46 = vpop.eup %4052  ;;  %v1703_v56 = vadd.f32 %v1699_v61, %v1627_v6  ;;  %v1707_v48 = vadd.f32 %v1701_v11, %v4542_v24  ;;  %1710 = vst [vmem:[#allocation10 + $0x60] sm:$0xff] %v1706_v21  ;;  %v3547_v23 = vmul.f32 -1.442695, %v1843_v20  ;;  %v6032_v32 = vstv %s6002_s26  ;;  %s6674_s26 = sld [smem:[#allocation4 + $0x103]] }
 0x16e   :  { %v1708_v26 = vadd.f32 %v1702_v13, %v4542_v24  ;;  %v1786_v27 = vadd.f32 1.0, %v4051_v10  ;;  %v1886_v6 = vmul.f32 %v6032_v32, %v5826_v9  ;;  %v1887_v53 = vmul.f32 %v6032_v32, %v5841_v57 }
 0x16f   :  { %v1709_v18 = vadd.f32 %v1703_v56, %v4542_v24  ;;  %1711 = vst [vmem:[#allocation10 + $0x68] sm:$0xff] %v1707_v48  ;;  %v1787_v54 = vadd.f32 1.0, %v4053_v46  ;;  %v1888_v60 = vmul.f32 %v6032_v32, %v5843_v28  ;;  %v1889_v59 = vmul.f32 %v6032_v32, %v5849_v47 }
 0x170   :  { %1712 = vst [vmem:[#allocation10 + $0x70] sm:$0xff] %v1708_v26  ;;  %v6046_v58 = vstv %s6012_s27  ;;  %4060 = vpow2.f32 %v3546_v41  ;;  %v1890_v45 = vadd.f32 %v1886_v6, %v1880_v31  ;;  %v1891_v51 = vadd.f32 %v1887_v53, %v1881_v35  ;;  %s6686_s27 = sld [smem:[#allocation7 + $0x2]] }
 0x171   :  { %1713 = vst [vmem:[#allocation10 + $0x78] sm:$0xff] %v1709_v18  ;;  %v1896_v34 = vmul.f32 %v6046_v58, %v5858_v2  ;;  %4062 = vpow2.f32 %v3547_v23  ;;  %v1892_v3 = vadd.f32 %v1888_v60, %v1882_v14  ;;  %v1893_v1 = vadd.f32 %v1889_v59, %v1883_v52 }
 0x172   :  { %v1897_v20 = vmul.f32 %v6046_v58, %v5866_v37  ;;  %v1898_v25 = vmul.f32 %v6046_v58, %v5873_v49  ;;  %v1899_v19 = vmul.f32 %v6046_v58, %v5875_v0  ;;  %v6061_v31 = vstv %s6023_s28  ;;  %s6712_s28 = sld [smem:[#allocation4 + $0x180]] }
 0x173   :  { %v1900_v15 = vadd.f32 %v1896_v34, %v1890_v45  ;;  %v1906_v61 = vmul.f32 %v6061_v31, %v5885_v39  ;;  %v1907_v11 = vmul.f32 %v6061_v31, %v5892_v62  ;;  %v1908_v21 = vmul.f32 %v6061_v31, %v5894_v42 }
 0x174   :  { %v1901_v35 = vadd.f32 %v1897_v20, %v1891_v51  ;;  %v4055_v10 = vpop.eup %4054  ;;  %4064 = vrcp.f32 %v1785_v8  ;;  %v1902_v13 = vadd.f32 %v1898_v25, %v1892_v3  ;;  %v1903_v14 = vadd.f32 %v1899_v19, %v1893_v1 }
 0x175   :  { %v1909_v52 = vmul.f32 %v6061_v31, %v5896_v63  ;;  %v4057_v46 = vpop.eup %4056  ;;  %4066 = vrcp.f32 %v1786_v27  ;;  %v1910_v56 = vadd.f32 %v1906_v61, %v1900_v15  ;;  %v6076_v41 = vstv %s6034_s2  ;;  %s6730_s2 = sld [smem:[#allocation4 + $0x181]] }
 0x176   :  { %v1911_v48 = vadd.f32 %v1907_v11, %v1901_v35  ;;  %v4059_v26 = vpop.eup %4058  ;;  %4068 = vrcp.f32 %v1787_v54  ;;  %v1856_v8 = vadd.f32 1.0, %v4057_v46  ;;  %v1912_v23 = vadd.f32 %v1908_v21, %v1902_v13 }
 0x177   :  { %v1913_v18 = vadd.f32 %v1909_v52, %v1903_v14  ;;  %v1857_v6 = vadd.f32 1.0, %v4059_v26  ;;  %v1916_v53 = vadd.f32 %v6076_v41, %v1910_v56  ;;  %v6081_v59 = vstv %s6048_s29  ;;  %s3655_s29 = sld [smem:[#allocation4 + $0x182]] }
 0x178   :  { %v1917_v60 = vadd.f32 %v6076_v41, %v1911_v48  ;;  %v6084_v45 = vmul.f32 %v4055_v10, %v5934_v7  ;;  %4070 = vrcp.f32 %v1856_v8  ;;  %v1918_v27 = vadd.f32 %v6076_v41, %v1912_v23 }
 0x179   :  { %v1919_v51 = vadd.f32 %v6076_v41, %v1913_v18  ;;  %4072 = vrcp.f32 %v1857_v6  ;;  %v3554_v54 = vmul.f32 -1.442695, %v1916_v53  ;;  %v6089_v3 = vstv %s6054_s30  ;;  %s3656_s30 = sld [smem:[#allocation4 + $0x183]] }
 0x17a   :  { %v3555_v34 = vmul.f32 -1.442695, %v1917_v60  ;;  %7300 = vst [vmem:[#allocation14_spill] sm:$0xff] %v6089_v3  ;;  %v4061_v1 = vpop.eup %4060  ;;  %v3556_v20 = vmul.f32 -1.442695, %v1918_v27  ;;  %v1956_v19 = vmul.f32 %v6081_v59, %v5806_v29  ;;  %v1957_v15 = vmul.f32 %v6081_v59, %v5820_v17 }
 0x17b   :  { %v3557_v25 = vmul.f32 -1.442695, %v1919_v51  ;;  %v4063_v35 = vpop.eup %4062  ;;  %v1858_v61 = vadd.f32 1.0, %v4061_v1  ;;  %4074 = vpow2.f32 %v3554_v54  ;;  %v1958_v11 = vmul.f32 %v6081_v59, %v5822_v33 }
 0x17c   :  { %v1959_v21 = vmul.f32 %v6081_v59, %v5834_v12  ;;  %v1859_v10 = vadd.f32 1.0, %v4063_v35  ;;  %4076 = vpow2.f32 %v3555_v34  ;;  %v6104_v13 = vstv %s6071_s6  ;;  %s6757_s6 = sld [smem:[#allocation7 + $0x3]] }
 0x17d   :  { %v6107_v14 = vstv %s6073_s7  ;;  %4078 = vrcp.f32 %v1858_v61  ;;  %v1962_v52 = vmul.f32 %v6104_v13, %v5826_v9  ;;  %v1963_v46 = vmul.f32 %v6104_v13, %v5841_v57  ;;  %s6771_s7 = sld [smem:[#allocation4 + $0x200]] }
 0x17e   :  { %v1964_v56 = vmul.f32 %v6104_v13, %v5843_v28  ;;  %v4065_v48 = vpop.eup %4064  ;;  %4080 = vrcp.f32 %v1859_v10  ;;  %v1965_v26 = vmul.f32 %v6104_v13, %v5849_v47  ;;  %v1972_v8 = vmul.f32 %v6107_v14, %v5858_v2 }
 0x17f   :  { %v1973_v23 = vmul.f32 %v6107_v14, %v5866_v37  ;;  %v4067_v18 = vpop.eup %4066  ;;  %4082 = vpow2.f32 %v3556_v20  ;;  %v1966_v6 = vadd.f32 %v1962_v52, %v1956_v19  ;;  %v1967_v53 = vadd.f32 %v1963_v46, %v1957_v15 }
 0x180   :  { %v1968_v60 = vadd.f32 %v1964_v56, %v1958_v11  ;;  %v4069_v27 = vpop.eup %4068  ;;  %4084 = vpow2.f32 %v3557_v25  ;;  %v1969_v51 = vadd.f32 %v1965_v26, %v1959_v21  ;;  %v1974_v54 = vmul.f32 %v6107_v14, %v5873_v49 }
 0x181   :  { %v1975_v34 = vmul.f32 %v6107_v14, %v5875_v0  ;;  %v6130_v1 = vmul.f32 %v4065_v48, %v5934_v7  ;;  %v1976_v35 = vadd.f32 %v1972_v8, %v1966_v6  ;;  %v1977_v61 = vadd.f32 %v1973_v23, %v1967_v53 }
 0x182   :  { %v6133_v10 = vstv %s6091_s8  ;;  %v4071_v20 = vpop.eup %4070  ;;  %v1978_v19 = vadd.f32 %v1974_v54, %v1968_v60  ;;  %v6145_v48 = vstv %s6101_s9  ;;  %v6150_v26 = vmul.f32 %v4067_v18, %v5934_v7  ;;  %s6785_s8 = sld [smem:[#allocation9]]  ;;  %s6795_s9 = sld [smem:[#allocation4 + $0x201]] }
 0x183   :  { %7301 = vst [vmem:[#allocation19_spill] sm:$0xff] %v6133_v10  ;;  %v1979_v15 = vadd.f32 %v1975_v34, %v1969_v51  ;;  %v1982_v25 = vmul.f32 %v6133_v10, %v5885_v39  ;;  %v1983_v11 = vmul.f32 %v6133_v10, %v5892_v62  ;;  %v4073_v21 = vpop.eup %4072  ;;  %v1870_v52 = vmul.f32 %v4071_v20, %v6006_v44 }
 0x184   :  { %v1984_v46 = vmul.f32 %v6133_v10, %v5894_v42  ;;  %v1985_v56 = vmul.f32 %v6133_v10, %v5896_v63  ;;  %7302 = vst [vmem:[#allocation15_spill] sm:$0xff] %v6145_v48  ;;  %v6153_v8 = vmul.f32 %v4069_v27, %v5934_v7  ;;  %v6160_v54 = vstv %s6115_s0  ;;  %s6802_s0 = sld [smem:[#allocation4 + $0x202]] }
 0x185   :  { %v1986_v23 = vadd.f32 %v1982_v25, %v1976_v35  ;;  %v1987_v6 = vadd.f32 %v1983_v11, %v1977_v61  ;;  %v4075_v53 = vpop.eup %4074  ;;  %v6163_v34 = vstv %s6117_s10  ;;  %v1871_v18 = vmul.f32 %v4073_v21, %v6006_v44  ;;  %s6811_s10 = sld [smem:[#allocation4 + $0x203]] }
 0x186   :  { %v1988_v60 = vadd.f32 %v1984_v46, %v1978_v19  ;;  %v1989_v51 = vadd.f32 %v1985_v56, %v1979_v15  ;;  %v4077_v20 = vpop.eup %4076  ;;  %v1932_v10 = vadd.f32 1.0, %v4075_v53  ;;  %v6169_v25 = vadd.f32 %v1870_v52, %v6084_v45 }
 0x187   :  { %v1992_v27 = vadd.f32 %v6145_v48, %v1986_v23  ;;  %v1993_v35 = vadd.f32 %v6145_v48, %v1987_v6  ;;  %v4079_v61 = vpop.eup %4078  ;;  %v1933_v11 = vadd.f32 1.0, %v4077_v20  ;;  %v2032_v21 = vmul.f32 %v6163_v34, %v5806_v29 }
 0x188   :  { %v1994_v19 = vadd.f32 %v6145_v48, %v1988_v60  ;;  %v1995_v15 = vadd.f32 %v6145_v48, %v1989_v51  ;;  %v4081_v46 = vpop.eup %4080  ;;  %4086 = vrcp.f32 %v1932_v10  ;;  %v1872_v23 = vmul.f32 %v4079_v61, %v6006_v44 }
 0x189   :  { %v3564_v56 = vmul.f32 -1.442695, %v1992_v27  ;;  %v3565_v7 = vmul.f32 -1.442695, %v1993_v35  ;;  %v4083_v53 = vpop.eup %4082  ;;  %v1873_v45 = vmul.f32 %v4081_v46, %v6006_v44  ;;  %4088 = vrcp.f32 %v1933_v11 }
 0x18a   :  { %v2033_v52 = vmul.f32 %v6163_v34, %v5820_v17  ;;  %v4085_v10 = vpop.eup %4084  ;;  %v1934_v6 = vadd.f32 1.0, %v4083_v53  ;;  %v3566_v60 = vmul.f32 -1.442695, %v1994_v19  ;;  %v3567_v51 = vmul.f32 -1.442695, %v1995_v15 }
 0x18b   :  { %4090 = vpow2.f32 %v3564_v56  ;;  %v1935_v29 = vadd.f32 1.0, %v4085_v10  ;;  %v2034_v20 = vmul.f32 %v6163_v34, %v5822_v33  ;;  %v2035_v27 = vmul.f32 %v6163_v34, %v5834_v12 }
 0x18c   :  { %4092 = vpow2.f32 %v3565_v7  ;;  %v6186_v35 = vstv %s6147_s11  ;;  %v6189_v61 = vstv %s6155_s12  ;;  %v6192_v17 = vstv %s6157_s1  ;;  %s6827_s11 = sld [smem:[#allocation7 + $0x4]]  ;;  %s6829_s12 = sld [smem:[#allocation9 + $0x1]] }
 0x18d   :  { %4094 = vrcp.f32 %v1934_v6  ;;  %7303 = vst [vmem:[#allocation20_spill] sm:$0xff] %v6186_v35  ;;  %7304 = vst [vmem:[#allocation21_spill] sm:$0xff] %v6189_v61  ;;  %v2038_v11 = vmul.f32 %v6186_v35, %v5826_v9  ;;  %v2039_v7 = vmul.f32 %v6186_v35, %v5841_v57  ;;  %v2040_v33 = vmul.f32 %v6186_v35, %v5843_v28  ;;  %s6854_s1 = sld [smem:[#allocation9 + $0x2]] }
 0x18e   :  { %7305 = vst [vmem:[#allocation22_spill] sm:$0xff] %v6192_v17  ;;  %4096 = vrcp.f32 %v1935_v29  ;;  %v2041_v12 = vmul.f32 %v6186_v35, %v5849_v47  ;;  %v2048_v19 = vmul.f32 %v6189_v61, %v5858_v2  ;;  %v2049_v15 = vmul.f32 %v6189_v61, %v5866_v37 }
 0x18f   :  { %4098 = vpow2.f32 %v3566_v60  ;;  %v2042_v9 = vadd.f32 %v2038_v11, %v2032_v21  ;;  %v2043_v46 = vadd.f32 %v2039_v7, %v2033_v52  ;;  %v2044_v57 = vadd.f32 %v2040_v33, %v2034_v20  ;;  %v6233_v33 = vld [vmem:[#allocation3 + $0xa0] sm:$0xff] }
 0x190   :  { %4100 = vpow2.f32 %v3567_v51  ;;  %v2045_v56 = vadd.f32 %v2041_v12, %v2035_v27  ;;  %v2050_v28 = vmul.f32 %v6189_v61, %v5873_v49  ;;  %v2051_v53 = vmul.f32 %v6189_v61, %v5875_v0 }
 0x191   :  { %v2058_v47 = vmul.f32 %v6192_v17, %v5885_v39  ;;  %v2052_v10 = vadd.f32 %v2048_v19, %v2042_v9  ;;  %v2053_v2 = vadd.f32 %v2049_v15, %v2043_v46  ;;  %v2059_v37 = vmul.f32 %v6192_v17, %v5892_v62  ;;  %v6245_v46 = vld [vmem:[#allocation3 + $0xa8] sm:$0xff] }
 0x192   :  { %v2060_v21 = vmul.f32 %v6192_v17, %v5894_v42  ;;  %v4087_v52 = vpop.eup %4086  ;;  %v2054_v6 = vadd.f32 %v2050_v28, %v2044_v57  ;;  %v2055_v60 = vadd.f32 %v2051_v53, %v2045_v56  ;;  %v2061_v49 = vmul.f32 %v6192_v17, %v5896_v63  ;;  %v6247_v53 = vld [vmem:[#allocation3 + $0xb0] sm:$0xff] }
 0x193   :  { %v6221_v51 = vstv %s6179_s3  ;;  %v4089_v0 = vpop.eup %4088  ;;  %v6224_v39 = vadd.f32 %v1871_v18, %v6130_v1  ;;  %v6227_v29 = vadd.f32 %v1872_v23, %v6150_v26  ;;  %v2062_v62 = vadd.f32 %v2058_v47, %v2052_v10  ;;  %s6938_s3 = sld [smem:[#allocation9 + $0x3]] }
 0x194   :  { %7306 = vst [vmem:[#allocation18_spill] sm:$0xff] %v6221_v51  ;;  %v2063_v20 = vadd.f32 %v2059_v37, %v2053_v2  ;;  %v6230_v42 = vadd.f32 %v1873_v45, %v6153_v8  ;;  %v1946_v11 = vmul.f32 %v4087_v52, %v6089_v3  ;;  %v2064_v7 = vadd.f32 %v2060_v21, %v2054_v6  ;;  %v6256_v52 = vld [vmem:[#allocation3 + $0xb8] sm:$0xff]  ;;  %v6258_v6 = vld [vmem:[#allocation3 + $0x1a0] sm:$0xff] }
 0x195   :  { %v4091_v27 = vpop.eup %4090  ;;  %v2065_v63 = vadd.f32 %v2061_v49, %v2055_v60  ;;  %v2068_v1 = vadd.f32 %v6221_v51, %v2062_v62  ;;  %v6238_v26 = vstv %s6200_s13  ;;  %v6241_v15 = vmul.f32 %v4089_v0, %v6089_v3  ;;  %v6260_v60 = vld [vmem:[#allocation3 + $0x1a8] sm:$0xff]  ;;  %s6944_s13 = sld [smem:[#allocation9 + $0x4]] }
 0x196   :  { %v4093_v12 = vpop.eup %4092  ;;  %v2008_v19 = vadd.f32 1.0, %v4091_v27  ;;  %v2069_v18 = vadd.f32 %v6221_v51, %v2063_v20  ;;  %v2070_v45 = vadd.f32 %v6221_v51, %v2064_v7  ;;  %v2134_v47 = vmul.f32 %v6233_v33, %v5816_v5  ;;  %v6262_v20 = vld [vmem:[#allocation3 + $0x1b0] sm:$0xff]  ;;  %v6264_v27 = vld [vmem:[#allocation3 + $0x1b8] sm:$0xff]  ;;  %v6266_v7 = vld [vmem:[#allocation3 + $0x2a0] sm:$0xff] }
 0x197   :  { %v4095_v23 = vpop.eup %4094  ;;  %v2009_v8 = vadd.f32 1.0, %v4093_v12  ;;  %v2071_v9 = vadd.f32 %v6221_v51, %v2065_v63  ;;  %v3574_v56 = vmul.f32 -1.442695, %v2068_v1  ;;  %v6254_v21 = vadd.f32 %v1946_v11, %v6169_v25  ;;  %v6270_v12 = vld [vmem:[#allocation3 + $0x2a8] sm:$0xff]  ;;  %v6274_v1 = vld [vmem:[#allocation3 + $0x2b0] sm:$0xff] }
 0x198   :  { %v4097_v57 = vpop.eup %4096  ;;  %4102 = vrcp.f32 %v2008_v19  ;;  %v3575_v28 = vmul.f32 -1.442695, %v2069_v18  ;;  %v1948_v2 = vmul.f32 %v4095_v23, %v6089_v3  ;;  %v3576_v62 = vmul.f32 -1.442695, %v2070_v45  ;;  %v6282_v45 = vld [vmem:[#allocation3 + $0x2b8] sm:$0xff] }
 0x199   :  { %v4099_v10 = vpop.eup %4098  ;;  %v1949_v37 = vmul.f32 %v4097_v57, %v6089_v3  ;;  %4104 = vrcp.f32 %v2009_v8  ;;  %v2135_v25 = vmul.f32 %v6245_v46, %v5816_v5  ;;  %v3577_v63 = vmul.f32 -1.442695, %v2071_v9  ;;  %v6284_v9 = vld [vmem:[#allocation3 + $0x3a0] sm:$0xff] }
 0x19a   :  { %v4101_v49 = vpop.eup %4100  ;;  %v2010_v0 = vadd.f32 1.0, %v4099_v10  ;;  %4106 = vpow2.f32 %v3574_v56  ;;  %v2136_v19 = vmul.f32 %v6247_v53, %v5816_v5  ;;  %v2137_v18 = vmul.f32 %v6256_v52, %v5816_v5  ;;  %v6294_v10 = vld [vmem:[#allocation3 + $0x3b0] sm:$0xff] }
 0x19b   :  { %v2011_v11 = vadd.f32 1.0, %v4101_v49  ;;  %4108 = vpow2.f32 %v3575_v28  ;;  %v2140_v23 = vmul.f32 %v6258_v6, %v5837_v16  ;;  %v2141_v8 = vmul.f32 %v6260_v60, %v5837_v16  ;;  %v6292_v28 = vld [vmem:[#allocation3 + $0x3a8] sm:$0xff]  ;;  %v6296_v49 = vld [vmem:[#allocation3 + $0x3b8] sm:$0xff] }
 0x19c   :  { %4110 = vrcp.f32 %v2010_v0  ;;  %v2142_v57 = vmul.f32 %v6262_v20, %v5837_v16  ;;  %v2143_v56 = vmul.f32 %v6264_v27, %v5837_v16  ;;  %v2150_v5 = vmul.f32 %v6266_v7, %v5878_v55 }
 0x19d   :  { %4112 = vrcp.f32 %v2011_v11  ;;  %v2144_v0 = vadd.f32 %v2140_v23, %v2134_v47  ;;  %v2145_v11 = vadd.f32 %v2141_v8, %v2135_v25  ;;  %v2151_v3 = vmul.f32 %v6270_v12, %v5878_v55 }
 0x19e   :  { %4114 = vpow2.f32 %v3576_v62  ;;  %v2146_v51 = vadd.f32 %v2142_v57, %v2136_v19  ;;  %v2147_v17 = vadd.f32 %v2143_v56, %v2137_v18  ;;  %v2152_v16 = vmul.f32 %v6274_v1, %v5878_v55 }
 0x19f   :  { %4116 = vpow2.f32 %v3577_v63  ;;  %v2153_v62 = vmul.f32 %v6282_v45, %v5878_v55  ;;  %v2154_v61 = vadd.f32 %v2150_v5, %v2144_v0  ;;  %v2155_v44 = vadd.f32 %v2151_v3, %v2145_v11 }
 0x1a0   :  { %v2160_v35 = vmul.f32 %v6284_v9, %v5907_v36  ;;  %v2156_v48 = vadd.f32 %v2152_v16, %v2146_v51  ;;  %v2161_v47 = vmul.f32 %v6292_v28, %v5907_v36  ;;  %v2162_v25 = vmul.f32 %v6294_v10, %v5907_v36 }
 0x1a1   :  { %v2163_v63 = vmul.f32 %v6296_v49, %v5907_v36  ;;  %v1951_v18 = vadd.f32 %v6241_v15, %v6224_v39  ;;  %v1952_v55 = vadd.f32 %v1948_v2, %v6227_v29  ;;  %v2157_v3 = vadd.f32 %v2153_v62, %v2147_v17 }
 0x1a2   :  { %v4103_v19 = vpop.eup %4102  ;;  %v2164_v23 = vadd.f32 %v2160_v35, %v2154_v61  ;;  %v1953_v51 = vadd.f32 %v1949_v37, %v6230_v42  ;;  %v2165_v56 = vadd.f32 %v2161_v47, %v2155_v44  ;;  %v2166_v5 = vadd.f32 %v2162_v25, %v2156_v48 }
 0x1a3   :  { %v4105_v8 = vpop.eup %4104  ;;  %v2022_v57 = vmul.f32 %v4103_v19, %v6160_v54  ;;  %v2167_v16 = vadd.f32 %v2163_v63, %v2157_v3  ;;  %v2206_v39 = vmul.f32 %v6233_v33, %v5925_v43  ;;  %v2207_v17 = vmul.f32 %v6245_v46, %v5925_v43 }
 0x1a4   :  { %v4107_v0 = vpop.eup %4106  ;;  %v2023_v11 = vmul.f32 %v4105_v8, %v6160_v54  ;;  %v2170_v36 = vadd.f32 %v2164_v23, %v5922_v40  ;;  %v2171_v35 = vadd.f32 %v2165_v56, %v5922_v40  ;;  %v2172_v61 = vadd.f32 %v2166_v5, %v5922_v40 }
 0x1a5   :  { %v4109_v15 = vpop.eup %4108  ;;  %v2084_v29 = vadd.f32 1.0, %v4107_v0  ;;  %v2208_v2 = vmul.f32 %v6247_v53, %v5925_v43  ;;  %v2209_v37 = vmul.f32 %v6256_v52, %v5925_v43  ;;  %v2026_v47 = vadd.f32 %v2022_v57, %v6254_v21 }
 0x1a6   :  { %v4111_v44 = vpop.eup %4110  ;;  %v2085_v48 = vadd.f32 1.0, %v4109_v15  ;;  %v3582_v42 = vmul.f32 -1.442695, %v2170_v36  ;;  %v2027_v25 = vadd.f32 %v2023_v11, %v1951_v18  ;;  %v3583_v63 = vmul.f32 -1.442695, %v2171_v35 }
 0x1a7   :  { %v4113_v62 = vpop.eup %4112  ;;  %4118 = vrcp.f32 %v2084_v29  ;;  %v2024_v3 = vmul.f32 %v4111_v44, %v6160_v54  ;;  %v2173_v23 = vadd.f32 %v2167_v16, %v5922_v40  ;;  %v2212_v8 = vmul.f32 %v6258_v6, %v5937_v22 }
 0x1a8   :  { %v4115_v19 = vpop.eup %4114  ;;  %4120 = vrcp.f32 %v2085_v48  ;;  %v3584_v0 = vmul.f32 -1.442695, %v2172_v61  ;;  %v2213_v43 = vmul.f32 %v6260_v60, %v5937_v22  ;;  %v2025_v21 = vmul.f32 %v4113_v62, %v6160_v54 }
 0x1a9   :  { %v4117_v56 = vpop.eup %4116  ;;  %v2086_v5 = vadd.f32 1.0, %v4115_v19  ;;  %4122 = vpow2.f32 %v3582_v42  ;;  %v2214_v57 = vmul.f32 %v6262_v20, %v5937_v22  ;;  %v2215_v40 = vmul.f32 %v6264_v27, %v5937_v22 }
 0x1aa   :  { %v2087_v18 = vadd.f32 1.0, %v4117_v56  ;;  %4124 = vpow2.f32 %v3583_v63  ;;  %v2216_v11 = vadd.f32 %v2212_v8, %v2206_v39  ;;  %v2217_v16 = vadd.f32 %v2213_v43, %v2207_v17 }
 0x1ab   :  { %4126 = vrcp.f32 %v2086_v5  ;;  %v2218_v36 = vadd.f32 %v2214_v57, %v2208_v2  ;;  %v2222_v15 = vmul.f32 %v6266_v7, %v5970_v30  ;;  %v2223_v29 = vmul.f32 %v6270_v12, %v5970_v30 }
 0x1ac   :  { %4128 = vrcp.f32 %v2087_v18  ;;  %v3585_v35 = vmul.f32 -1.442695, %v2173_v23  ;;  %v2219_v61 = vadd.f32 %v2215_v40, %v2209_v37  ;;  %v2224_v44 = vmul.f32 %v6274_v1, %v5970_v30 }
 0x1ad   :  { %v2225_v48 = vmul.f32 %v6282_v45, %v5970_v30  ;;  %4130 = vpow2.f32 %v3584_v0  ;;  %v2226_v22 = vadd.f32 %v2222_v15, %v2216_v11  ;;  %v2227_v39 = vadd.f32 %v2223_v29, %v2217_v16 }
 0x1ae   :  { %v2232_v17 = vmul.f32 %v6284_v9, %v5984_v4  ;;  %v2228_v42 = vadd.f32 %v2224_v44, %v2218_v36  ;;  %v2233_v62 = vmul.f32 %v6292_v28, %v5984_v4  ;;  %v2234_v37 = vmul.f32 %v6294_v10, %v5984_v4 }
 0x1af   :  { %v2229_v2 = vadd.f32 %v2225_v48, %v2219_v61  ;;  %v2028_v63 = vadd.f32 %v2024_v3, %v1952_v55  ;;  %v2029_v19 = vadd.f32 %v2025_v21, %v1953_v51  ;;  %v2235_v23 = vmul.f32 %v6296_v49, %v5984_v4 }
 0x1b0   :  { %v2236_v30 = vadd.f32 %v2232_v17, %v2226_v22  ;;  %4132 = vpow2.f32 %v3585_v35  ;;  %v2237_v56 = vadd.f32 %v2233_v62, %v2227_v39  ;;  %v2238_v5 = vadd.f32 %v2234_v37, %v2228_v42 }
 0x1b1   :  { %v4119_v8 = vpop.eup %4118  ;;  %v2282_v0 = vmul.f32 %v6233_v33, %v5998_v38  ;;  %v2239_v57 = vadd.f32 %v2235_v23, %v2229_v2  ;;  %v2283_v55 = vmul.f32 %v6245_v46, %v5998_v38  ;;  %v2284_v21 = vmul.f32 %v6247_v53, %v5998_v38 }
 0x1b2   :  { %v4121_v43 = vpop.eup %4120  ;;  %v2098_v18 = vmul.f32 %v4119_v8, %v6238_v26  ;;  %v2242_v40 = vadd.f32 %v2236_v30, %v5995_v50  ;;  %v2243_v3 = vadd.f32 %v2237_v56, %v5995_v50  ;;  %v2285_v11 = vmul.f32 %v6256_v52, %v5998_v38 }
 0x1b3   :  { %v4123_v51 = vpop.eup %4122  ;;  %v2099_v4 = vmul.f32 %v4121_v43, %v6238_v26  ;;  %v2244_v29 = vadd.f32 %v2238_v5, %v5995_v50  ;;  %v2245_v48 = vadd.f32 %v2239_v57, %v5995_v50  ;;  %v2288_v39 = vmul.f32 %v6258_v6, %v6032_v32 }
 0x1b4   :  { %v4125_v16 = vpop.eup %4124  ;;  %v2102_v36 = vadd.f32 %v2098_v18, %v2026_v47  ;;  %v2186_v15 = vadd.f32 1.0, %v4123_v51  ;;  %v3591_v35 = vmul.f32 -1.442695, %v2242_v40  ;;  %v3592_v22 = vmul.f32 -1.442695, %v2243_v3 }
 0x1b5   :  { %v4127_v61 = vpop.eup %4126  ;;  %v2103_v44 = vadd.f32 %v2099_v4, %v2027_v25  ;;  %v2187_v38 = vadd.f32 1.0, %v4125_v16  ;;  %v2289_v47 = vmul.f32 %v6260_v60, %v6032_v32  ;;  %v2290_v50 = vmul.f32 %v6262_v20, %v6032_v32 }
 0x1b6   :  { %v4129_v17 = vpop.eup %4128  ;;  %v2100_v42 = vmul.f32 %v4127_v61, %v6238_v26  ;;  %v2108_v2 = vadd.f32 %v2102_v36, %v4542_v24  ;;  %4134 = vrcp.f32 %v2186_v15  ;;  %v3593_v30 = vmul.f32 -1.442695, %v2244_v29 }
 0x1b7   :  { %v2101_v62 = vmul.f32 %v4129_v17, %v6238_v26  ;;  %v2109_v37 = vadd.f32 %v2103_v44, %v4542_v24  ;;  %v4131_v25 = vpop.eup %4130  ;;  %4136 = vpow2.f32 %v3591_v35  ;;  %v2291_v8 = vmul.f32 %v6264_v27, %v6032_v32 }
 0x1b8   :  { %v2104_v23 = vadd.f32 %v2100_v42, %v2028_v63  ;;  %2112 = vst [vmem:[#allocation10 + $0x80] sm:$0xff] %v2108_v2  ;;  %4138 = vpow2.f32 %v3592_v22  ;;  %v3594_v5 = vmul.f32 -1.442695, %v2245_v48  ;;  %v2292_v43 = vadd.f32 %v2288_v39, %v2282_v0 }
 0x1b9   :  { %v2105_v56 = vadd.f32 %v2101_v62, %v2029_v19  ;;  %2113 = vst [vmem:[#allocation10 + $0x88] sm:$0xff] %v2109_v37  ;;  %4140 = vrcp.f32 %v2187_v38  ;;  %v2293_v57 = vadd.f32 %v2289_v47, %v2283_v55  ;;  %v2294_v40 = vadd.f32 %v2290_v50, %v2284_v21 }
 0x1ba   :  { %v2110_v18 = vadd.f32 %v2104_v23, %v4542_v24  ;;  %v4133_v51 = vpop.eup %4132  ;;  %v2188_v63 = vadd.f32 1.0, %v4131_v25  ;;  %v2295_v3 = vadd.f32 %v2291_v8, %v2285_v11  ;;  %v2298_v16 = vmul.f32 %v6266_v7, %v6046_v58 }
 0x1bb   :  { %v2111_v4 = vadd.f32 %v2105_v56, %v4542_v24  ;;  %4142 = vpow2.f32 %v3593_v30  ;;  %v2299_v32 = vmul.f32 %v6270_v12, %v6046_v58  ;;  %v2300_v19 = vmul.f32 %v6274_v1, %v6046_v58 }
 0x1bc   :  { %2114 = vst [vmem:[#allocation10 + $0x90] sm:$0xff] %v2110_v18  ;;  %v2301_v0 = vmul.f32 %v6282_v45, %v6046_v58  ;;  %4144 = vpow2.f32 %v3594_v5  ;;  %v2302_v55 = vadd.f32 %v2298_v16, %v2292_v43  ;;  %v2308_v21 = vmul.f32 %v6284_v9, %v6061_v31 }
 0x1bd   :  { %2115 = vst [vmem:[#allocation10 + $0x98] sm:$0xff] %v2111_v4  ;;  %v2309_v11 = vmul.f32 %v6292_v28, %v6061_v31  ;;  %v2303_v36 = vadd.f32 %v2299_v32, %v2293_v57  ;;  %v2304_v15 = vadd.f32 %v2300_v19, %v2294_v40  ;;  %v2310_v35 = vmul.f32 %v6294_v10, %v6061_v31 }
 0x1be   :  { %v2305_v29 = vadd.f32 %v2301_v0, %v2295_v3  ;;  %v2189_v61 = vadd.f32 1.0, %v4133_v51  ;;  %4146 = vrcp.f32 %v2188_v63  ;;  %v2311_v58 = vmul.f32 %v6296_v49, %v6061_v31 }
 0x1bf   :  { %v2312_v44 = vadd.f32 %v2308_v21, %v2302_v55  ;;  %v2313_v48 = vadd.f32 %v2309_v11, %v2303_v36  ;;  %v2314_v22 = vadd.f32 %v2310_v35, %v2304_v15  ;;  %v2358_v39 = vmul.f32 %v6233_v33, %v6081_v59  ;;  %v7307_v35 = vld [vmem:[#allocation19_spill] sm:$0xff] }
 0x1c0   :  { %v2359_v17 = vmul.f32 %v6245_v46, %v6081_v59  ;;  %v6405_v42 = vpop.eup %4134  ;;  %v2315_v2 = vadd.f32 %v2311_v58, %v2305_v29  ;;  %v2360_v47 = vmul.f32 %v6247_v53, %v6081_v59  ;;  %v2364_v31 = vmul.f32 %v6258_v6, %v6104_v13 }
 0x1c1   :  { %v2318_v38 = vadd.f32 %v2312_v44, %v6076_v41  ;;  %v4137_v62 = vpop.eup %4136  ;;  %v2319_v37 = vadd.f32 %v2313_v48, %v6076_v41  ;;  %v2320_v50 = vadd.f32 %v2314_v22, %v6076_v41  ;;  %v2361_v25 = vmul.f32 %v6256_v52, %v6081_v59 }
 0x1c2   :  { %v2365_v23 = vmul.f32 %v6260_v60, %v6104_v13  ;;  %v4139_v30 = vpop.eup %4138  ;;  %v2258_v8 = vadd.f32 1.0, %v4137_v62  ;;  %v2321_v56 = vadd.f32 %v2315_v2, %v6076_v41  ;;  %v2366_v43 = vmul.f32 %v6262_v20, %v6104_v13 }
 0x1c3   :  { %v3601_v5 = vmul.f32 -1.442695, %v2318_v38  ;;  %v4141_v18 = vpop.eup %4140  ;;  %4148 = vrcp.f32 %v2189_v61  ;;  %v2259_v57 = vadd.f32 1.0, %v4139_v30  ;;  %v3602_v40 = vmul.f32 -1.442695, %v2319_v37 }
 0x1c4   :  { %v2367_v51 = vmul.f32 %v6264_v27, %v6104_v13  ;;  %4150 = vrcp.f32 %v2258_v8  ;;  %v3603_v59 = vmul.f32 -1.442695, %v2320_v50  ;;  %v2368_v4 = vadd.f32 %v2364_v31, %v2358_v39  ;;  %v7308_v50 = vld [vmem:[#allocation15_spill] sm:$0xff] }
 0x1c5   :  { %v4143_v63 = vpop.eup %4142  ;;  %4152 = vrcp.f32 %v2259_v57  ;;  %v3604_v3 = vmul.f32 -1.442695, %v2321_v56  ;;  %v2369_v16 = vadd.f32 %v2365_v23, %v2359_v17  ;;  %v2370_v32 = vadd.f32 %v2366_v43, %v2360_v47 }
 0x1c6   :  { %v4145_v41 = vpop.eup %4144  ;;  %v2260_v19 = vadd.f32 1.0, %v4143_v63  ;;  %4154 = vpow2.f32 %v3601_v5  ;;  %v2371_v0 = vadd.f32 %v2367_v51, %v2361_v25  ;;  %v2374_v55 = vmul.f32 %v6266_v7, %v6107_v14 }
 0x1c7   :  { %v2261_v21 = vadd.f32 1.0, %v4145_v41  ;;  %4156 = vpow2.f32 %v3602_v40  ;;  %v2375_v13 = vmul.f32 %v6270_v12, %v6107_v14  ;;  %v2376_v11 = vmul.f32 %v6274_v1, %v6107_v14 }
 0x1c8   :  { %v4147_v36 = vpop.eup %4146  ;;  %4158 = vrcp.f32 %v2260_v19  ;;  %v2377_v15 = vmul.f32 %v6282_v45, %v6107_v14  ;;  %v2378_v29 = vadd.f32 %v2374_v55, %v2368_v4  ;;  %v2384_v61 = vmul.f32 %v6284_v9, %v7307_v35  ;;  %v7310_v4 = vld [vmem:[#allocation17_spill] sm:$0xff] }
 0x1c9   :  { %4160 = vrcp.f32 %v2261_v21  ;;  %v2379_v58 = vadd.f32 %v2375_v13, %v2369_v16  ;;  %v2380_v44 = vadd.f32 %v2376_v11, %v2370_v32  ;;  %v2385_v48 = vmul.f32 %v6292_v28, %v7307_v35  ;;  %v7311_v16 = vld [vmem:[#allocation16_spill] sm:$0xff]  ;;  %v7312_v11 = vld [vmem:[#allocation21_spill] sm:$0xff] }
 0x1ca   :  { %4162 = vpow2.f32 %v3603_v59  ;;  %v2381_v22 = vadd.f32 %v2377_v15, %v2371_v0  ;;  %v2386_v39 = vmul.f32 %v6294_v10, %v7307_v35  ;;  %v2387_v17 = vmul.f32 %v6296_v49, %v7307_v35 }
 0x1cb   :  { %4164 = vpow2.f32 %v3604_v3  ;;  %v2388_v14 = vadd.f32 %v2384_v61, %v2378_v29  ;;  %v2389_v2 = vadd.f32 %v2385_v48, %v2379_v58  ;;  %v2434_v31 = vmul.f32 %v6233_v33, %v6163_v34  ;;  %v7309_v33 = vld [vmem:[#allocation20_spill] sm:$0xff] }
 0x1cc   :  { %v2390_v38 = vadd.f32 %v2386_v39, %v2380_v44  ;;  %v2391_v47 = vadd.f32 %v2387_v17, %v2381_v22  ;;  %v2435_v62 = vmul.f32 %v6245_v46, %v6163_v34  ;;  %v2436_v30 = vmul.f32 %v6247_v53, %v6163_v34 }
 0x1cd   :  { %v4149_v37 = vpop.eup %4148  ;;  %v2394_v25 = vadd.f32 %v2388_v14, %v7308_v50  ;;  %v2395_v23 = vadd.f32 %v2389_v2, %v7308_v50  ;;  %v2437_v8 = vmul.f32 %v6256_v52, %v6163_v34  ;;  %v2440_v57 = vmul.f32 %v6258_v6, %v7309_v33 }
 0x1ce   :  { %v4151_v56 = vpop.eup %4150  ;;  %v2396_v5 = vadd.f32 %v2390_v38, %v7308_v50  ;;  %v2397_v43 = vadd.f32 %v2391_v47, %v7308_v50  ;;  %v2441_v46 = vmul.f32 %v6260_v60, %v7309_v33  ;;  %v2442_v53 = vmul.f32 %v6262_v20, %v7309_v33 }
 0x1cf   :  { %v4153_v40 = vpop.eup %4152  ;;  %v3611_v51 = vmul.f32 -1.442695, %v2394_v25  ;;  %v3612_v59 = vmul.f32 -1.442695, %v2395_v23  ;;  %v2443_v34 = vmul.f32 %v6264_v27, %v7309_v33  ;;  %v2200_v63 = vmul.f32 %v6405_v42, %v7310_v4 }
 0x1d0   :  { %v4155_v52 = vpop.eup %4154  ;;  %v2201_v3 = vmul.f32 %v4141_v18, %v7310_v4  ;;  %v2202_v6 = vmul.f32 %v4147_v36, %v7310_v4  ;;  %v2272_v32 = vmul.f32 %v4151_v56, %v7311_v16  ;;  %v3613_v19 = vmul.f32 -1.442695, %v2396_v5  ;;  %v6503_v56 = vld [vmem:[#allocation3 + $0x1c0] sm:$0xff] }
 0x1d1   :  { %v4157_v60 = vpop.eup %4156  ;;  %v2334_v41 = vadd.f32 1.0, %v4155_v52  ;;  %4166 = vpow2.f32 %v3611_v51  ;;  %v3614_v20 = vmul.f32 -1.442695, %v2397_v43  ;;  %v2444_v27 = vadd.f32 %v2440_v57, %v2434_v31  ;;  %v6510_v57 = vld [vmem:[#allocation3 + $0x1c8] sm:$0xff]  ;;  %v7314_v51 = vld [vmem:[#allocation18_spill] sm:$0xff]  ;;  %v6517_v52 = vld [vmem:[#allocation3 + $0xd0] sm:$0xff] }
 0x1d2   :  { %v4159_v0 = vpop.eup %4158  ;;  %v2335_v55 = vadd.f32 1.0, %v4157_v60  ;;  %4168 = vpow2.f32 %v3612_v59  ;;  %v2445_v21 = vadd.f32 %v2441_v46, %v2435_v62  ;;  %v2446_v18 = vadd.f32 %v2442_v53, %v2436_v30  ;;  %v6489_v62 = vld [vmem:[#allocation3 + $0xc0] sm:$0xff] }
 0x1d3   :  { %v4161_v42 = vpop.eup %4160  ;;  %4170 = vrcp.f32 %v2334_v41  ;;  %v2447_v13 = vadd.f32 %v2443_v34, %v2437_v8  ;;  %v2450_v36 = vmul.f32 %v6266_v7, %v7312_v11  ;;  %v6471_v29 = vmul.f32 %v4149_v37, %v7310_v4  ;;  %v6519_v4 = vld [vmem:[#allocation3 + $0xd8] sm:$0xff] }
 0x1d4   :  { %v4163_v15 = vpop.eup %4162  ;;  %4172 = vrcp.f32 %v2335_v55  ;;  %v2451_v35 = vmul.f32 %v6270_v12, %v7312_v11  ;;  %v2452_v61 = vmul.f32 %v6274_v1, %v7312_v11  ;;  %v2273_v44 = vmul.f32 %v4153_v40, %v7311_v16  ;;  %v7313_v1 = vld [vmem:[#allocation22_spill] sm:$0xff] }
 0x1d5   :  { %v4165_v58 = vpop.eup %4164  ;;  %v2336_v48 = vadd.f32 1.0, %v4163_v15  ;;  %4174 = vpow2.f32 %v3613_v19  ;;  %v2453_v22 = vmul.f32 %v6282_v45, %v7312_v11  ;;  %v2274_v7 = vmul.f32 %v4159_v0, %v7311_v16 }
 0x1d6   :  { %v6481_v39 = vadd.f32 %v2272_v32, %v2200_v63  ;;  %4176 = vpow2.f32 %v3614_v20  ;;  %v2454_v17 = vadd.f32 %v2450_v36, %v2444_v27  ;;  %v2337_v14 = vadd.f32 1.0, %v4165_v58  ;;  %v6524_v32 = vld [vmem:[#allocation3 + $0x1d8] sm:$0xff]  ;;  %v6543_v58 = vld [vmem:[#allocation3 + $0x2c0] sm:$0xff] }
 0x1d7   :  { %v2455_v12 = vadd.f32 %v2451_v35, %v2445_v21  ;;  %v2456_v2 = vadd.f32 %v2452_v61, %v2446_v18  ;;  %v2457_v38 = vadd.f32 %v2453_v22, %v2447_v13  ;;  %4178 = vrcp.f32 %v2336_v48  ;;  %v7315_v21 = vld [vmem:[#allocation14_spill] sm:$0xff] }
 0x1d8   :  { %v2460_v47 = vmul.f32 %v6284_v9, %v7313_v1  ;;  %v2461_v31 = vmul.f32 %v6292_v28, %v7313_v1  ;;  %v2462_v45 = vmul.f32 %v6294_v10, %v7313_v1  ;;  %v2275_v37 = vmul.f32 %v4161_v42, %v7311_v16  ;;  %v6501_v28 = vld [vmem:[#allocation3 + $0xc8] sm:$0xff]  ;;  %v6522_v16 = vld [vmem:[#allocation3 + $0x1d0] sm:$0xff] }
 0x1d9   :  { %v6492_v50 = vadd.f32 %v2273_v44, %v2201_v3  ;;  %v2463_v25 = vmul.f32 %v6296_v49, %v7313_v1  ;;  %v6497_v23 = vstv %s6464_s14  ;;  %v6506_v10 = vstv %s6466_s15  ;;  %v6545_v44 = vld [vmem:[#allocation3 + $0x2c8] sm:$0xff] }
 0x1da   :  { %v2464_v9 = vadd.f32 %v2460_v47, %v2454_v17  ;;  %v2465_v30 = vadd.f32 %v2461_v31, %v2455_v12  ;;  %v2466_v8 = vadd.f32 %v2462_v45, %v2456_v2  ;;  %v6508_v43 = vadd.f32 %v2274_v7, %v2202_v6  ;;  %v6556_v12 = vld [vmem:[#allocation3 + $0x2d8] sm:$0xff] }
 0x1db   :  { %v4167_v5 = vpop.eup %4166  ;;  %4180 = vrcp.f32 %v2337_v14  ;;  %v2467_v33 = vadd.f32 %v2463_v25, %v2457_v38  ;;  %v2536_v49 = vmul.f32 %v6497_v23, %v6489_v62  ;;  %v2537_v60 = vmul.f32 %v6497_v23, %v6501_v28  ;;  %v6554_v14 = vld [vmem:[#allocation3 + $0x2d0] sm:$0xff] }
 0x1dc   :  { %v4169_v46 = vpop.eup %4168  ;;  %v2410_v40 = vadd.f32 1.0, %v4167_v5  ;;  %v2470_v59 = vadd.f32 %v2464_v9, %v7314_v51  ;;  %v2471_v53 = vadd.f32 %v2465_v30, %v7314_v51  ;;  %v2472_v34 = vadd.f32 %v2466_v8, %v7314_v51  ;;  %v6561_v9 = vld [vmem:[#allocation3 + $0x3c0] sm:$0xff]  ;;  %v6563_v30 = vld [vmem:[#allocation3 + $0x3c8] sm:$0xff] }
 0x1dd   :  { %v4171_v63 = vpop.eup %4170  ;;  %v2411_v3 = vadd.f32 1.0, %v4169_v46  ;;  %v2473_v6 = vadd.f32 %v2467_v33, %v7314_v51  ;;  %v2542_v41 = vmul.f32 %v6506_v10, %v6503_v56  ;;  %v2543_v55 = vmul.f32 %v6506_v10, %v6510_v57 }
 0x1de   :  { %v4173_v19 = vpop.eup %4172  ;;  %4182 = vrcp.f32 %v2410_v40  ;;  %v3621_v20 = vmul.f32 -1.442695, %v2470_v59  ;;  %v3622_v0 = vmul.f32 -1.442695, %v2471_v53  ;;  %v2348_v42 = vmul.f32 %v4171_v63, %v7315_v21 }
 0x1df   :  { %v4175_v27 = vpop.eup %4174  ;;  %4184 = vrcp.f32 %v2411_v3  ;;  %v2538_v18 = vmul.f32 %v6497_v23, %v6517_v52  ;;  %v2539_v13 = vmul.f32 %v6497_v23, %v6519_v4  ;;  %v3623_v15 = vmul.f32 -1.442695, %v2472_v34 }
 0x1e0   :  { %v4177_v11 = vpop.eup %4176  ;;  %v2412_v36 = vadd.f32 1.0, %v4175_v27  ;;  %4186 = vpow2.f32 %v3621_v20  ;;  %v2544_v35 = vmul.f32 %v6506_v10, %v6522_v16  ;;  %v3624_v61 = vmul.f32 -1.442695, %v2473_v6 }
 0x1e1   :  { %4188 = vpow2.f32 %v3622_v0  ;;  %v2545_v48 = vmul.f32 %v6506_v10, %v6524_v32  ;;  %v6550_v22 = vstv %s6499_s16  ;;  %v4179_v7 = vpop.eup %4178  ;;  %v2413_v17 = vadd.f32 1.0, %v4177_v11 }
 0x1e2   :  { %4190 = vrcp.f32 %v2412_v36  ;;  %v2546_v2 = vadd.f32 %v2542_v41, %v2536_v49  ;;  %v2547_v38 = vadd.f32 %v2543_v55, %v2537_v60  ;;  %v2279_v1 = vadd.f32 %v2275_v37, %v6471_v29  ;;  %v6570_v37 = vld [vmem:[#allocation3 + $0x3d0] sm:$0xff] }
 0x1e3   :  { %v2349_v47 = vmul.f32 %v4173_v19, %v7315_v21  ;;  %v2548_v31 = vadd.f32 %v2544_v35, %v2538_v18  ;;  %v2549_v45 = vadd.f32 %v2545_v48, %v2539_v13  ;;  %v2352_v25 = vadd.f32 %v2348_v42, %v6481_v39  ;;  %v6572_v39 = vld [vmem:[#allocation3 + $0x3d8] sm:$0xff] }
 0x1e4   :  { %4192 = vpow2.f32 %v3623_v15  ;;  %v2552_v8 = vmul.f32 %v6550_v22, %v6543_v58  ;;  %v2553_v5 = vmul.f32 %v6550_v22, %v6545_v44  ;;  %v2350_v29 = vmul.f32 %v4179_v7, %v7315_v21 }
 0x1e5   :  { %v4181_v33 = vpop.eup %4180  ;;  %4194 = vpow2.f32 %v3624_v61  ;;  %v2554_v49 = vmul.f32 %v6550_v22, %v6554_v14  ;;  %v2555_v46 = vmul.f32 %v6550_v22, %v6556_v12  ;;  %v6579_v59 = vstv %s6532_s17 }
 0x1e6   :  { %4196 = vrcp.f32 %v2413_v17  ;;  %v2556_v40 = vadd.f32 %v2552_v8, %v2546_v2  ;;  %v2557_v51 = vadd.f32 %v2553_v5, %v2547_v38  ;;  %v2562_v63 = vmul.f32 %v6579_v59, %v6561_v9 }
 0x1e7   :  { %v2558_v53 = vadd.f32 %v2554_v49, %v2548_v31  ;;  %v2559_v34 = vadd.f32 %v2555_v46, %v2549_v45  ;;  %v2563_v3 = vmul.f32 %v6579_v59, %v6563_v30  ;;  %v2351_v60 = vmul.f32 %v4181_v33, %v7315_v21 }
 0x1e8   :  { %v4183_v6 = vpop.eup %4182  ;;  %v2564_v41 = vmul.f32 %v6579_v59, %v6570_v37  ;;  %v2565_v19 = vmul.f32 %v6579_v59, %v6572_v39  ;;  %v6591_v20 = vstv %s6541_s18  ;;  %v2353_v55 = vadd.f32 %v2349_v47, %v6492_v50 }
 0x1e9   :  { %v4185_v0 = vpop.eup %4184  ;;  %v2566_v27 = vadd.f32 %v2562_v63, %v2556_v40  ;;  %v2567_v42 = vadd.f32 %v2563_v3, %v2557_v51  ;;  %v6597_v18 = vstv %s6552_s19  ;;  %v2424_v13 = vmul.f32 %v4183_v6, %v6160_v54 }
 0x1ea   :  { %v4187_v21 = vpop.eup %4186  ;;  %v2425_v11 = vmul.f32 %v4185_v0, %v6160_v54  ;;  %v2568_v36 = vadd.f32 %v2564_v41, %v2558_v53  ;;  %v2569_v15 = vadd.f32 %v2565_v19, %v2559_v34  ;;  %v6606_v61 = vadd.f32 %v2350_v29, %v6508_v43 }
 0x1eb   :  { %v4189_v35 = vpop.eup %4188  ;;  %v2486_v50 = vadd.f32 1.0, %v4187_v21  ;;  %v2572_v48 = vadd.f32 %v6591_v20, %v2566_v27  ;;  %v2573_v7 = vadd.f32 %v6591_v20, %v2567_v42  ;;  %v6610_v2 = vadd.f32 %v2351_v60, %v2279_v1 }
 0x1ec   :  { %v4191_v17 = vpop.eup %4190  ;;  %v2487_v38 = vadd.f32 1.0, %v4189_v35  ;;  %v2574_v47 = vadd.f32 %v6591_v20, %v2568_v36  ;;  %v2608_v31 = vmul.f32 %v6597_v18, %v6489_v62  ;;  %v2609_v43 = vmul.f32 %v6597_v18, %v6501_v28 }
 0x1ed   :  { %4198 = vrcp.f32 %v2486_v50  ;;  %v3629_v45 = vmul.f32 -1.442695, %v2572_v48  ;;  %v3630_v8 = vmul.f32 -1.442695, %v2573_v7  ;;  %v2428_v33 = vadd.f32 %v2424_v13, %v2352_v25 }
 0x1ee   :  { %v4193_v5 = vpop.eup %4192  ;;  %v2429_v29 = vadd.f32 %v2425_v11, %v2353_v55  ;;  %4200 = vrcp.f32 %v2487_v38  ;;  %v2575_v1 = vadd.f32 %v6591_v20, %v2569_v15  ;;  %v2426_v46 = vmul.f32 %v4191_v17, %v6160_v54 }
 0x1ef   :  { %v4195_v49 = vpop.eup %4194  ;;  %v2488_v40 = vadd.f32 1.0, %v4193_v5  ;;  %4202 = vpow2.f32 %v3629_v45  ;;  %v3631_v51 = vmul.f32 -1.442695, %v2574_v47  ;;  %v2610_v25 = vmul.f32 %v6597_v18, %v6517_v52 }
 0x1f0   :  { %v4197_v53 = vpop.eup %4196  ;;  %v2489_v34 = vadd.f32 1.0, %v4195_v49  ;;  %4204 = vpow2.f32 %v3630_v8  ;;  %v2611_v63 = vmul.f32 %v6597_v18, %v6519_v4  ;;  %v6626_v3 = vstv %s6593_s20 }
 0x1f1   :  { %4206 = vrcp.f32 %v2488_v40  ;;  %v6629_v6 = vstv %s6599_s21  ;;  %v6632_v60 = vstv %s6601_s22  ;;  %v2614_v41 = vmul.f32 %v6626_v3, %v6503_v56 }
 0x1f2   :  { %4208 = vrcp.f32 %v2489_v34  ;;  %v2615_v19 = vmul.f32 %v6626_v3, %v6510_v57  ;;  %v2616_v0 = vmul.f32 %v6626_v3, %v6522_v16  ;;  %v2617_v55 = vmul.f32 %v6626_v3, %v6524_v32 }
 0x1f3   :  { %4210 = vpow2.f32 %v3631_v51  ;;  %v2624_v27 = vmul.f32 %v6629_v6, %v6543_v58  ;;  %v2625_v42 = vmul.f32 %v6629_v6, %v6545_v44  ;;  %v2427_v21 = vmul.f32 %v4197_v53, %v6160_v54 }
 0x1f4   :  { %v2618_v13 = vadd.f32 %v2614_v41, %v2608_v31  ;;  %v2619_v11 = vadd.f32 %v2615_v19, %v2609_v43  ;;  %v2620_v36 = vadd.f32 %v2616_v0, %v2610_v25  ;;  %v2621_v15 = vadd.f32 %v2617_v55, %v2611_v63 }
 0x1f5   :  { %v2626_v35 = vmul.f32 %v6629_v6, %v6554_v14  ;;  %v2627_v50 = vmul.f32 %v6629_v6, %v6556_v12  ;;  %v2634_v48 = vmul.f32 %v6632_v60, %v6561_v9  ;;  %v2635_v38 = vmul.f32 %v6632_v60, %v6563_v30 }
 0x1f6   :  { %v2628_v7 = vadd.f32 %v2624_v27, %v2618_v13  ;;  %v2629_v17 = vadd.f32 %v2625_v42, %v2619_v11  ;;  %v2636_v54 = vmul.f32 %v6632_v60, %v6570_v37  ;;  %v3632_v31 = vmul.f32 -1.442695, %v2575_v1 }
 0x1f7   :  { %v4199_v47 = vpop.eup %4198  ;;  %v2630_v45 = vadd.f32 %v2626_v35, %v2620_v36  ;;  %v2631_v8 = vadd.f32 %v2627_v50, %v2621_v15  ;;  %v6660_v43 = vstv %s6619_s4  ;;  %v2637_v40 = vmul.f32 %v6632_v60, %v6572_v39 }
 0x1f8   :  { %v4201_v5 = vpop.eup %4200  ;;  %v2500_v49 = vmul.f32 %v4199_v47, %v6238_v26  ;;  %v2638_v51 = vadd.f32 %v2634_v48, %v2628_v7  ;;  %v2639_v53 = vadd.f32 %v2635_v38, %v2629_v17  ;;  %v2430_v25 = vadd.f32 %v2426_v46, %v6606_v61 }
 0x1f9   :  { %v4203_v34 = vpop.eup %4202  ;;  %v2501_v63 = vmul.f32 %v4201_v5, %v6238_v26  ;;  %v2640_v41 = vadd.f32 %v2636_v54, %v2630_v45  ;;  %v2431_v13 = vadd.f32 %v2427_v21, %v6610_v2  ;;  %4212 = vpow2.f32 %v3632_v31 }
 0x1fa   :  { %v4205_v19 = vpop.eup %4204  ;;  %v2504_v1 = vadd.f32 %v2500_v49, %v2428_v33  ;;  %v2588_v0 = vadd.f32 1.0, %v4203_v34  ;;  %v2644_v55 = vadd.f32 %v6660_v43, %v2638_v51  ;;  %v2645_v27 = vadd.f32 %v6660_v43, %v2639_v53 }
 0x1fb   :  { %v4207_v42 = vpop.eup %4206  ;;  %v2505_v11 = vadd.f32 %v2501_v63, %v2429_v29  ;;  %v2641_v36 = vadd.f32 %v2637_v40, %v2631_v8  ;;  %v2646_v2 = vadd.f32 %v6660_v43, %v2640_v41  ;;  %v6682_v29 = vstv %s6657_s23 }
 0x1fc   :  { %v4209_v61 = vpop.eup %4208  ;;  %v2502_v33 = vmul.f32 %v4207_v42, %v6238_v26  ;;  %v2510_v46 = vadd.f32 %v2504_v1, %v4542_v24  ;;  %v3638_v15 = vmul.f32 -1.442695, %v2644_v55  ;;  %v3639_v7 = vmul.f32 -1.442695, %v2645_v27 }
 0x1fd   :  { %v4211_v35 = vpop.eup %4210  ;;  %v2503_v50 = vmul.f32 %v4209_v61, %v6238_v26  ;;  %v2511_v48 = vadd.f32 %v2505_v11, %v4542_v24  ;;  %4214 = vrcp.f32 %v2588_v0  ;;  %v2589_v38 = vadd.f32 1.0, %v4205_v19 }
 0x1fe   :  { %v2506_v17 = vadd.f32 %v2502_v33, %v2430_v25  ;;  %2514 = vst [vmem:[#allocation10 + $0xa0] sm:$0xff] %v2510_v46  ;;  %4216 = vpow2.f32 %v3638_v15  ;;  %v2590_v47 = vadd.f32 1.0, %v4211_v35  ;;  %v2647_v26 = vadd.f32 %v6660_v43, %v2641_v36 }
 0x1ff   :  { %v2507_v21 = vadd.f32 %v2503_v50, %v2431_v13  ;;  %2515 = vst [vmem:[#allocation10 + $0xa8] sm:$0xff] %v2511_v48  ;;  %4218 = vpow2.f32 %v3639_v7  ;;  %v2684_v45 = vmul.f32 %v6682_v29, %v6489_v62  ;;  %v2685_v8 = vmul.f32 %v6682_v29, %v6501_v28 }
 0x200   :  { %v2512_v54 = vadd.f32 %v2506_v17, %v4542_v24  ;;  %v2686_v5 = vmul.f32 %v6682_v29, %v6517_v52  ;;  %v3640_v49 = vmul.f32 -1.442695, %v2646_v2  ;;  %v2687_v40 = vmul.f32 %v6682_v29, %v6519_v4 }
 0x201   :  { %v2513_v31 = vadd.f32 %v2507_v21, %v4542_v24  ;;  %v6698_v51 = vstv %s6669_s24  ;;  %v6701_v53 = vstv %s6671_s25  ;;  %v6710_v41 = vstv %s6674_s26 }
 0x202   :  { %2516 = vst [vmem:[#allocation10 + $0xb0] sm:$0xff] %v2512_v54  ;;  %v2690_v34 = vmul.f32 %v6698_v51, %v6503_v56  ;;  %v2691_v25 = vmul.f32 %v6698_v51, %v6510_v57  ;;  %v2692_v63 = vmul.f32 %v6698_v51, %v6522_v16  ;;  %v2693_v19 = vmul.f32 %v6698_v51, %v6524_v32 }
 0x203   :  { %2517 = vst [vmem:[#allocation10 + $0xb8] sm:$0xff] %v2513_v31  ;;  %v2700_v1 = vmul.f32 %v6701_v53, %v6543_v58  ;;  %v2701_v0 = vmul.f32 %v6701_v53, %v6545_v44  ;;  %v2702_v55 = vmul.f32 %v6701_v53, %v6554_v14  ;;  %v4213_v27 = vpop.eup %4212  ;;  %v2703_v61 = vmul.f32 %v6701_v53, %v6556_v12 }
 0x204   :  { %v2694_v42 = vadd.f32 %v2690_v34, %v2684_v45  ;;  %v2695_v13 = vadd.f32 %v2691_v25, %v2685_v8  ;;  %v2696_v11 = vadd.f32 %v2692_v63, %v2686_v5  ;;  %v2697_v33 = vadd.f32 %v2693_v19, %v2687_v40 }
 0x205   :  { %v2710_v46 = vmul.f32 %v6710_v41, %v6561_v9  ;;  %v2711_v36 = vmul.f32 %v6710_v41, %v6563_v30  ;;  %v2712_v15 = vmul.f32 %v6710_v41, %v6570_v37  ;;  %v3641_v35 = vmul.f32 -1.442695, %v2647_v26 }
 0x206   :  { %v2704_v50 = vadd.f32 %v2700_v1, %v2694_v42  ;;  %v2705_v48 = vadd.f32 %v2701_v0, %v2695_v13  ;;  %v2706_v7 = vadd.f32 %v2702_v55, %v2696_v11  ;;  %v2591_v2 = vadd.f32 1.0, %v4213_v27 }
 0x207   :  { %v6732_v17 = vpop.eup %4214  ;;  %v2707_v21 = vadd.f32 %v2703_v61, %v2697_v33  ;;  %v2713_v54 = vmul.f32 %v6710_v41, %v6572_v39  ;;  %v6737_v31 = vstv %s6686_s27  ;;  %4220 = vpow2.f32 %v3640_v49 }
 0x208   :  { %7316 = vst [vmem:[#allocation19_spill] sm:$0xff] %v6737_v31  ;;  %v4217_v45 = vpop.eup %4216  ;;  %v2714_v8 = vadd.f32 %v2710_v46, %v2704_v50  ;;  %v2715_v5 = vadd.f32 %v2711_v36, %v2705_v48  ;;  %v2716_v26 = vadd.f32 %v2712_v15, %v2706_v7  ;;  %4222 = vrcp.f32 %v2589_v38 }
 0x209   :  { %v4219_v40 = vpop.eup %4218  ;;  %4224 = vpow2.f32 %v3641_v35  ;;  %v2717_v34 = vadd.f32 %v2713_v54, %v2707_v21  ;;  %v6741_v63 = vstv %s6712_s28  ;;  %v2660_v1 = vadd.f32 1.0, %v4217_v45 }
 0x20a   :  { %v2720_v25 = vadd.f32 %v6737_v31, %v2714_v8  ;;  %4226 = vrcp.f32 %v2590_v47  ;;  %v2721_v19 = vadd.f32 %v6737_v31, %v2715_v5  ;;  %v2722_v49 = vadd.f32 %v6737_v31, %v2716_v26 }
 0x20b   :  { %4228 = vrcp.f32 %v2591_v2  ;;  %v2661_v0 = vadd.f32 1.0, %v4219_v40  ;;  %v2760_v27 = vmul.f32 %v6741_v63, %v6489_v62  ;;  %v2761_v38 = vmul.f32 %v6741_v63, %v6501_v28 }
 0x20c   :  { %v3648_v55 = vmul.f32 -1.442695, %v2720_v25  ;;  %v2723_v42 = vadd.f32 %v6737_v31, %v2717_v34  ;;  %v2762_v13 = vmul.f32 %v6741_v63, %v6517_v52  ;;  %v2763_v47 = vmul.f32 %v6741_v63, %v6519_v4 }
 0x20d   :  { %v6755_v11 = vstv %s6730_s2  ;;  %v3649_v61 = vmul.f32 -1.442695, %v2721_v19  ;;  %v3650_v15 = vmul.f32 -1.442695, %v2722_v49  ;;  %v6767_v50 = vstv %s3655_s29 }
 0x20e   :  { %v2766_v33 = vmul.f32 %v6755_v11, %v6503_v56  ;;  %v2767_v46 = vmul.f32 %v6755_v11, %v6510_v57  ;;  %v2768_v36 = vmul.f32 %v6755_v11, %v6522_v16  ;;  %v2769_v35 = vmul.f32 %v6755_v11, %v6524_v32  ;;  %7317 = vst [vmem:[#allocation15_spill] sm:$0xff] %v6767_v50 }
 0x20f   :  { %v6769_v48 = vstv %s3656_s30  ;;  %4230 = vpow2.f32 %v3648_v55  ;;  %v3651_v45 = vmul.f32 -1.442695, %v2723_v42  ;;  %v2776_v5 = vmul.f32 %v6767_v50, %v6543_v58 }
 0x210   :  { %7318 = vst [vmem:[#allocation20_spill] sm:$0xff] %v6769_v48  ;;  %v2770_v7 = vadd.f32 %v2766_v33, %v2760_v27  ;;  %v2771_v2 = vadd.f32 %v2767_v46, %v2761_v38  ;;  %v2772_v21 = vadd.f32 %v2768_v36, %v2762_v13  ;;  %v2773_v8 = vadd.f32 %v2769_v35, %v2763_v47 }
 0x211   :  { %v4221_v54 = vpop.eup %4220  ;;  %v2777_v26 = vmul.f32 %v6767_v50, %v6545_v44  ;;  %4232 = vpow2.f32 %v3649_v61  ;;  %v2778_v34 = vmul.f32 %v6767_v50, %v6554_v14  ;;  %v2779_v25 = vmul.f32 %v6767_v50, %v6556_v12  ;;  %v6967_v50 = vld [vmem:[#allocation3 + $0x3f8] sm:$0xff] }
 0x212   :  { %v6777_v40 = vpop.eup %4222  ;;  %v2786_v19 = vmul.f32 %v6769_v48, %v6561_v9  ;;  %v2780_v55 = vadd.f32 %v2776_v5, %v2770_v7  ;;  %v2787_v38 = vmul.f32 %v6769_v48, %v6563_v30  ;;  %v2788_v42 = vmul.f32 %v6769_v48, %v6570_v37 }
 0x213   :  { %v4225_v49 = vpop.eup %4224  ;;  %v2781_v27 = vadd.f32 %v2777_v26, %v2771_v2  ;;  %v2662_v47 = vadd.f32 1.0, %v4221_v54  ;;  %v2782_v61 = vadd.f32 %v2778_v34, %v2772_v21  ;;  %v2783_v33 = vadd.f32 %v2779_v25, %v2773_v8 }
 0x214   :  { %v6791_v13 = vpop.eup %4226  ;;  %v2789_v46 = vmul.f32 %v6769_v48, %v6572_v39  ;;  %4234 = vpow2.f32 %v3650_v15  ;;  %v2790_v35 = vadd.f32 %v2786_v19, %v2780_v55  ;;  %v6800_v2 = vstv %s6757_s6 }
 0x215   :  { %v6797_v36 = vpop.eup %4228  ;;  %v2791_v7 = vadd.f32 %v2787_v38, %v2781_v27  ;;  %7319 = vst [vmem:[#allocation17_spill] sm:$0xff] %v6800_v2  ;;  %v2663_v5 = vadd.f32 1.0, %v4225_v49  ;;  %4236 = vrcp.f32 %v2660_v1  ;;  %v2792_v26 = vadd.f32 %v2788_v42, %v2782_v61 }
 0x216   :  { %v2793_v54 = vadd.f32 %v2789_v46, %v2783_v33  ;;  %4238 = vpow2.f32 %v3651_v45  ;;  %v2796_v21 = vadd.f32 %v6800_v2, %v2790_v35  ;;  %v6807_v34 = vstv %s6771_s7 }
 0x217   :  { %4240 = vrcp.f32 %v2661_v0  ;;  %v2797_v8 = vadd.f32 %v6800_v2, %v2791_v7  ;;  %7320 = vst [vmem:[#allocation16_spill] sm:$0xff] %v6807_v34  ;;  %v2798_v15 = vadd.f32 %v6800_v2, %v2792_v26  ;;  %v6814_v49 = vstv %s6785_s8 }
 0x218   :  { %4242 = vrcp.f32 %v2662_v47  ;;  %v3658_v25 = vmul.f32 -1.442695, %v2796_v21  ;;  %v2799_v1 = vadd.f32 %v6800_v2, %v2793_v54  ;;  %7321 = vst [vmem:[#allocation21_spill] sm:$0xff] %v6814_v49  ;;  %v2836_v0 = vmul.f32 %v6807_v34, %v6489_v62 }
 0x219   :  { %v4231_v19 = vpop.eup %4230  ;;  %4244 = vrcp.f32 %v2663_v5  ;;  %v2837_v45 = vmul.f32 %v6807_v34, %v6501_v28  ;;  %v3659_v27 = vmul.f32 -1.442695, %v2797_v8  ;;  %v2838_v38 = vmul.f32 %v6807_v34, %v6517_v52 }
 0x21a   :  { %4246 = vpow2.f32 %v3658_v25  ;;  %v2839_v42 = vmul.f32 %v6807_v34, %v6519_v4  ;;  %v6825_v47 = vstv %s6795_s9  ;;  %v2736_v61 = vadd.f32 1.0, %v4231_v19 }
 0x21b   :  { %v4233_v55 = vpop.eup %4232  ;;  %7322 = vst [vmem:[#allocation22_spill] sm:$0xff] %v6825_v47  ;;  %v3660_v62 = vmul.f32 -1.442695, %v2798_v15  ;;  %v2842_v33 = vmul.f32 %v6825_v47, %v6503_v56  ;;  %v2843_v28 = vmul.f32 %v6825_v47, %v6510_v57  ;;  %v3661_v46 = vmul.f32 -1.442695, %v2799_v1 }
 0x21c   :  { %v2844_v52 = vmul.f32 %v6825_v47, %v6522_v16  ;;  %v2845_v4 = vmul.f32 %v6825_v47, %v6524_v32  ;;  %v6840_v35 = vstv %s6802_s0  ;;  %v2737_v5 = vadd.f32 1.0, %v4233_v55 }
 0x21d   :  { %7323 = vst [vmem:[#allocation18_spill] sm:$0xff] %v6840_v35  ;;  %v2846_v26 = vadd.f32 %v2842_v33, %v2836_v0  ;;  %v2847_v54 = vadd.f32 %v2843_v28, %v2837_v45  ;;  %v2852_v21 = vmul.f32 %v6840_v35, %v6543_v58  ;;  %4248 = vpow2.f32 %v3659_v27 }
 0x21e   :  { %v4235_v7 = vpop.eup %4234  ;;  %v2848_v57 = vadd.f32 %v2844_v52, %v2838_v38  ;;  %v2849_v8 = vadd.f32 %v2845_v4, %v2839_v42  ;;  %v2853_v16 = vmul.f32 %v6840_v35, %v6545_v44  ;;  %4250 = vpow2.f32 %v3660_v62 }
 0x21f   :  { %v6844_v56 = vpop.eup %4236  ;;  %v2854_v32 = vmul.f32 %v6840_v35, %v6554_v14  ;;  %v2855_v25 = vmul.f32 %v6840_v35, %v6556_v12  ;;  %v2856_v19 = vadd.f32 %v2852_v21, %v2846_v26  ;;  %v2738_v1 = vadd.f32 1.0, %v4235_v7  ;;  %v6877_v7 = vld [vmem:[#allocation3 + $0xe0] sm:$0xff]  ;;  %v6950_v35 = vld [vmem:[#allocation3 + $0x3e8] sm:$0xff] }
 0x220   :  { %v4239_v15 = vpop.eup %4238  ;;  %4252 = vpow2.f32 %v3661_v46  ;;  %v2857_v0 = vadd.f32 %v2853_v16, %v2847_v54  ;;  %v6857_v45 = vstv %s6811_s10  ;;  %v6872_v28 = vstv %s6827_s11  ;;  %v6879_v21 = vld [vmem:[#allocation3 + $0x1e0] sm:$0xff]  ;;  %v6894_v16 = vld [vmem:[#allocation3 + $0xf0] sm:$0xff] }
 0x221   :  { %v6852_v58 = vpop.eup %4240  ;;  %7324 = vst [vmem:[#allocation14_spill] sm:$0xff] %v6857_v45  ;;  %v2858_v55 = vadd.f32 %v2854_v32, %v2848_v57  ;;  %v2859_v27 = vadd.f32 %v2855_v25, %v2849_v8  ;;  %v2862_v14 = vmul.f32 %v6857_v45, %v6561_v9  ;;  %v2863_v12 = vmul.f32 %v6857_v45, %v6563_v30  ;;  %v6887_v57 = vld [vmem:[#allocation3 + $0xe8] sm:$0xff] }
 0x222   :  { %v6859_v44 = vpop.eup %4242  ;;  %v2739_v42 = vadd.f32 1.0, %v4239_v15  ;;  %v2864_v62 = vmul.f32 %v6857_v45, %v6570_v37  ;;  %v2865_v33 = vmul.f32 %v6857_v45, %v6572_v39  ;;  %7325 = vst [vmem:[#allocation23_spill] sm:$0xff] %v6872_v28  ;;  %v6875_v52 = vstv %s6829_s12 }
 0x223   :  { %v6865_v38 = vpop.eup %4244  ;;  %7326 = vst [vmem:[#allocation24_spill] sm:$0xff] %v6875_v52  ;;  %4254 = vrcp.f32 %v2736_v61  ;;  %v2866_v4 = vadd.f32 %v2862_v14, %v2856_v19  ;;  %v2867_v9 = vadd.f32 %v2863_v12, %v2857_v0  ;;  %v6883_v37 = vmul.f32 %v6732_v17, %v6814_v49  ;;  %v6899_v19 = vld [vmem:[#allocation3 + $0x1e8] sm:$0xff] }
 0x224   :  { %v4247_v46 = vpop.eup %4246  ;;  %4256 = vrcp.f32 %v2737_v5  ;;  %v2868_v26 = vadd.f32 %v2864_v62, %v2858_v55  ;;  %v2869_v54 = vadd.f32 %v2865_v33, %v2859_v27  ;;  %v6891_v5 = vmul.f32 %v6777_v40, %v6814_v49  ;;  %v6912_v33 = vld [vmem:[#allocation3 + $0x2e0] sm:$0xff] }
 0x225   :  { %v2812_v30 = vadd.f32 1.0, %v4247_v46  ;;  %4258 = vrcp.f32 %v2738_v1  ;;  %v2872_v39 = vadd.f32 %v6872_v28, %v2866_v4  ;;  %v2873_v61 = vadd.f32 %v6872_v28, %v2867_v9  ;;  %v6901_v1 = vld [vmem:[#allocation3 + $0x1f0] sm:$0xff] }
 0x226   :  { %4260 = vrcp.f32 %v2739_v42  ;;  %v2874_v8 = vadd.f32 %v6872_v28, %v2868_v26  ;;  %v2938_v17 = vmul.f32 %v6877_v7, %v6497_v23  ;;  %v2875_v15 = vadd.f32 %v6872_v28, %v2869_v54  ;;  %v6916_v26 = vld [vmem:[#allocation3 + $0xf8] sm:$0xff]  ;;  %v6932_v28 = vld [vmem:[#allocation3 + $0x3e0] sm:$0xff] }
 0x227   :  { %v3668_v32 = vmul.f32 -1.442695, %v2872_v39  ;;  %v3669_v25 = vmul.f32 -1.442695, %v2873_v61  ;;  %v2944_v40 = vmul.f32 %v6879_v21, %v6506_v10  ;;  %v4249_v0 = vpop.eup %4248  ;;  %v2604_v55 = vmul.f32 %v6791_v13, %v6814_v49  ;;  %v6918_v13 = vld [vmem:[#allocation3 + $0x1f8] sm:$0xff] }
 0x228   :  { %v6908_v27 = vstv %s6854_s1  ;;  %4262 = vrcp.f32 %v2812_v30  ;;  %v2939_v14 = vmul.f32 %v6887_v57, %v6497_v23  ;;  %v4251_v12 = vpop.eup %4250  ;;  %v2813_v42 = vadd.f32 1.0, %v4249_v0 }
 0x229   :  { %7327 = vst [vmem:[#allocation25_spill] sm:$0xff] %v6908_v27  ;;  %4264 = vpow2.f32 %v3668_v32  ;;  %v3670_v62 = vmul.f32 -1.442695, %v2874_v8  ;;  %v2940_v46 = vmul.f32 %v6894_v16, %v6497_v23  ;;  %v2814_v9 = vadd.f32 1.0, %v4251_v12  ;;  %v6924_v8 = vld [vmem:[#allocation3 + $0x2e8] sm:$0xff]  ;;  %v6930_v12 = vld [vmem:[#allocation3 + $0x2f0] sm:$0xff] }
 0x22a   :  { %v4253_v4 = vpop.eup %4252  ;;  %4266 = vpow2.f32 %v3669_v25  ;;  %v2945_v30 = vmul.f32 %v6899_v19, %v6506_v10  ;;  %v2946_v54 = vmul.f32 %v6901_v1, %v6506_v10  ;;  %v3671_v61 = vmul.f32 -1.442695, %v2875_v15 }
 0x22b   :  { %v2815_v39 = vadd.f32 1.0, %v4253_v4  ;;  %4268 = vrcp.f32 %v2813_v42  ;;  %v2948_v32 = vadd.f32 %v2944_v40, %v2938_v17  ;;  %v2674_v0 = vmul.f32 %v6844_v56, %v6875_v52  ;;  %v6946_v40 = vld [vmem:[#allocation3 + $0x2f8] sm:$0xff] }
 0x22c   :  { %v2675_v25 = vmul.f32 %v6852_v58, %v6875_v52  ;;  %4270 = vrcp.f32 %v2814_v9  ;;  %v2954_v45 = vmul.f32 %v6912_v33, %v6550_v22  ;;  %v2676_v15 = vmul.f32 %v6859_v44, %v6875_v52 }
 0x22d   :  { %v4255_v4 = vpop.eup %4254  ;;  %4272 = vrcp.f32 %v2815_v39  ;;  %v2941_v56 = vmul.f32 %v6916_v26, %v6497_v23  ;;  %v2947_v58 = vmul.f32 %v6918_v13, %v6506_v10  ;;  %v2949_v42 = vadd.f32 %v2945_v30, %v2939_v14 }
 0x22e   :  { %v4257_v17 = vpop.eup %4256  ;;  %4274 = vpow2.f32 %v3670_v62  ;;  %v2950_v9 = vadd.f32 %v2946_v54, %v2940_v46  ;;  %v2955_v44 = vmul.f32 %v6924_v8, %v6550_v22  ;;  %v2956_v23 = vmul.f32 %v6930_v12, %v6550_v22  ;;  %v6960_v46 = vld [vmem:[#allocation3 + $0x3f0] sm:$0xff] }
 0x22f   :  { %v4259_v39 = vpop.eup %4258  ;;  %4276 = vpow2.f32 %v3671_v61  ;;  %v2958_v47 = vadd.f32 %v2954_v45, %v2948_v32  ;;  %v2964_v10 = vmul.f32 %v6932_v28, %v6579_v59  ;;  %v2605_v34 = vmul.f32 %v6797_v36, %v6814_v49 }
 0x230   :  { %v4261_v62 = vpop.eup %4260  ;;  %v2677_v14 = vmul.f32 %v6865_v38, %v6875_v52  ;;  %v2678_v30 = vadd.f32 %v2674_v0, %v6883_v37  ;;  %v2679_v54 = vadd.f32 %v2675_v25, %v6891_v5  ;;  %v2951_v61 = vadd.f32 %v2947_v58, %v2941_v56 }
 0x231   :  { %v2957_v45 = vmul.f32 %v6946_v40, %v6550_v22  ;;  %v2680_v2 = vadd.f32 %v2676_v15, %v2604_v55  ;;  %v2750_v48 = vmul.f32 %v4255_v4, %v6908_v27  ;;  %v2959_v36 = vadd.f32 %v2955_v44, %v2949_v42 }
 0x232   :  { %v4263_v32 = vpop.eup %4262  ;;  %v2965_v38 = vmul.f32 %v6950_v35, %v6579_v59  ;;  %v2751_v37 = vmul.f32 %v4257_v17, %v6908_v27  ;;  %v2960_v0 = vadd.f32 %v2956_v23, %v2950_v9  ;;  %v2966_v5 = vmul.f32 %v6960_v46, %v6579_v59 }
 0x233   :  { %v4265_v52 = vpop.eup %4264  ;;  %v2968_v22 = vadd.f32 %v2964_v10, %v2958_v47  ;;  %v2681_v55 = vadd.f32 %v2677_v14, %v2605_v34  ;;  %v2752_v15 = vmul.f32 %v4259_v39, %v6908_v27  ;;  %v2753_v4 = vmul.f32 %v4261_v62, %v6908_v27 }
 0x234   :  { %v4267_v25 = vpop.eup %4266  ;;  %v2888_v56 = vadd.f32 1.0, %v4265_v52  ;;  %v6977_v42 = vstv %s6938_s3  ;;  %v2961_v49 = vadd.f32 %v2957_v45, %v2951_v61  ;;  %v2967_v17 = vmul.f32 %v6967_v50, %v6579_v59 }
 0x235   :  { %v4269_v58 = vpop.eup %4268  ;;  %v2889_v44 = vadd.f32 1.0, %v4267_v25  ;;  %v2754_v23 = vadd.f32 %v2750_v48, %v2678_v30  ;;  %v6982_v31 = vstv %s6944_s13  ;;  %v2969_v47 = vadd.f32 %v2965_v38, %v2959_v36 }
 0x236   :  { %v4271_v9 = vpop.eup %4270  ;;  %4278 = vrcp.f32 %v2888_v56  ;;  %v2755_v10 = vadd.f32 %v2751_v37, %v2679_v54  ;;  %v2970_v39 = vadd.f32 %v2966_v5, %v2960_v0  ;;  %v2974_v52 = vadd.f32 %v2968_v22, %v6591_v20 }
 0x237   :  { %v4273_v34 = vpop.eup %4272  ;;  %4280 = vrcp.f32 %v2889_v44  ;;  %v2756_v14 = vadd.f32 %v2752_v15, %v2680_v2  ;;  %v2757_v27 = vadd.f32 %v2753_v4, %v2681_v55  ;;  %v2826_v61 = vmul.f32 %v4263_v32, %v6977_v42 }
 0x238   :  { %v4275_v62 = vpop.eup %4274  ;;  %v3010_v59 = vmul.f32 %v6877_v7, %v6597_v18  ;;  %v2971_v30 = vadd.f32 %v2967_v17, %v2961_v49  ;;  %v3011_v36 = vmul.f32 %v6887_v57, %v6597_v18  ;;  %v3012_v54 = vmul.f32 %v6894_v16, %v6597_v18 }
 0x239   :  { %v4277_v45 = vpop.eup %4276  ;;  %v2890_v48 = vadd.f32 1.0, %v4275_v62  ;;  %v2975_v37 = vadd.f32 %v2969_v47, %v6591_v20  ;;  %v3016_v2 = vmul.f32 %v6879_v21, %v6626_v3  ;;  %v3017_v32 = vmul.f32 %v6899_v19, %v6626_v3 }
 0x23a   :  { %v2891_v38 = vadd.f32 1.0, %v4277_v45  ;;  %v2976_v0 = vadd.f32 %v2970_v39, %v6591_v20  ;;  %v3676_v5 = vmul.f32 -1.442695, %v2974_v52  ;;  %v3018_v49 = vmul.f32 %v6901_v1, %v6626_v3 }
 0x23b   :  { %4282 = vrcp.f32 %v2890_v48  ;;  %v2827_v22 = vmul.f32 %v4269_v58, %v6977_v42  ;;  %v2828_v25 = vmul.f32 %v4271_v9, %v6977_v42  ;;  %v2829_v55 = vmul.f32 %v4273_v34, %v6977_v42 }
 0x23c   :  { %4284 = vrcp.f32 %v2891_v38  ;;  %v2830_v15 = vadd.f32 %v2826_v61, %v2754_v23  ;;  %v7004_v4 = vadd.f32 %v2971_v30, %v6591_v20  ;;  %v3013_v56 = vmul.f32 %v6916_v26, %v6597_v18 }
 0x23d   :  { %v3019_v44 = vmul.f32 %v6918_v13, %v6626_v3  ;;  %v3020_v17 = vadd.f32 %v3016_v2, %v3010_v59  ;;  %v3021_v47 = vadd.f32 %v3017_v32, %v3011_v36  ;;  %v3026_v58 = vmul.f32 %v6912_v33, %v6629_v6 }
 0x23e   :  { %v3027_v9 = vmul.f32 %v6924_v8, %v6629_v6  ;;  %v3677_v34 = vmul.f32 -1.442695, %v2975_v37  ;;  %v3678_v39 = vmul.f32 -1.442695, %v2976_v0  ;;  %v3022_v23 = vadd.f32 %v3018_v49, %v3012_v54 }
 0x23f   :  { %v3028_v20 = vmul.f32 %v6930_v12, %v6629_v6  ;;  %v2831_v62 = vadd.f32 %v2827_v22, %v2755_v10  ;;  %v2832_v18 = vadd.f32 %v2828_v25, %v2756_v14  ;;  %v2833_v61 = vadd.f32 %v2829_v55, %v2757_v27 }
 0x240   :  { %v4279_v52 = vpop.eup %4278  ;;  %4286 = vpow2.f32 %v3676_v5  ;;  %v3023_v45 = vadd.f32 %v3019_v44, %v3013_v56  ;;  %v3029_v48 = vmul.f32 %v6946_v40, %v6629_v6  ;;  %v3036_v30 = vmul.f32 %v6932_v28, %v6632_v60 }
 0x241   :  { %v4281_v3 = vpop.eup %4280  ;;  %v2902_v59 = vmul.f32 %v4279_v52, %v6982_v31  ;;  %v3030_v54 = vadd.f32 %v3026_v58, %v3020_v17  ;;  %v3031_v38 = vadd.f32 %v3027_v9, %v3021_v47  ;;  %v3037_v10 = vmul.f32 %v6950_v35, %v6632_v60 }
 0x242   :  { %v2903_v36 = vmul.f32 %v4281_v3, %v6982_v31  ;;  %v3032_v27 = vadd.f32 %v3028_v20, %v3022_v23  ;;  %v3086_v37 = vmul.f32 %v6877_v7, %v6682_v29  ;;  %v3092_v2 = vmul.f32 %v6879_v21, %v6698_v51 }
 0x243   :  { %v2906_v14 = vadd.f32 %v2902_v59, %v2830_v15  ;;  %v3038_v6 = vmul.f32 %v6960_v46, %v6632_v60  ;;  %v3087_v0 = vmul.f32 %v6887_v57, %v6682_v29  ;;  %v3093_v5 = vmul.f32 %v6899_v19, %v6698_v51 }
 0x244   :  { %v2907_v32 = vadd.f32 %v2903_v36, %v2831_v62  ;;  %v3033_v25 = vadd.f32 %v3029_v48, %v3023_v45  ;;  %v3088_v55 = vmul.f32 %v6894_v16, %v6682_v29  ;;  %v3094_v15 = vmul.f32 %v6901_v1, %v6698_v51 }
 0x245   :  { %v4283_v49 = vpop.eup %4282  ;;  %v2912_v22 = vadd.f32 %v2906_v14, %v4542_v24  ;;  %v3089_v47 = vmul.f32 %v6916_v26, %v6682_v29  ;;  %v3095_v58 = vmul.f32 %v6918_v13, %v6698_v51  ;;  %v3039_v23 = vmul.f32 %v6967_v50, %v6632_v60 }
 0x246   :  { %v4285_v56 = vpop.eup %4284  ;;  %v2904_v44 = vmul.f32 %v4283_v49, %v6982_v31  ;;  %v2913_v17 = vadd.f32 %v2907_v32, %v4542_v24  ;;  %v3040_v20 = vadd.f32 %v3036_v30, %v3030_v54  ;;  %v3096_v52 = vadd.f32 %v3092_v2, %v3086_v37 }
 0x247   :  { %v2905_v9 = vmul.f32 %v4285_v56, %v6982_v31  ;;  %2916 = vst [vmem:[#allocation10 + $0xc0] sm:$0xff] %v2912_v22  ;;  %v3041_v3 = vadd.f32 %v3037_v10, %v3031_v38  ;;  %v3042_v59 = vadd.f32 %v3038_v6, %v3032_v27  ;;  %v3097_v45 = vadd.f32 %v3093_v5, %v3087_v0 }
 0x248   :  { %v2908_v62 = vadd.f32 %v2904_v44, %v2832_v18  ;;  %2917 = vst [vmem:[#allocation10 + $0xc8] sm:$0xff] %v2913_v17  ;;  %v3098_v36 = vadd.f32 %v3094_v15, %v3088_v55  ;;  %v3102_v29 = vmul.f32 %v6912_v33, %v6701_v53  ;;  %v3103_v51 = vmul.f32 %v6924_v8, %v6701_v53 }
 0x249   :  { %v2909_v48 = vadd.f32 %v2905_v9, %v2833_v61  ;;  %v3099_v60 = vadd.f32 %v3095_v58, %v3089_v47  ;;  %v3104_v18 = vmul.f32 %v6930_v12, %v6701_v53  ;;  %v3105_v30 = vmul.f32 %v6946_v40, %v6701_v53 }
 0x24a   :  { %v7052_v14 = vpop.eup %4286  ;;  %v2914_v32 = vadd.f32 %v2908_v62, %v4542_v24  ;;  %4288 = vpow2.f32 %v3677_v34  ;;  %v3679_v54 = vmul.f32 -1.442695, %v7004_v4  ;;  %v3106_v38 = vadd.f32 %v3102_v29, %v3096_v52  ;;  %v7328_v62 = vld [vmem:[#allocation19_spill] sm:$0xff] }
 0x24b   :  { %v2915_v61 = vadd.f32 %v2909_v48, %v4542_v24  ;;  %4290 = vpow2.f32 %v3678_v39  ;;  %v3043_v10 = vadd.f32 %v3039_v23, %v3033_v25  ;;  %v3107_v27 = vadd.f32 %v3103_v51, %v3097_v45 }
 0x24c   :  { %2918 = vst [vmem:[#allocation10 + $0xd0] sm:$0xff] %v2914_v32  ;;  %v3112_v37 = vmul.f32 %v6932_v28, %v6710_v41  ;;  %v3046_v2 = vadd.f32 %v3040_v20, %v6660_v43  ;;  %v3047_v6 = vadd.f32 %v3041_v3, %v6660_v43  ;;  %v3048_v53 = vadd.f32 %v3042_v59, %v6660_v43 }
 0x24d   :  { %2919 = vst [vmem:[#allocation10 + $0xd8] sm:$0xff] %v2915_v61  ;;  %v3113_v34 = vmul.f32 %v6950_v35, %v6710_v41  ;;  %v3108_v0 = vadd.f32 %v3104_v18, %v3098_v36  ;;  %v3109_v4 = vadd.f32 %v3105_v30, %v3099_v60  ;;  %v3114_v39 = vmul.f32 %v6960_v46, %v6710_v41 }
 0x24e   :  { %v3115_v5 = vmul.f32 %v6967_v50, %v6710_v41  ;;  %v3116_v49 = vadd.f32 %v3112_v37, %v3106_v38  ;;  %v3162_v22 = vmul.f32 %v6877_v7, %v6741_v63  ;;  %v3163_v25 = vmul.f32 %v6887_v57, %v6741_v63 }
 0x24f   :  { %v3168_v55 = vmul.f32 %v6879_v21, %v6755_v11  ;;  %v3117_v15 = vadd.f32 %v3113_v34, %v3107_v27  ;;  %v3164_v56 = vmul.f32 %v6894_v16, %v6741_v63  ;;  %v3169_v44 = vmul.f32 %v6899_v19, %v6755_v11 }
 0x250   :  { %v3170_v41 = vmul.f32 %v6901_v1, %v6755_v11  ;;  %v3049_v17 = vadd.f32 %v3043_v10, %v6660_v43  ;;  %v3685_v47 = vmul.f32 -1.442695, %v3046_v2  ;;  %v3165_v58 = vmul.f32 %v6916_v26, %v6741_v63  ;;  %v7329_v63 = vld [vmem:[#allocation15_spill] sm:$0xff] }
 0x251   :  { %v3686_v9 = vmul.f32 -1.442695, %v3047_v6  ;;  %v3118_v23 = vadd.f32 %v3114_v39, %v3108_v0  ;;  %v3171_v20 = vmul.f32 %v6918_v13, %v6755_v11  ;;  %4292 = vpow2.f32 %v3679_v54 }
 0x252   :  { %v3119_v52 = vadd.f32 %v3115_v5, %v3109_v4  ;;  %v3122_v3 = vadd.f32 %v3116_v49, %v7328_v62  ;;  %v3172_v59 = vadd.f32 %v3168_v55, %v3162_v22  ;;  %v3687_v45 = vmul.f32 -1.442695, %v3048_v53  ;;  %v7330_v53 = vld [vmem:[#allocation20_spill] sm:$0xff] }
 0x253   :  { %v3123_v48 = vadd.f32 %v3117_v15, %v7328_v62  ;;  %v3173_v36 = vadd.f32 %v3169_v44, %v3163_v25  ;;  %v3174_v29 = vadd.f32 %v3170_v41, %v3164_v56  ;;  %4294 = vpow2.f32 %v3685_v47 }
 0x254   :  { %v4289_v43 = vpop.eup %4288  ;;  %v3688_v51 = vmul.f32 -1.442695, %v3049_v17  ;;  %v3175_v32 = vadd.f32 %v3171_v20, %v3165_v58  ;;  %v3178_v60 = vmul.f32 %v6912_v33, %v7329_v63  ;;  %4296 = vpow2.f32 %v3686_v9  ;;  %v7331_v58 = vld [vmem:[#allocation17_spill] sm:$0xff]  ;;  %v7333_v20 = vld [vmem:[#allocation22_spill] sm:$0xff] }
 0x255   :  { %v4291_v18 = vpop.eup %4290  ;;  %v3124_v11 = vadd.f32 %v3118_v23, %v7328_v62  ;;  %v3179_v30 = vmul.f32 %v6924_v8, %v7329_v63  ;;  %v3180_v61 = vmul.f32 %v6930_v12, %v7329_v63  ;;  %v3125_v54 = vadd.f32 %v3119_v52, %v7328_v62  ;;  %v7332_v23 = vld [vmem:[#allocation16_spill] sm:$0xff] }
 0x256   :  { %v3695_v38 = vmul.f32 -1.442695, %v3122_v3  ;;  %v3181_v10 = vmul.f32 %v6946_v40, %v7329_v63  ;;  %v3182_v27 = vadd.f32 %v3178_v60, %v3172_v59  ;;  %v3696_v37 = vmul.f32 -1.442695, %v3123_v48  ;;  %v7334_v63 = vld [vmem:[#allocation18_spill] sm:$0xff] }
 0x257   :  { %v3183_v2 = vadd.f32 %v3179_v30, %v3173_v36  ;;  %v3184_v6 = vadd.f32 %v3180_v61, %v3174_v29  ;;  %v3188_v34 = vmul.f32 %v6932_v28, %v7330_v53  ;;  %4298 = vpow2.f32 %v3687_v45 }
 0x258   :  { %v3185_v0 = vadd.f32 %v3181_v10, %v3175_v32  ;;  %v3189_v4 = vmul.f32 %v6950_v35, %v7330_v53  ;;  %v3190_v39 = vmul.f32 %v6960_v46, %v7330_v53  ;;  %v2990_v5 = vadd.f32 1.0, %v7052_v14 }
 0x259   :  { %4300 = vpow2.f32 %v3688_v51  ;;  %v3191_v49 = vmul.f32 %v6967_v50, %v7330_v53  ;;  %v3192_v22 = vadd.f32 %v3188_v34, %v3182_v27  ;;  %v2991_v25 = vadd.f32 1.0, %v4289_v43 }
 0x25a   :  { %4302 = vpow2.f32 %v3695_v38  ;;  %v3697_v55 = vmul.f32 -1.442695, %v3124_v11  ;;  %v3193_v15 = vadd.f32 %v3189_v4, %v3183_v2  ;;  %v2992_v56 = vadd.f32 1.0, %v4291_v18 }
 0x25b   :  { %4304 = vpow2.f32 %v3696_v37  ;;  %v3698_v44 = vmul.f32 -1.442695, %v3125_v54  ;;  %v3194_v41 = vadd.f32 %v3190_v39, %v3184_v6  ;;  %v4293_v17 = vpop.eup %4292  ;;  %v3195_v47 = vadd.f32 %v3191_v49, %v3185_v0  ;;  %v7335_v0 = vld [vmem:[#allocation14_spill] sm:$0xff] }
 0x25c   :  { %v3198_v9 = vadd.f32 %v3192_v22, %v7331_v58  ;;  %v3238_v14 = vmul.f32 %v6877_v7, %v7332_v23  ;;  %v3244_v52 = vmul.f32 %v6879_v21, %v7333_v20  ;;  %v3239_v62 = vmul.f32 %v6887_v57, %v7332_v23 }
 0x25d   :  { %v3240_v3 = vmul.f32 %v6894_v16, %v7332_v23  ;;  %v3245_v59 = vmul.f32 %v6899_v19, %v7333_v20  ;;  %v3246_v45 = vmul.f32 %v6901_v1, %v7333_v20  ;;  %v4295_v48 = vpop.eup %4294  ;;  %4306 = vpow2.f32 %v3697_v55 }
 0x25e   :  { %v3199_v36 = vadd.f32 %v3193_v15, %v7331_v58  ;;  %v3241_v7 = vmul.f32 %v6916_v26, %v7332_v23  ;;  %v3247_v21 = vmul.f32 %v6918_v13, %v7333_v20  ;;  %v4297_v57 = vpop.eup %4296  ;;  %v2993_v29 = vadd.f32 1.0, %v4293_v17  ;;  %v7336_v17 = vld [vmem:[#allocation23_spill] sm:$0xff] }
 0x25f   :  { %4308 = vrcp.f32 %v2990_v5  ;;  %v3200_v16 = vadd.f32 %v3194_v41, %v7331_v58  ;;  %v3201_v19 = vadd.f32 %v3195_v47, %v7331_v58  ;;  %v3705_v43 = vmul.f32 -1.442695, %v3198_v9 }
 0x260   :  { %4310 = vpow2.f32 %v3698_v44  ;;  %v3248_v1 = vadd.f32 %v3244_v52, %v3238_v14  ;;  %v3249_v51 = vadd.f32 %v3245_v59, %v3239_v62  ;;  %v3250_v32 = vadd.f32 %v3246_v45, %v3240_v3 }
 0x261   :  { %4312 = vrcp.f32 %v2991_v25  ;;  %v3254_v60 = vmul.f32 %v6912_v33, %v7334_v63  ;;  %v4299_v26 = vpop.eup %4298  ;;  %v3706_v18 = vmul.f32 -1.442695, %v3199_v36  ;;  %v3251_v13 = vadd.f32 %v3247_v21, %v3241_v7 }
 0x262   :  { %4314 = vrcp.f32 %v2992_v56  ;;  %v3255_v11 = vmul.f32 %v6924_v8, %v7334_v63  ;;  %v3707_v61 = vmul.f32 -1.442695, %v3200_v16  ;;  %v3256_v54 = vmul.f32 %v6930_v12, %v7334_v63 }
 0x263   :  { %v4301_v30 = vpop.eup %4300  ;;  %4316 = vrcp.f32 %v2993_v29  ;;  %v3257_v38 = vmul.f32 %v6946_v40, %v7334_v63  ;;  %v3708_v27 = vmul.f32 -1.442695, %v3201_v19  ;;  %v3258_v33 = vadd.f32 %v3254_v60, %v3248_v1 }
 0x264   :  { %v4303_v10 = vpop.eup %4302  ;;  %4318 = vpow2.f32 %v3705_v43  ;;  %v3062_v2 = vadd.f32 1.0, %v4295_v48  ;;  %v3063_v6 = vadd.f32 1.0, %v4297_v57  ;;  %v3259_v53 = vadd.f32 %v3255_v11, %v3249_v51 }
 0x265   :  { %v4305_v37 = vpop.eup %4304  ;;  %v3260_v34 = vadd.f32 %v3256_v54, %v3250_v32  ;;  %4320 = vpow2.f32 %v3706_v18  ;;  %v3261_v8 = vadd.f32 %v3257_v38, %v3251_v13  ;;  %v3264_v4 = vmul.f32 %v6932_v28, %v7335_v0  ;;  %v7337_v13 = vld [vmem:[#allocation21_spill] sm:$0xff] }
 0x266   :  { %v3265_v12 = vmul.f32 %v6950_v35, %v7335_v0  ;;  %v3064_v39 = vadd.f32 1.0, %v4299_v26  ;;  %4322 = vpow2.f32 %v3707_v61  ;;  %v3266_v40 = vmul.f32 %v6960_v46, %v7335_v0 }
 0x267   :  { %v3267_v5 = vmul.f32 %v6967_v50, %v7335_v0  ;;  %v4307_v49 = vpop.eup %4306  ;;  %v3065_v22 = vadd.f32 1.0, %v4301_v30  ;;  %4324 = vpow2.f32 %v3708_v27  ;;  %v3268_v25 = vadd.f32 %v3264_v4, %v3258_v33  ;;  %v7338_v30 = vld [vmem:[#allocation24_spill] sm:$0xff] }
 0x268   :  { %v3269_v55 = vadd.f32 %v3265_v12, %v3259_v53  ;;  %4326 = vrcp.f32 %v3062_v2  ;;  %v3138_v56 = vadd.f32 1.0, %v4303_v10  ;;  %v3270_v28 = vadd.f32 %v3266_v40, %v3260_v34  ;;  %v7339_v12 = vld [vmem:[#allocation25_spill] sm:$0xff] }
 0x269   :  { %v4309_v15 = vpop.eup %4308  ;;  %v3271_v44 = vadd.f32 %v3267_v5, %v3261_v8  ;;  %4328 = vrcp.f32 %v3063_v6  ;;  %v3139_v35 = vadd.f32 1.0, %v4305_v37  ;;  %v3274_v47 = vadd.f32 %v3268_v25, %v7336_v17 }
 0x26a   :  { %v4311_v41 = vpop.eup %4310  ;;  %v3275_v46 = vadd.f32 %v3269_v55, %v7336_v17  ;;  %4330 = vrcp.f32 %v3064_v39  ;;  %v3140_v50 = vadd.f32 1.0, %v4307_v49  ;;  %v3276_v9 = vadd.f32 %v3270_v28, %v7336_v17 }
 0x26b   :  { %v4313_v58 = vpop.eup %4312  ;;  %4332 = vrcp.f32 %v3065_v22  ;;  %v3277_v14 = vadd.f32 %v3271_v44, %v7336_v17  ;;  %v3715_v20 = vmul.f32 -1.442695, %v3274_v47  ;;  %v3141_v62 = vadd.f32 1.0, %v4311_v41 }
 0x26c   :  { %v4315_v23 = vpop.eup %4314  ;;  %4334 = vrcp.f32 %v3138_v56  ;;  %v3716_v59 = vmul.f32 -1.442695, %v3275_v46  ;;  %v3717_v45 = vmul.f32 -1.442695, %v3276_v9  ;;  %v3004_v11 = vmul.f32 %v4309_v15, %v7337_v13 }
 0x26d   :  { %v4317_v52 = vpop.eup %4316  ;;  %4336 = vrcp.f32 %v3139_v35  ;;  %v3718_v36 = vmul.f32 -1.442695, %v3277_v14  ;;  %v3005_v27 = vmul.f32 %v4313_v58, %v7337_v13  ;;  %v3006_v33 = vmul.f32 %v4315_v23, %v7337_v13 }
 0x26e   :  { %v4319_v3 = vpop.eup %4318  ;;  %4338 = vrcp.f32 %v3140_v50  ;;  %v3007_v6 = vmul.f32 %v4317_v52, %v7337_v13 }
 0x26f   :  { %v4321_v48 = vpop.eup %4320  ;;  %4340 = vpow2.f32 %v3715_v20  ;;  %v3214_v21 = vadd.f32 1.0, %v4319_v3 }
 0x270   :  { %v4323_v7 = vpop.eup %4322  ;;  %4342 = vrcp.f32 %v3141_v62  ;;  %v3215_v16 = vadd.f32 1.0, %v4321_v48 }
 0x271   :  { %v4325_v57 = vpop.eup %4324  ;;  %4344 = vpow2.f32 %v3716_v59  ;;  %v3216_v43 = vadd.f32 1.0, %v4323_v7 }
 0x272   :  { %v4327_v29 = vpop.eup %4326  ;;  %4346 = vpow2.f32 %v3717_v45  ;;  %v3217_v51 = vadd.f32 1.0, %v4325_v57 }
 0x273   :  { %v4329_v19 = vpop.eup %4328  ;;  %4348 = vpow2.f32 %v3718_v36  ;;  %v3076_v61 = vmul.f32 %v4327_v29, %v7338_v30 }
 0x274   :  { %v4331_v1 = vpop.eup %4330  ;;  %4350 = vrcp.f32 %v3214_v21  ;;  %v3077_v37 = vmul.f32 %v4329_v19, %v7338_v30 }
 0x275   :  { %v4333_v32 = vpop.eup %4332  ;;  %4352 = vrcp.f32 %v3215_v16  ;;  %v3078_v53 = vmul.f32 %v4331_v1, %v7338_v30  ;;  %v3080_v4 = vadd.f32 %v3076_v61, %v3004_v11 }
 0x276   :  { %v4335_v63 = vpop.eup %4334  ;;  %4354 = vrcp.f32 %v3216_v43  ;;  %v3079_v0 = vmul.f32 %v4333_v32, %v7338_v30  ;;  %v3081_v22 = vadd.f32 %v3077_v37, %v3005_v27 }
 0x277   :  { %v4337_v60 = vpop.eup %4336  ;;  %4356 = vrcp.f32 %v3217_v51  ;;  %v3152_v39 = vmul.f32 %v4335_v63, %v7339_v12  ;;  %v3082_v15 = vadd.f32 %v3078_v53, %v3006_v33 }
 0x278   :  { %v4339_v26 = vpop.eup %4338  ;;  %v3153_v25 = vmul.f32 %v4337_v60, %v7339_v12  ;;  %v3083_v44 = vadd.f32 %v3079_v0, %v3007_v6 }
 0x279   :  { %v4341_v18 = vpop.eup %4340  ;;  %v3154_v56 = vmul.f32 %v4339_v26, %v7339_v12  ;;  %v3156_v35 = vadd.f32 %v3152_v39, %v3080_v4 }
 0x27a   :  { %v4343_v54 = vpop.eup %4342  ;;  %v3290_v38 = vadd.f32 1.0, %v4341_v18  ;;  %v3157_v46 = vadd.f32 %v3153_v25, %v3081_v22 }
 0x27b   :  { %v4345_v10 = vpop.eup %4344  ;;  %v3155_v41 = vmul.f32 %v4343_v54, %v7339_v12  ;;  %v3158_v50 = vadd.f32 %v3154_v56, %v3082_v15 }
 0x27c   :  { %v4347_v2 = vpop.eup %4346  ;;  %v3291_v34 = vadd.f32 1.0, %v4345_v10  ;;  %4358 = vrcp.f32 %v3290_v38 }
 0x27d   :  { %v4349_v8 = vpop.eup %4348  ;;  %v3292_v40 = vadd.f32 1.0, %v4347_v2  ;;  %v3159_v23 = vadd.f32 %v3155_v41, %v3083_v44 }
 0x27e   :  { %v4351_v5 = vpop.eup %4350  ;;  %v3293_v49 = vadd.f32 1.0, %v4349_v8  ;;  %4360 = vrcp.f32 %v3291_v34 }
 0x27f   :  { %4362 = vrcp.f32 %v3292_v40  ;;  %v4353_v55 = vpop.eup %4352  ;;  %v3228_v17 = vmul.f32 %v4351_v5, %v6977_v42 }
 0x280   :  { %4364 = vrcp.f32 %v3293_v49  ;;  %v4355_v28 = vpop.eup %4354  ;;  %v3229_v58 = vmul.f32 %v4353_v55, %v6977_v42 }
 0x281   :  { %v4357_v47 = vpop.eup %4356  ;;  %v3230_v9 = vmul.f32 %v4355_v28, %v6977_v42  ;;  %v3232_v20 = vadd.f32 %v3228_v17, %v3156_v35 }
 0x282   :  { %v3231_v14 = vmul.f32 %v4357_v47, %v6977_v42  ;;  %v3233_v62 = vadd.f32 %v3229_v58, %v3157_v46 }
 0x283   :  { %v3234_v45 = vadd.f32 %v3230_v9, %v3158_v50 }
 0x284   :  { %v3235_v36 = vadd.f32 %v3231_v14, %v3159_v23 }
 0x286   :  { %v4359_v52 = vpop.eup %4358 }
 0x287   :  { %v3304_v3 = vmul.f32 %v4359_v52, %v6982_v31 }
 0x288   :  { %v4361_v59 = vpop.eup %4360 }
 0x289   :  { %v4363_v48 = vpop.eup %4362  ;;  %v3305_v7 = vmul.f32 %v4361_v59, %v6982_v31  ;;  %v3308_v21 = vadd.f32 %v3304_v3, %v3232_v20 }
 0x28a   :  { %v4365_v57 = vpop.eup %4364  ;;  %v3306_v29 = vmul.f32 %v4363_v48, %v6982_v31 }
 0x28b   :  { %v3307_v16 = vmul.f32 %v4365_v57, %v6982_v31  ;;  %v3309_v19 = vadd.f32 %v3305_v7, %v3233_v62  ;;  %v3314_v42 = vadd.f32 %v3308_v21, %v4542_v24 }
 0x28c   :  { %v3310_v43 = vadd.f32 %v3306_v29, %v3234_v45 }
 0x28d   :  { %v3311_v1 = vadd.f32 %v3307_v16, %v3235_v36  ;;  %v3315_v51 = vadd.f32 %v3309_v19, %v4542_v24  ;;  %3318 = vst [vmem:[#allocation10 + $0xe0] sm:$0xff] %v3314_v42 }
 0x28e   :  { %v3316_v32 = vadd.f32 %v3310_v43, %v4542_v24 }
 0x28f   :  { %v3317_v63 = vadd.f32 %v3311_v1, %v4542_v24  ;;  %3319 = vst [vmem:[#allocation10 + $0xe8] sm:$0xff] %v3315_v51 }
 0x290   :  { %3320 = vst [vmem:[#allocation10 + $0xf0] sm:$0xff] %v3316_v32 }
 0x291   :  { %3321 = vst [vmem:[#allocation10 + $0xf8] sm:$0xff] %v3317_v63 }
 0x292   :  { %3326 = vsyncadd [#allocation5], 4080  ;;  %s4435_s14 = smov [#allocation10]  }
 0x293   :  { %s3327_s15 = sshll.u32 %s4435_s14, 4  ;;  %s3328_s15 = int_to_ptr.vmem [resolvable:$true] %s3327_s15 }
 0x294   :  { %s4404_s16 = scalar_lea.vmem %s3328_s15, 16  ;;  %s4408_s17 = scalar_lea.vmem %s3328_s15, 4096 }
 0x295   :  { %p4405_p1 = scmp.ne.s32.totalorder %s3328_s15, %s4404_s16  ;;  %p4409_p2 = scmp.lt.s32.totalorder %s3328_s15, %s3328_s15 }
 0x296   :  { %p4410_p3 = scmp.lt.s32.totalorder %s4408_s17, %s4404_s16 }
 0x298   :  { %p4411_p4 = por %p4410_p3, %p4409_p2 }
 0x29a   :  { %p4412_p5 = pnand %p4411_p4, %p4405_p1 }
 0x29c   :  { %4415 = shalt.err (!%p4412_p5)
}
 0x29d   :  { %s4416_s20 = scalar_lea.hbm %s7191_s5, 16 }
 0x29e   :  { %p4417_p6 = scmp.ne.s32.totalorder %s7191_s5, %s4416_s20  ;;  %p4420_p7 = scmp.lt.u32.totalorder %s4416_s20, %s7191_s5 }
 0x2a0   :  { %p4422_p8 = pnand %p4420_p7, %p4417_p6 }
 0x2a2   :  { %4425 = shalt.err (!%p4422_p8)
}
 0x2a3   :  { %s4436_s24 = smov 16   ;;  %s4437_s25 = smov 1  }
 0x2a4   :  { %3333 = dma.vmem_to_hbm [thread:$0]  %s3328_s15, 16, %s7191_s5, [#allocation5], %s4436_s24, %s4436_s24, %s4437_s25  }
 0x2a5   :  { %4430 = dma.done.wait [#allocation5], 4096  }
 0x2a6   :  { %4431 = vsyncadd [#allocation5], 4294963200 }
 0x2a7   :  { %3337 = vsyncpa [#allocation5], 1 }
 0x2a8   :  { %3338 = vsyncpa [#allocation6], 1 }
 0x2a9   :  { %3339 = vsyncpa [#allocation8], 1 }

</bundles_post_ra>
